<compile_context>
chip_gen: v7x
topology: tpu7x:2x2x1
jax: 0.10.0
libtpu: 0.0.40
codegen_flags: <defaults>
</compile_context>

<pallas_src>
import functools

import jax
import jax.numpy as jnp
import numpy as np
from jax import lax
from jax.experimental import pallas as pl
from jax.experimental.pallas import tpu as pltpu


def _sigmoid(x):
    # tanh-form sigmoid: one EUP op + VPU ops, numerically stable, lowers cleanly.
    return 0.5 * (jnp.tanh(0.5 * x) + 1.0)


def _lstm_chunk_kernel(x_ref, lens_ref, wih_ref, whh_ref, b_ref,
                       fcw_ref, fcb_ref, out_ref,
                       h_scr, c_scr, hlast_scr, xw_scr,
                       *, t_chunk, unroll, compute_dtype):
    """One grid step = one (batch_tile, time_chunk) cell.

    x_ref:     (t_chunk * B_tile, E)   time-major, contiguous chunk of inputs
    xw_scr:    (t_chunk * B_tile, 4Hp) chunk input projection x @ W_ih + bias (f32)
    h/c/hlast: (B_tile, Hp)            persistent f32 state across time chunks
    """
    c_idx = pl.program_id(1)                      # time-chunk index (inner axis)
    n_b, hid = h_scr.shape                        # (B_tile, Hp)

    @pl.when(c_idx == 0)
    def _init():
        h_scr[...] = jnp.zeros_like(h_scr)
        c_scr[...] = jnp.zeros_like(c_scr)
        hlast_scr[...] = jnp.zeros_like(hlast_scr)

    # Hoisted invariants: one load per chunk, not per timestep.
    w_hh = whh_ref[...]                           # (Hp, 4Hp) compute_dtype
    last_t = lens_ref[...] - 1                    # (B_tile, 1) int32

    # Whole-chunk input projection + bias as one MXU matmul, off the serial
    # recurrence path:  (Tc*B, E) @ (E, 4Hp) + (1, 4Hp)  -> f32 scratch.
    xw_scr[...] = (jnp.dot(x_ref[...], wih_ref[...],
                           preferred_element_type=jnp.float32)
                   + b_ref[...])

    t0 = c_idx * t_chunk

    def step(i, carry):
        h, c, h_last = carry
        off = pl.multiple_of(i * n_b, 8)          # B_tile is a multiple of 8
        # Single per-step matmul: recurrent projection only.
        gates = (xw_scr[pl.ds(off, n_b), :]
                 + jnp.dot(h.astype(compute_dtype), w_hh,
                           preferred_element_type=jnp.float32))
        # PyTorch gate order [i, f, g, o]; Hp % 128 == 0 -> whole-vreg lane slices.
        i_g = _sigmoid(gates[:, 0 * hid:1 * hid])
        f_g = _sigmoid(gates[:, 1 * hid:2 * hid])
        g_g = jnp.tanh(gates[:, 2 * hid:3 * hid])
        o_g = _sigmoid(gates[:, 3 * hid:4 * hid])
        c_new = f_g * c + i_g * g_g
        h_new = o_g * jnp.tanh(c_new)
        # pack_padded_sequence semantics, off the h/c critical path: capture the
        # hidden state at the last valid timestep. Padded rows (len=0) never match.
        h_last = jnp.where((t0 + i) == last_t, h_new, h_last)
        return h_new, c_new, h_last

    h_fin, c_fin, hl_fin = lax.fori_loop(
        0, t_chunk, step,
        (h_scr[...], c_scr[...], hlast_scr[...]),
        unroll=unroll)
    h_scr[...] = h_fin
    c_scr[...] = c_fin
    hlast_scr[...] = hl_fin

    @pl.when(c_idx == pl.num_programs(1) - 1)
    def _finalize():
        # classify(): BatchNorm = Identity, Dropout = eval no-op, then fc.
        out_ref[...] = (jnp.dot(hl_fin.astype(compute_dtype), fcw_ref[...],
                                preferred_element_type=jnp.float32)
                        + fcb_ref[...])


def _vmem_limit_bytes():
    """Generation-aware VMEM budget (leave headroom below physical capacity)."""
    try:
        info = pltpu.get_tpu_info()
        cap = getattr(info, "vmem_capacity_bytes", None)
        if cap:
            return min(int(cap * 0.85), 100 * 1024 * 1024)
    except Exception:
        pass
    return 48 * 1024 * 1024   # conservative: fits v7x (64 MiB) and older chips


def lstm_modal_forward(x, seq_lens, params, *, t_chunk=None, b_tile=None,
                       compute_dtype=jnp.bfloat16):
    """x: (B, T, E) batch-first (like PyTorch); seq_lens: (B,) int32, lens <= T."""
    B, T, E = x.shape
    H = params['w_hh_t'].shape[0]
    n_out = params['fc_w_t'].shape[1]
    Hp = ((H + 127) // 128) * 128          # lane-pad hidden so gate slices are whole vregs

    # ---- batch padding / tiling (sublane multiple of 8; tiles feed megacore) ----
    B8 = ((B + 7) // 8) * 8
    if b_tile is None:
        b_tile = min(B8, 128)
    b_tile = max(8, ((b_tile + 7) // 8) * 8)
    B_pad = ((B8 + b_tile - 1) // b_tile) * b_tile
    nb_tiles = B_pad // b_tile

    # ---- time-chunk sizing from the VMEM budget ----
    vmem_budget = _vmem_limit_bytes()
    comp_bytes = jnp.dtype(compute_dtype).itemsize
    weight_bytes = ((E * 4 * Hp + Hp * 4 * Hp + Hp * n_out) * comp_bytes
                    + (4 * Hp + n_out) * 4)
    if t_chunk is None:
        if T <= 128:
            t_chunk = T                     # single chunk: no grid overhead at all
        else:
            t_chunk = 8
            for cand in (128, 96, 64, 48, 32, 16, 8):
                foot = (2 * cand * b_tile * E * comp_bytes      # pipelined x chunk
                        + cand * b_tile * 4 * Hp * 4)           # xw_scr (f32)
                if weight_bytes + foot <= int(vmem_budget * 0.6):
                    t_chunk = cand
                    break
    t_chunk = max(1, int(t_chunk))
    T_pad = ((T + t_chunk - 1) // t_chunk) * t_chunk
    n_chunks = T_pad // t_chunk
    unroll = min(t_chunk, 8)               # partial unroll: LLO visibility w/o vreg spills

    # ---- data / parameter layout ----
    cdt = compute_dtype
    x_tm = jnp.transpose(x.astype(jnp.float32), (1, 0, 2))            # (T, B, E)
    x_tm = jnp.pad(x_tm, ((0, T_pad - T), (0, B_pad - B), (0, 0)))    # (T_pad, B_pad, E)
    # (T_pad, B_pad, E) -> (nb_tiles, T_pad, b_tile, E) -> flat 2-D so every grid
    # step's x block is one contiguous lane-dense slab.
    x_bt = x_tm.reshape(T_pad, nb_tiles, b_tile, E).transpose(1, 0, 2, 3)
    x_flat = x_bt.reshape(nb_tiles * T_pad * b_tile, E).astype(cdt)

    lens = jnp.pad(seq_lens.astype(jnp.int32), (0, B_pad - B)).reshape(B_pad, 1)

    def pad_gates(w):                      # last axis 4H -> 4Hp, per-gate zero pad
        parts = jnp.split(w, 4, axis=-1)
        pw = [(0, 0)] * (w.ndim - 1) + [(0, Hp - H)]
        return jnp.concatenate([jnp.pad(p, pw) for p in parts], axis=-1)

    w_ih = pad_gates(params['w_ih_t'].astype(jnp.float32)).astype(cdt)         # (E, 4Hp)
    w_hh = jnp.pad(pad_gates(params['w_hh_t'].astype(jnp.float32)),
                   ((0, Hp - H), (0, 0))).astype(cdt)                          # (Hp, 4Hp)
    bias = pad_gates(params['bias'].reshape(1, 4 * H).astype(jnp.float32))     # (1, 4Hp) f32
    fc_w = jnp.pad(params['fc_w_t'].astype(jnp.float32),
                   ((0, Hp - H), (0, 0))).astype(cdt)                          # (Hp, n_out)
    fc_b = params['fc_b'].reshape(1, n_out).astype(jnp.float32)                # (1, n_out) f32

    kernel = functools.partial(_lstm_chunk_kernel, t_chunk=t_chunk,
                               unroll=unroll, compute_dtype=cdt)

    def run(single_buffer):
        # Single-buffer the loop-invariant operands (constant index_map): the
        # second pipeline buffer is pure VMEM waste for resident weights.
        inv = dict(pipeline_mode=pl.Buffered(1)) if single_buffer else {}
        in_specs = [
            pl.BlockSpec((t_chunk * b_tile, E),
                         lambda bt, c: (bt * n_chunks + c, 0)),          # x chunk
            pl.BlockSpec((b_tile, 1), lambda bt, c: (bt, 0)),            # seq_lens
            pl.BlockSpec((E, 4 * Hp), lambda bt, c: (0, 0), **inv),      # W_ih^T
            pl.BlockSpec((Hp, 4 * Hp), lambda bt, c: (0, 0), **inv),     # W_hh^T
            pl.BlockSpec((1, 4 * Hp), lambda bt, c: (0, 0), **inv),      # b_ih + b_hh
            pl.BlockSpec((Hp, n_out), lambda bt, c: (0, 0), **inv),      # fc W^T
            pl.BlockSpec((1, n_out), lambda bt, c: (0, 0), **inv),       # fc b
        ]
        grid_spec = pltpu.PrefetchScalarGridSpec(
            num_scalar_prefetch=0,
            grid=(nb_tiles, n_chunks),           # batch tiles parallel, time serial
            in_specs=in_specs,
            out_specs=pl.BlockSpec((b_tile, n_out), lambda bt, c: (bt, 0)),
            scratch_shapes=[
                pltpu.VMEM((b_tile, Hp), jnp.float32),                   # h state
                pltpu.VMEM((b_tile, Hp), jnp.float32),                   # c state
                pltpu.VMEM((b_tile, Hp), jnp.float32),                   # h @ last valid t
                pltpu.VMEM((t_chunk * b_tile, 4 * Hp), jnp.float32),     # x@W_ih + b
            ],
        )
        out = pl.pallas_call(
            kernel,
            out_shape=jax.ShapeDtypeStruct((B_pad, n_out), jnp.float32),
            grid_spec=grid_spec,
            compiler_params=pltpu.CompilerParams(
                dimension_semantics=("parallel", "arbitrary"),
                vmem_limit_bytes=vmem_budget),
        )(x_flat, lens, w_ih, w_hh, bias, fc_w, fc_b)
        return jax.block_until_ready(out)

    try:
        out = run(single_buffer=True)
    except Exception:
        # Fallback if this Pallas build rejects pl.Buffered(1): default
        # double-buffering only wastes VMEM on invariant weights, still correct.
        out = run(single_buffer=False)

    return out[:B]


def reference_forward(x, seq_lens, params):
    """Pure-JAX reference mirroring PyTorch LSTM_modal (eval mode), all f32."""
    B, T, E = x.shape
    H = params['w_hh_t'].shape[0]
    h = jnp.zeros((B, H), jnp.float32)
    c = jnp.zeros((B, H), jnp.float32)
    for t in range(T):
        gates = x[:, t, :] @ params['w_ih_t'] + h @ params['w_hh_t'] + params['bias']
        i_g = _sigmoid(gates[:, 0 * H:1 * H])
        f_g = _sigmoid(gates[:, 1 * H:2 * H])
        g_g = jnp.tanh(gates[:, 2 * H:3 * H])
        o_g = _sigmoid(gates[:, 3 * H:4 * H])
        c_new = f_g * c + i_g * g_g
        h_new = o_g * jnp.tanh(c_new)
        m = (t < seq_lens).reshape(B, 1)
        h = jnp.where(m, h_new, h)
        c = jnp.where(m, c_new, c)
    return h @ params['fc_w_t'] + params['fc_b']


def make_params(key, n_embed, n_hidden, n_output):
    """Deterministic synthetic parameters (PyTorch-like uniform init)."""
    ks = jax.random.split(key, 6)
    k = 1.0 / np.sqrt(n_hidden)
    u = lambda kk, shape: jax.random.uniform(kk, shape, jnp.float32, -k, k)
    return {
        'w_ih_t': u(ks[0], (n_embed, 4 * n_hidden)),   # = weight_ih_l0.T
        'w_hh_t': u(ks[1], (n_hidden, 4 * n_hidden)),  # = weight_hh_l0.T
        'bias':   u(ks[2], (4 * n_hidden,)) + u(ks[3], (4 * n_hidden,)),  # b_ih + b_hh
        'fc_w_t': u(ks[4], (n_hidden, n_output)),      # = fc.weight.T
        'fc_b':   u(ks[5], (n_output,)),
    }


if __name__ == "__main__":
    # config: n_embed=16, n_hidden=32, n_layers=1, b_dir=False, n_output=8,
    #         batch_norm=False (Identity), dropout eval mode.
    B, T, E, H, n_out = 2, 8, 16, 32, 8

    key = jax.random.PRNGKey(0)
    kx, kp = jax.random.split(key)
    x = jax.random.normal(kx, (B, T, E), jnp.float32)
    seq_lens = jnp.array([8, 5], jnp.int32)   # descending (pack_padded_sequence req.)
    params = make_params(kp, E, H, n_out)

    ref = reference_forward(x, seq_lens, params)

    # f32 path: tight check against the pure-JAX reference.
    out_f32 = lstm_modal_forward(x, seq_lens, params, compute_dtype=jnp.float32)
    out_f32 = jax.block_until_ready(out_f32)
    np.testing.assert_allclose(np.asarray(out_f32), np.asarray(ref),
                               atol=1e-4, rtol=1e-4)

    # Default bf16-weight path (halves weight VMEM/DMA, native MXU precision).
    out_bf16 = lstm_modal_forward(x, seq_lens, params)
    out_bf16 = jax.block_until_ready(out_bf16)
    np.testing.assert_allclose(np.asarray(out_bf16), np.asarray(ref),
                               atol=5e-2, rtol=5e-2)

    print("KERNEL_OK")
</pallas_src>

<mosaic_0001>
module attributes {stable_mosaic.version = 11 : i64} {
  func.func @_lstm_chunk_kernel(%arg0: i32, %arg1: i32, %arg2: memref<64x16xf32, #tpu.memory_space<vmem>>, %arg3: memref<8x1xi32, #tpu.memory_space<vmem>>, %arg4: memref<16x512xf32, #tpu.memory_space<vmem>>, %arg5: memref<128x512xf32, #tpu.memory_space<vmem>>, %arg6: memref<1x512xf32, #tpu.memory_space<vmem>>, %arg7: memref<128x8xf32, #tpu.memory_space<vmem>>, %arg8: memref<1x8xf32, #tpu.memory_space<vmem>>, %arg9: memref<8x8xf32, #tpu.memory_space<vmem>>, %arg10: memref<8x128xf32, #tpu.memory_space<vmem>>, %arg11: memref<8x128xf32, #tpu.memory_space<vmem>>, %arg12: memref<8x128xf32, #tpu.memory_space<vmem>>, %arg13: memref<64x512xf32, #tpu.memory_space<vmem>>) attributes {dimension_semantics = [#tpu.dimension_semantics<parallel>, #tpu.dimension_semantics<arbitrary>], iteration_bounds = array<i64: 1, 1>, scalar_prefetch = 0 : i64, scratch_operands = 4 : i64, tpu.core_type = #tpu.core_type<tc>, window_params = [{transform_indices = @transform_0, window_bounds = array<i64: 64, 16>}, {transform_indices = @transform_1, window_bounds = array<i64: 8, 1>}, {pipeline_mode = #tpu.pipeline_mode<synchronous>, transform_indices = @transform_2, window_bounds = array<i64: 16, 512>}, {pipeline_mode = #tpu.pipeline_mode<synchronous>, transform_indices = @transform_3, window_bounds = array<i64: 128, 512>}, {pipeline_mode = #tpu.pipeline_mode<synchronous>, transform_indices = @transform_4, window_bounds = array<i64: 1, 512>}, {pipeline_mode = #tpu.pipeline_mode<synchronous>, transform_indices = @transform_5, window_bounds = array<i64: 128, 8>}, {pipeline_mode = #tpu.pipeline_mode<synchronous>, transform_indices = @transform_6, window_bounds = array<i64: 1, 8>}, {transform_indices = @transform_7, window_bounds = array<i64: 8, 8>}]} {
    %c0_i32 = arith.constant 0 : i32
    %0 = arith.cmpi eq, %arg1, %c0_i32 : i32
    %1 = arith.extui %0 : i1 to i32
    %c0_i32_0 = arith.constant 0 : i32
    %2 = arith.cmpi ne, %1, %c0_i32_0 : i32
    scf.if %2 {
      %cst_125 = arith.constant 0.000000e+00 : f32
      %368 = vector.broadcast %cst_125 : f32 to vector<8x128xf32>
      %c0_126 = arith.constant 0 : index
      %c0_127 = arith.constant 0 : index
      %369 = vector.load %arg10[%c0_126, %c0_127] : memref<8x128xf32, #tpu.memory_space<vmem>>, vector<8x128xf32>
      tpu.vector_store %arg10[%c0_126, %c0_127], %368 {strides = array<i32>} : memref<8x128xf32, #tpu.memory_space<vmem>>, vector<8x128xf32>,
      %cst_128 = arith.constant 0.000000e+00 : f32
      %370 = vector.broadcast %cst_128 : f32 to vector<8x128xf32>
      %c0_129 = arith.constant 0 : index
      %c0_130 = arith.constant 0 : index
      %371 = vector.load %arg11[%c0_129, %c0_130] : memref<8x128xf32, #tpu.memory_space<vmem>>, vector<8x128xf32>
      tpu.vector_store %arg11[%c0_129, %c0_130], %370 {strides = array<i32>} : memref<8x128xf32, #tpu.memory_space<vmem>>, vector<8x128xf32>,
      %cst_131 = arith.constant 0.000000e+00 : f32
      %372 = vector.broadcast %cst_131 : f32 to vector<8x128xf32>
      %c0_132 = arith.constant 0 : index
      %c0_133 = arith.constant 0 : index
      %373 = vector.load %arg12[%c0_132, %c0_133] : memref<8x128xf32, #tpu.memory_space<vmem>>, vector<8x128xf32>
      tpu.vector_store %arg12[%c0_132, %c0_133], %372 {strides = array<i32>} : memref<8x128xf32, #tpu.memory_space<vmem>>, vector<8x128xf32>,
    } else {
    }
    %c0 = arith.constant 0 : index
    %c0_1 = arith.constant 0 : index
    %3 = vector.load %arg5[%c0, %c0_1] : memref<128x512xf32, #tpu.memory_space<vmem>>, vector<128x512xf32>
    %c0_2 = arith.constant 0 : index
    %c0_3 = arith.constant 0 : index
    %4 = vector.load %arg3[%c0_2, %c0_3] : memref<8x1xi32, #tpu.memory_space<vmem>>, vector<8x1xi32>
    %c1_i32 = arith.constant 1 : i32
    %5 = vector.broadcast %c1_i32 : i32 to vector<8x1xi32>
    %6 = arith.subi %4, %5 : vector<8x1xi32>
    %c0_4 = arith.constant 0 : index
    %c0_5 = arith.constant 0 : index
    %7 = vector.load %arg2[%c0_4, %c0_5] : memref<64x16xf32, #tpu.memory_space<vmem>>, vector<64x16xf32>
    %c0_6 = arith.constant 0 : index
    %c0_7 = arith.constant 0 : index
    %8 = vector.load %arg4[%c0_6, %c0_7] : memref<16x512xf32, #tpu.memory_space<vmem>>, vector<16x512xf32>
    %cst = arith.constant dense<0.000000e+00> : vector<64x512xf32>
    %9 = tpu.matmul %7, %8, %cst {dimension_numbers = #tpu.dot_dimension_numbers<[1], [0], [0], [1], [0, 0, 1, 1], [], []>} : vector<64x16xf32>, vector<16x512xf32>, vector<64x512xf32> -> vector<64x512xf32>
    %c0_8 = arith.constant 0 : index
    %c0_9 = arith.constant 0 : index
    %10 = vector.load %arg6[%c0_8, %c0_9] : memref<1x512xf32, #tpu.memory_space<vmem>>, vector<1x512xf32>
    %11 = vector.broadcast %10 : vector<1x512xf32> to vector<64x512xf32>
    %12 = arith.addf %9, %11 : vector<64x512xf32>
    %c0_10 = arith.constant 0 : index
    %c0_11 = arith.constant 0 : index
    %13 = vector.load %arg13[%c0_10, %c0_11] : memref<64x512xf32, #tpu.memory_space<vmem>>, vector<64x512xf32>
    tpu.vector_store %arg13[%c0_10, %c0_11], %12 {strides = array<i32>} : memref<64x512xf32, #tpu.memory_space<vmem>>, vector<64x512xf32>,
    %c8_i32 = arith.constant 8 : i32
    %14 = arith.muli %arg1, %c8_i32 : i32
    %c0_12 = arith.constant 0 : index
    %c0_13 = arith.constant 0 : index
    %15 = vector.load %arg10[%c0_12, %c0_13] : memref<8x128xf32, #tpu.memory_space<vmem>>, vector<8x128xf32>
    %c0_14 = arith.constant 0 : index
    %c0_15 = arith.constant 0 : index
    %16 = vector.load %arg11[%c0_14, %c0_15] : memref<8x128xf32, #tpu.memory_space<vmem>>, vector<8x128xf32>
    %c0_16 = arith.constant 0 : index
    %c0_17 = arith.constant 0 : index
    %17 = vector.load %arg12[%c0_16, %c0_17] : memref<8x128xf32, #tpu.memory_space<vmem>>, vector<8x128xf32>
    %c0_i32_18 = arith.constant 0 : i32
    %c8_i32_19 = arith.constant 8 : i32
    %18 = arith.muli %c0_i32_18, %c8_i32_19 : i32
    %19 = tpu.assume_multiple %18, 8 : i32
    %20 = arith.index_cast %19 : i32 to index
    %c0_20 = arith.constant 0 : index
    %21 = vector.load %arg13[%20, %c0_20] : memref<64x512xf32, #tpu.memory_space<vmem>>, vector<8x512xf32>
    %cst_21 = arith.constant dense<0.000000e+00> : vector<8x512xf32>
    %22 = tpu.matmul %15, %3, %cst_21 {dimension_numbers = #tpu.dot_dimension_numbers<[1], [0], [0], [1], [0, 0, 1, 1], [], []>} : vector<8x128xf32>, vector<128x512xf32>, vector<8x512xf32> -> vector<8x512xf32>
    %23 = arith.addf %21, %22 : vector<8x512xf32>
    %24 = vector.extract_strided_slice %23 {offsets = [0, 0], sizes = [8, 128], strides = [1, 1]} : vector<8x512xf32> to vector<8x128xf32>
    %cst_22 = arith.constant 5.000000e-01 : f32
    %25 = vector.broadcast %cst_22 : f32 to vector<8x128xf32>
    %26 = arith.mulf %25, %24 : vector<8x128xf32>
    %27 = math.tanh %26 : vector<8x128xf32>
    %cst_23 = arith.constant 1.000000e+00 : f32
    %28 = vector.broadcast %cst_23 : f32 to vector<8x128xf32>
    %29 = arith.addf %27, %28 : vector<8x128xf32>
    %cst_24 = arith.constant 5.000000e-01 : f32
    %30 = vector.broadcast %cst_24 : f32 to vector<8x128xf32>
    %31 = arith.mulf %30, %29 : vector<8x128xf32>
    %32 = vector.extract_strided_slice %23 {offsets = [0, 128], sizes = [8, 128], strides = [1, 1]} : vector<8x512xf32> to vector<8x128xf32>
    %cst_25 = arith.constant 5.000000e-01 : f32
    %33 = vector.broadcast %cst_25 : f32 to vector<8x128xf32>
    %34 = arith.mulf %33, %32 : vector<8x128xf32>
    %35 = math.tanh %34 : vector<8x128xf32>
    %cst_26 = arith.constant 1.000000e+00 : f32
    %36 = vector.broadcast %cst_26 : f32 to vector<8x128xf32>
    %37 = arith.addf %35, %36 : vector<8x128xf32>
    %cst_27 = arith.constant 5.000000e-01 : f32
    %38 = vector.broadcast %cst_27 : f32 to vector<8x128xf32>
    %39 = arith.mulf %38, %37 : vector<8x128xf32>
    %40 = vector.extract_strided_slice %23 {offsets = [0, 256], sizes = [8, 128], strides = [1, 1]} : vector<8x512xf32> to vector<8x128xf32>
    %41 = math.tanh %40 : vector<8x128xf32>
    %42 = vector.extract_strided_slice %23 {offsets = [0, 384], sizes = [8, 128], strides = [1, 1]} : vector<8x512xf32> to vector<8x128xf32>
    %cst_28 = arith.constant 5.000000e-01 : f32
    %43 = vector.broadcast %cst_28 : f32 to vector<8x128xf32>
    %44 = arith.mulf %43, %42 : vector<8x128xf32>
    %45 = math.tanh %44 : vector<8x128xf32>
    %cst_29 = arith.constant 1.000000e+00 : f32
    %46 = vector.broadcast %cst_29 : f32 to vector<8x128xf32>
    %47 = arith.addf %45, %46 : vector<8x128xf32>
    %cst_30 = arith.constant 5.000000e-01 : f32
    %48 = vector.broadcast %cst_30 : f32 to vector<8x128xf32>
    %49 = arith.mulf %48, %47 : vector<8x128xf32>
    %50 = arith.mulf %39, %16 : vector<8x128xf32>
    %51 = arith.mulf %31, %41 : vector<8x128xf32>
    %52 = arith.addf %50, %51 : vector<8x128xf32>
    %53 = math.tanh %52 : vector<8x128xf32>
    %54 = arith.mulf %49, %53 : vector<8x128xf32>
    %55 = arith.addi %14, %c0_i32_18 : i32
    %56 = vector.broadcast %55 : i32 to vector<8x1xi32>
    %57 = arith.cmpi eq, %56, %6 : vector<8x1xi32>
    %58 = vector.shape_cast %57 : vector<8x1xi1> to vector<8x1xi1>
    %59 = vector.broadcast %58 : vector<8x1xi1> to vector<8x128xi1>
    %60 = arith.select %59, %54, %17 : vector<8x128xi1>, vector<8x128xf32>
    %c1_i32_31 = arith.constant 1 : i32
    %c8_i32_32 = arith.constant 8 : i32
    %61 = arith.muli %c1_i32_31, %c8_i32_32 : i32
    %62 = tpu.assume_multiple %61, 8 : i32
    %63 = arith.index_cast %62 : i32 to index
    %c0_33 = arith.constant 0 : index
    %64 = vector.load %arg13[%63, %c0_33] : memref<64x512xf32, #tpu.memory_space<vmem>>, vector<8x512xf32>
    %cst_34 = arith.constant dense<0.000000e+00> : vector<8x512xf32>
    %65 = tpu.matmul %54, %3, %cst_34 {dimension_numbers = #tpu.dot_dimension_numbers<[1], [0], [0], [1], [0, 0, 1, 1], [], []>} : vector<8x128xf32>, vector<128x512xf32>, vector<8x512xf32> -> vector<8x512xf32>
    %66 = arith.addf %64, %65 : vector<8x512xf32>
    %67 = vector.extract_strided_slice %66 {offsets = [0, 0], sizes = [8, 128], strides = [1, 1]} : vector<8x512xf32> to vector<8x128xf32>
    %cst_35 = arith.constant 5.000000e-01 : f32
    %68 = vector.broadcast %cst_35 : f32 to vector<8x128xf32>
    %69 = arith.mulf %68, %67 : vector<8x128xf32>
    %70 = math.tanh %69 : vector<8x128xf32>
    %cst_36 = arith.constant 1.000000e+00 : f32
    %71 = vector.broadcast %cst_36 : f32 to vector<8x128xf32>
    %72 = arith.addf %70, %71 : vector<8x128xf32>
    %cst_37 = arith.constant 5.000000e-01 : f32
    %73 = vector.broadcast %cst_37 : f32 to vector<8x128xf32>
    %74 = arith.mulf %73, %72 : vector<8x128xf32>
    %75 = vector.extract_strided_slice %66 {offsets = [0, 128], sizes = [8, 128], strides = [1, 1]} : vector<8x512xf32> to vector<8x128xf32>
    %cst_38 = arith.constant 5.000000e-01 : f32
    %76 = vector.broadcast %cst_38 : f32 to vector<8x128xf32>
    %77 = arith.mulf %76, %75 : vector<8x128xf32>
    %78 = math.tanh %77 : vector<8x128xf32>
    %cst_39 = arith.constant 1.000000e+00 : f32
    %79 = vector.broadcast %cst_39 : f32 to vector<8x128xf32>
    %80 = arith.addf %78, %79 : vector<8x128xf32>
    %cst_40 = arith.constant 5.000000e-01 : f32
    %81 = vector.broadcast %cst_40 : f32 to vector<8x128xf32>
    %82 = arith.mulf %81, %80 : vector<8x128xf32>
    %83 = vector.extract_strided_slice %66 {offsets = [0, 256], sizes = [8, 128], strides = [1, 1]} : vector<8x512xf32> to vector<8x128xf32>
    %84 = math.tanh %83 : vector<8x128xf32>
    %85 = vector.extract_strided_slice %66 {offsets = [0, 384], sizes = [8, 128], strides = [1, 1]} : vector<8x512xf32> to vector<8x128xf32>
    %cst_41 = arith.constant 5.000000e-01 : f32
    %86 = vector.broadcast %cst_41 : f32 to vector<8x128xf32>
    %87 = arith.mulf %86, %85 : vector<8x128xf32>
    %88 = math.tanh %87 : vector<8x128xf32>
    %cst_42 = arith.constant 1.000000e+00 : f32
    %89 = vector.broadcast %cst_42 : f32 to vector<8x128xf32>
    %90 = arith.addf %88, %89 : vector<8x128xf32>
    %cst_43 = arith.constant 5.000000e-01 : f32
    %91 = vector.broadcast %cst_43 : f32 to vector<8x128xf32>
    %92 = arith.mulf %91, %90 : vector<8x128xf32>
    %93 = arith.mulf %82, %52 : vector<8x128xf32>
    %94 = arith.mulf %74, %84 : vector<8x128xf32>
    %95 = arith.addf %93, %94 : vector<8x128xf32>
    %96 = math.tanh %95 : vector<8x128xf32>
    %97 = arith.mulf %92, %96 : vector<8x128xf32>
    %98 = arith.addi %14, %c1_i32_31 : i32
    %99 = vector.broadcast %98 : i32 to vector<8x1xi32>
    %100 = arith.cmpi eq, %99, %6 : vector<8x1xi32>
    %101 = vector.shape_cast %100 : vector<8x1xi1> to vector<8x1xi1>
    %102 = vector.broadcast %101 : vector<8x1xi1> to vector<8x128xi1>
    %103 = arith.select %102, %97, %60 : vector<8x128xi1>, vector<8x128xf32>
    %c2_i32 = arith.constant 2 : i32
    %c8_i32_44 = arith.constant 8 : i32
    %104 = arith.muli %c2_i32, %c8_i32_44 : i32
    %105 = tpu.assume_multiple %104, 8 : i32
    %106 = arith.index_cast %105 : i32 to index
    %c0_45 = arith.constant 0 : index
    %107 = vector.load %arg13[%106, %c0_45] : memref<64x512xf32, #tpu.memory_space<vmem>>, vector<8x512xf32>
    %cst_46 = arith.constant dense<0.000000e+00> : vector<8x512xf32>
    %108 = tpu.matmul %97, %3, %cst_46 {dimension_numbers = #tpu.dot_dimension_numbers<[1], [0], [0], [1], [0, 0, 1, 1], [], []>} : vector<8x128xf32>, vector<128x512xf32>, vector<8x512xf32> -> vector<8x512xf32>
    %109 = arith.addf %107, %108 : vector<8x512xf32>
    %110 = vector.extract_strided_slice %109 {offsets = [0, 0], sizes = [8, 128], strides = [1, 1]} : vector<8x512xf32> to vector<8x128xf32>
    %cst_47 = arith.constant 5.000000e-01 : f32
    %111 = vector.broadcast %cst_47 : f32 to vector<8x128xf32>
    %112 = arith.mulf %111, %110 : vector<8x128xf32>
    %113 = math.tanh %112 : vector<8x128xf32>
    %cst_48 = arith.constant 1.000000e+00 : f32
    %114 = vector.broadcast %cst_48 : f32 to vector<8x128xf32>
    %115 = arith.addf %113, %114 : vector<8x128xf32>
    %cst_49 = arith.constant 5.000000e-01 : f32
    %116 = vector.broadcast %cst_49 : f32 to vector<8x128xf32>
    %117 = arith.mulf %116, %115 : vector<8x128xf32>
    %118 = vector.extract_strided_slice %109 {offsets = [0, 128], sizes = [8, 128], strides = [1, 1]} : vector<8x512xf32> to vector<8x128xf32>
    %cst_50 = arith.constant 5.000000e-01 : f32
    %119 = vector.broadcast %cst_50 : f32 to vector<8x128xf32>
    %120 = arith.mulf %119, %118 : vector<8x128xf32>
    %121 = math.tanh %120 : vector<8x128xf32>
    %cst_51 = arith.constant 1.000000e+00 : f32
    %122 = vector.broadcast %cst_51 : f32 to vector<8x128xf32>
    %123 = arith.addf %121, %122 : vector<8x128xf32>
    %cst_52 = arith.constant 5.000000e-01 : f32
    %124 = vector.broadcast %cst_52 : f32 to vector<8x128xf32>
    %125 = arith.mulf %124, %123 : vector<8x128xf32>
    %126 = vector.extract_strided_slice %109 {offsets = [0, 256], sizes = [8, 128], strides = [1, 1]} : vector<8x512xf32> to vector<8x128xf32>
    %127 = math.tanh %126 : vector<8x128xf32>
    %128 = vector.extract_strided_slice %109 {offsets = [0, 384], sizes = [8, 128], strides = [1, 1]} : vector<8x512xf32> to vector<8x128xf32>
    %cst_53 = arith.constant 5.000000e-01 : f32
    %129 = vector.broadcast %cst_53 : f32 to vector<8x128xf32>
    %130 = arith.mulf %129, %128 : vector<8x128xf32>
    %131 = math.tanh %130 : vector<8x128xf32>
    %cst_54 = arith.constant 1.000000e+00 : f32
    %132 = vector.broadcast %cst_54 : f32 to vector<8x128xf32>
    %133 = arith.addf %131, %132 : vector<8x128xf32>
    %cst_55 = arith.constant 5.000000e-01 : f32
    %134 = vector.broadcast %cst_55 : f32 to vector<8x128xf32>
    %135 = arith.mulf %134, %133 : vector<8x128xf32>
    %136 = arith.mulf %125, %95 : vector<8x128xf32>
    %137 = arith.mulf %117, %127 : vector<8x128xf32>
    %138 = arith.addf %136, %137 : vector<8x128xf32>
    %139 = math.tanh %138 : vector<8x128xf32>
    %140 = arith.mulf %135, %139 : vector<8x128xf32>
    %141 = arith.addi %14, %c2_i32 : i32
    %142 = vector.broadcast %141 : i32 to vector<8x1xi32>
    %143 = arith.cmpi eq, %142, %6 : vector<8x1xi32>
    %144 = vector.shape_cast %143 : vector<8x1xi1> to vector<8x1xi1>
    %145 = vector.broadcast %144 : vector<8x1xi1> to vector<8x128xi1>
    %146 = arith.select %145, %140, %103 : vector<8x128xi1>, vector<8x128xf32>
    %c3_i32 = arith.constant 3 : i32
    %c8_i32_56 = arith.constant 8 : i32
    %147 = arith.muli %c3_i32, %c8_i32_56 : i32
    %148 = tpu.assume_multiple %147, 8 : i32
    %149 = arith.index_cast %148 : i32 to index
    %c0_57 = arith.constant 0 : index
    %150 = vector.load %arg13[%149, %c0_57] : memref<64x512xf32, #tpu.memory_space<vmem>>, vector<8x512xf32>
    %cst_58 = arith.constant dense<0.000000e+00> : vector<8x512xf32>
    %151 = tpu.matmul %140, %3, %cst_58 {dimension_numbers = #tpu.dot_dimension_numbers<[1], [0], [0], [1], [0, 0, 1, 1], [], []>} : vector<8x128xf32>, vector<128x512xf32>, vector<8x512xf32> -> vector<8x512xf32>
    %152 = arith.addf %150, %151 : vector<8x512xf32>
    %153 = vector.extract_strided_slice %152 {offsets = [0, 0], sizes = [8, 128], strides = [1, 1]} : vector<8x512xf32> to vector<8x128xf32>
    %cst_59 = arith.constant 5.000000e-01 : f32
    %154 = vector.broadcast %cst_59 : f32 to vector<8x128xf32>
    %155 = arith.mulf %154, %153 : vector<8x128xf32>
    %156 = math.tanh %155 : vector<8x128xf32>
    %cst_60 = arith.constant 1.000000e+00 : f32
    %157 = vector.broadcast %cst_60 : f32 to vector<8x128xf32>
    %158 = arith.addf %156, %157 : vector<8x128xf32>
    %cst_61 = arith.constant 5.000000e-01 : f32
    %159 = vector.broadcast %cst_61 : f32 to vector<8x128xf32>
    %160 = arith.mulf %159, %158 : vector<8x128xf32>
    %161 = vector.extract_strided_slice %152 {offsets = [0, 128], sizes = [8, 128], strides = [1, 1]} : vector<8x512xf32> to vector<8x128xf32>
    %cst_62 = arith.constant 5.000000e-01 : f32
    %162 = vector.broadcast %cst_62 : f32 to vector<8x128xf32>
    %163 = arith.mulf %162, %161 : vector<8x128xf32>
    %164 = math.tanh %163 : vector<8x128xf32>
    %cst_63 = arith.constant 1.000000e+00 : f32
    %165 = vector.broadcast %cst_63 : f32 to vector<8x128xf32>
    %166 = arith.addf %164, %165 : vector<8x128xf32>
    %cst_64 = arith.constant 5.000000e-01 : f32
    %167 = vector.broadcast %cst_64 : f32 to vector<8x128xf32>
    %168 = arith.mulf %167, %166 : vector<8x128xf32>
    %169 = vector.extract_strided_slice %152 {offsets = [0, 256], sizes = [8, 128], strides = [1, 1]} : vector<8x512xf32> to vector<8x128xf32>
    %170 = math.tanh %169 : vector<8x128xf32>
    %171 = vector.extract_strided_slice %152 {offsets = [0, 384], sizes = [8, 128], strides = [1, 1]} : vector<8x512xf32> to vector<8x128xf32>
    %cst_65 = arith.constant 5.000000e-01 : f32
    %172 = vector.broadcast %cst_65 : f32 to vector<8x128xf32>
    %173 = arith.mulf %172, %171 : vector<8x128xf32>
    %174 = math.tanh %173 : vector<8x128xf32>
    %cst_66 = arith.constant 1.000000e+00 : f32
    %175 = vector.broadcast %cst_66 : f32 to vector<8x128xf32>
    %176 = arith.addf %174, %175 : vector<8x128xf32>
    %cst_67 = arith.constant 5.000000e-01 : f32
    %177 = vector.broadcast %cst_67 : f32 to vector<8x128xf32>
    %178 = arith.mulf %177, %176 : vector<8x128xf32>
    %179 = arith.mulf %168, %138 : vector<8x128xf32>
    %180 = arith.mulf %160, %170 : vector<8x128xf32>
    %181 = arith.addf %179, %180 : vector<8x128xf32>
    %182 = math.tanh %181 : vector<8x128xf32>
    %183 = arith.mulf %178, %182 : vector<8x128xf32>
    %184 = arith.addi %14, %c3_i32 : i32
    %185 = vector.broadcast %184 : i32 to vector<8x1xi32>
    %186 = arith.cmpi eq, %185, %6 : vector<8x1xi32>
    %187 = vector.shape_cast %186 : vector<8x1xi1> to vector<8x1xi1>
    %188 = vector.broadcast %187 : vector<8x1xi1> to vector<8x128xi1>
    %189 = arith.select %188, %183, %146 : vector<8x128xi1>, vector<8x128xf32>
    %c4_i32 = arith.constant 4 : i32
    %c8_i32_68 = arith.constant 8 : i32
    %190 = arith.muli %c4_i32, %c8_i32_68 : i32
    %191 = tpu.assume_multiple %190, 8 : i32
    %192 = arith.index_cast %191 : i32 to index
    %c0_69 = arith.constant 0 : index
    %193 = vector.load %arg13[%192, %c0_69] : memref<64x512xf32, #tpu.memory_space<vmem>>, vector<8x512xf32>
    %cst_70 = arith.constant dense<0.000000e+00> : vector<8x512xf32>
    %194 = tpu.matmul %183, %3, %cst_70 {dimension_numbers = #tpu.dot_dimension_numbers<[1], [0], [0], [1], [0, 0, 1, 1], [], []>} : vector<8x128xf32>, vector<128x512xf32>, vector<8x512xf32> -> vector<8x512xf32>
    %195 = arith.addf %193, %194 : vector<8x512xf32>
    %196 = vector.extract_strided_slice %195 {offsets = [0, 0], sizes = [8, 128], strides = [1, 1]} : vector<8x512xf32> to vector<8x128xf32>
    %cst_71 = arith.constant 5.000000e-01 : f32
    %197 = vector.broadcast %cst_71 : f32 to vector<8x128xf32>
    %198 = arith.mulf %197, %196 : vector<8x128xf32>
    %199 = math.tanh %198 : vector<8x128xf32>
    %cst_72 = arith.constant 1.000000e+00 : f32
    %200 = vector.broadcast %cst_72 : f32 to vector<8x128xf32>
    %201 = arith.addf %199, %200 : vector<8x128xf32>
    %cst_73 = arith.constant 5.000000e-01 : f32
    %202 = vector.broadcast %cst_73 : f32 to vector<8x128xf32>
    %203 = arith.mulf %202, %201 : vector<8x128xf32>
    %204 = vector.extract_strided_slice %195 {offsets = [0, 128], sizes = [8, 128], strides = [1, 1]} : vector<8x512xf32> to vector<8x128xf32>
    %cst_74 = arith.constant 5.000000e-01 : f32
    %205 = vector.broadcast %cst_74 : f32 to vector<8x128xf32>
    %206 = arith.mulf %205, %204 : vector<8x128xf32>
    %207 = math.tanh %206 : vector<8x128xf32>
    %cst_75 = arith.constant 1.000000e+00 : f32
    %208 = vector.broadcast %cst_75 : f32 to vector<8x128xf32>
    %209 = arith.addf %207, %208 : vector<8x128xf32>
    %cst_76 = arith.constant 5.000000e-01 : f32
    %210 = vector.broadcast %cst_76 : f32 to vector<8x128xf32>
    %211 = arith.mulf %210, %209 : vector<8x128xf32>
    %212 = vector.extract_strided_slice %195 {offsets = [0, 256], sizes = [8, 128], strides = [1, 1]} : vector<8x512xf32> to vector<8x128xf32>
    %213 = math.tanh %212 : vector<8x128xf32>
    %214 = vector.extract_strided_slice %195 {offsets = [0, 384], sizes = [8, 128], strides = [1, 1]} : vector<8x512xf32> to vector<8x128xf32>
    %cst_77 = arith.constant 5.000000e-01 : f32
    %215 = vector.broadcast %cst_77 : f32 to vector<8x128xf32>
    %216 = arith.mulf %215, %214 : vector<8x128xf32>
    %217 = math.tanh %216 : vector<8x128xf32>
    %cst_78 = arith.constant 1.000000e+00 : f32
    %218 = vector.broadcast %cst_78 : f32 to vector<8x128xf32>
    %219 = arith.addf %217, %218 : vector<8x128xf32>
    %cst_79 = arith.constant 5.000000e-01 : f32
    %220 = vector.broadcast %cst_79 : f32 to vector<8x128xf32>
    %221 = arith.mulf %220, %219 : vector<8x128xf32>
    %222 = arith.mulf %211, %181 : vector<8x128xf32>
    %223 = arith.mulf %203, %213 : vector<8x128xf32>
    %224 = arith.addf %222, %223 : vector<8x128xf32>
    %225 = math.tanh %224 : vector<8x128xf32>
    %226 = arith.mulf %221, %225 : vector<8x128xf32>
    %227 = arith.addi %14, %c4_i32 : i32
    %228 = vector.broadcast %227 : i32 to vector<8x1xi32>
    %229 = arith.cmpi eq, %228, %6 : vector<8x1xi32>
    %230 = vector.shape_cast %229 : vector<8x1xi1> to vector<8x1xi1>
    %231 = vector.broadcast %230 : vector<8x1xi1> to vector<8x128xi1>
    %232 = arith.select %231, %226, %189 : vector<8x128xi1>, vector<8x128xf32>
    %c5_i32 = arith.constant 5 : i32
    %c8_i32_80 = arith.constant 8 : i32
    %233 = arith.muli %c5_i32, %c8_i32_80 : i32
    %234 = tpu.assume_multiple %233, 8 : i32
    %235 = arith.index_cast %234 : i32 to index
    %c0_81 = arith.constant 0 : index
    %236 = vector.load %arg13[%235, %c0_81] : memref<64x512xf32, #tpu.memory_space<vmem>>, vector<8x512xf32>
    %cst_82 = arith.constant dense<0.000000e+00> : vector<8x512xf32>
    %237 = tpu.matmul %226, %3, %cst_82 {dimension_numbers = #tpu.dot_dimension_numbers<[1], [0], [0], [1], [0, 0, 1, 1], [], []>} : vector<8x128xf32>, vector<128x512xf32>, vector<8x512xf32> -> vector<8x512xf32>
    %238 = arith.addf %236, %237 : vector<8x512xf32>
    %239 = vector.extract_strided_slice %238 {offsets = [0, 0], sizes = [8, 128], strides = [1, 1]} : vector<8x512xf32> to vector<8x128xf32>
    %cst_83 = arith.constant 5.000000e-01 : f32
    %240 = vector.broadcast %cst_83 : f32 to vector<8x128xf32>
    %241 = arith.mulf %240, %239 : vector<8x128xf32>
    %242 = math.tanh %241 : vector<8x128xf32>
    %cst_84 = arith.constant 1.000000e+00 : f32
    %243 = vector.broadcast %cst_84 : f32 to vector<8x128xf32>
    %244 = arith.addf %242, %243 : vector<8x128xf32>
    %cst_85 = arith.constant 5.000000e-01 : f32
    %245 = vector.broadcast %cst_85 : f32 to vector<8x128xf32>
    %246 = arith.mulf %245, %244 : vector<8x128xf32>
    %247 = vector.extract_strided_slice %238 {offsets = [0, 128], sizes = [8, 128], strides = [1, 1]} : vector<8x512xf32> to vector<8x128xf32>
    %cst_86 = arith.constant 5.000000e-01 : f32
    %248 = vector.broadcast %cst_86 : f32 to vector<8x128xf32>
    %249 = arith.mulf %248, %247 : vector<8x128xf32>
    %250 = math.tanh %249 : vector<8x128xf32>
    %cst_87 = arith.constant 1.000000e+00 : f32
    %251 = vector.broadcast %cst_87 : f32 to vector<8x128xf32>
    %252 = arith.addf %250, %251 : vector<8x128xf32>
    %cst_88 = arith.constant 5.000000e-01 : f32
    %253 = vector.broadcast %cst_88 : f32 to vector<8x128xf32>
    %254 = arith.mulf %253, %252 : vector<8x128xf32>
    %255 = vector.extract_strided_slice %238 {offsets = [0, 256], sizes = [8, 128], strides = [1, 1]} : vector<8x512xf32> to vector<8x128xf32>
    %256 = math.tanh %255 : vector<8x128xf32>
    %257 = vector.extract_strided_slice %238 {offsets = [0, 384], sizes = [8, 128], strides = [1, 1]} : vector<8x512xf32> to vector<8x128xf32>
    %cst_89 = arith.constant 5.000000e-01 : f32
    %258 = vector.broadcast %cst_89 : f32 to vector<8x128xf32>
    %259 = arith.mulf %258, %257 : vector<8x128xf32>
    %260 = math.tanh %259 : vector<8x128xf32>
    %cst_90 = arith.constant 1.000000e+00 : f32
    %261 = vector.broadcast %cst_90 : f32 to vector<8x128xf32>
    %262 = arith.addf %260, %261 : vector<8x128xf32>
    %cst_91 = arith.constant 5.000000e-01 : f32
    %263 = vector.broadcast %cst_91 : f32 to vector<8x128xf32>
    %264 = arith.mulf %263, %262 : vector<8x128xf32>
    %265 = arith.mulf %254, %224 : vector<8x128xf32>
    %266 = arith.mulf %246, %256 : vector<8x128xf32>
    %267 = arith.addf %265, %266 : vector<8x128xf32>
    %268 = math.tanh %267 : vector<8x128xf32>
    %269 = arith.mulf %264, %268 : vector<8x128xf32>
    %270 = arith.addi %14, %c5_i32 : i32
    %271 = vector.broadcast %270 : i32 to vector<8x1xi32>
    %272 = arith.cmpi eq, %271, %6 : vector<8x1xi32>
    %273 = vector.shape_cast %272 : vector<8x1xi1> to vector<8x1xi1>
    %274 = vector.broadcast %273 : vector<8x1xi1> to vector<8x128xi1>
    %275 = arith.select %274, %269, %232 : vector<8x128xi1>, vector<8x128xf32>
    %c6_i32 = arith.constant 6 : i32
    %c8_i32_92 = arith.constant 8 : i32
    %276 = arith.muli %c6_i32, %c8_i32_92 : i32
    %277 = tpu.assume_multiple %276, 8 : i32
    %278 = arith.index_cast %277 : i32 to index
    %c0_93 = arith.constant 0 : index
    %279 = vector.load %arg13[%278, %c0_93] : memref<64x512xf32, #tpu.memory_space<vmem>>, vector<8x512xf32>
    %cst_94 = arith.constant dense<0.000000e+00> : vector<8x512xf32>
    %280 = tpu.matmul %269, %3, %cst_94 {dimension_numbers = #tpu.dot_dimension_numbers<[1], [0], [0], [1], [0, 0, 1, 1], [], []>} : vector<8x128xf32>, vector<128x512xf32>, vector<8x512xf32> -> vector<8x512xf32>
    %281 = arith.addf %279, %280 : vector<8x512xf32>
    %282 = vector.extract_strided_slice %281 {offsets = [0, 0], sizes = [8, 128], strides = [1, 1]} : vector<8x512xf32> to vector<8x128xf32>
    %cst_95 = arith.constant 5.000000e-01 : f32
    %283 = vector.broadcast %cst_95 : f32 to vector<8x128xf32>
    %284 = arith.mulf %283, %282 : vector<8x128xf32>
    %285 = math.tanh %284 : vector<8x128xf32>
    %cst_96 = arith.constant 1.000000e+00 : f32
    %286 = vector.broadcast %cst_96 : f32 to vector<8x128xf32>
    %287 = arith.addf %285, %286 : vector<8x128xf32>
    %cst_97 = arith.constant 5.000000e-01 : f32
    %288 = vector.broadcast %cst_97 : f32 to vector<8x128xf32>
    %289 = arith.mulf %288, %287 : vector<8x128xf32>
    %290 = vector.extract_strided_slice %281 {offsets = [0, 128], sizes = [8, 128], strides = [1, 1]} : vector<8x512xf32> to vector<8x128xf32>
    %cst_98 = arith.constant 5.000000e-01 : f32
    %291 = vector.broadcast %cst_98 : f32 to vector<8x128xf32>
    %292 = arith.mulf %291, %290 : vector<8x128xf32>
    %293 = math.tanh %292 : vector<8x128xf32>
    %cst_99 = arith.constant 1.000000e+00 : f32
    %294 = vector.broadcast %cst_99 : f32 to vector<8x128xf32>
    %295 = arith.addf %293, %294 : vector<8x128xf32>
    %cst_100 = arith.constant 5.000000e-01 : f32
    %296 = vector.broadcast %cst_100 : f32 to vector<8x128xf32>
    %297 = arith.mulf %296, %295 : vector<8x128xf32>
    %298 = vector.extract_strided_slice %281 {offsets = [0, 256], sizes = [8, 128], strides = [1, 1]} : vector<8x512xf32> to vector<8x128xf32>
    %299 = math.tanh %298 : vector<8x128xf32>
    %300 = vector.extract_strided_slice %281 {offsets = [0, 384], sizes = [8, 128], strides = [1, 1]} : vector<8x512xf32> to vector<8x128xf32>
    %cst_101 = arith.constant 5.000000e-01 : f32
    %301 = vector.broadcast %cst_101 : f32 to vector<8x128xf32>
    %302 = arith.mulf %301, %300 : vector<8x128xf32>
    %303 = math.tanh %302 : vector<8x128xf32>
    %cst_102 = arith.constant 1.000000e+00 : f32
    %304 = vector.broadcast %cst_102 : f32 to vector<8x128xf32>
    %305 = arith.addf %303, %304 : vector<8x128xf32>
    %cst_103 = arith.constant 5.000000e-01 : f32
    %306 = vector.broadcast %cst_103 : f32 to vector<8x128xf32>
    %307 = arith.mulf %306, %305 : vector<8x128xf32>
    %308 = arith.mulf %297, %267 : vector<8x128xf32>
    %309 = arith.mulf %289, %299 : vector<8x128xf32>
    %310 = arith.addf %308, %309 : vector<8x128xf32>
    %311 = math.tanh %310 : vector<8x128xf32>
    %312 = arith.mulf %307, %311 : vector<8x128xf32>
    %313 = arith.addi %14, %c6_i32 : i32
    %314 = vector.broadcast %313 : i32 to vector<8x1xi32>
    %315 = arith.cmpi eq, %314, %6 : vector<8x1xi32>
    %316 = vector.shape_cast %315 : vector<8x1xi1> to vector<8x1xi1>
    %317 = vector.broadcast %316 : vector<8x1xi1> to vector<8x128xi1>
    %318 = arith.select %317, %312, %275 : vector<8x128xi1>, vector<8x128xf32>
    %c7_i32 = arith.constant 7 : i32
    %c8_i32_104 = arith.constant 8 : i32
    %319 = arith.muli %c7_i32, %c8_i32_104 : i32
    %320 = tpu.assume_multiple %319, 8 : i32
    %321 = arith.index_cast %320 : i32 to index
    %c0_105 = arith.constant 0 : index
    %322 = vector.load %arg13[%321, %c0_105] : memref<64x512xf32, #tpu.memory_space<vmem>>, vector<8x512xf32>
    %cst_106 = arith.constant dense<0.000000e+00> : vector<8x512xf32>
    %323 = tpu.matmul %312, %3, %cst_106 {dimension_numbers = #tpu.dot_dimension_numbers<[1], [0], [0], [1], [0, 0, 1, 1], [], []>} : vector<8x128xf32>, vector<128x512xf32>, vector<8x512xf32> -> vector<8x512xf32>
    %324 = arith.addf %322, %323 : vector<8x512xf32>
    %325 = vector.extract_strided_slice %324 {offsets = [0, 0], sizes = [8, 128], strides = [1, 1]} : vector<8x512xf32> to vector<8x128xf32>
    %cst_107 = arith.constant 5.000000e-01 : f32
    %326 = vector.broadcast %cst_107 : f32 to vector<8x128xf32>
    %327 = arith.mulf %326, %325 : vector<8x128xf32>
    %328 = math.tanh %327 : vector<8x128xf32>
    %cst_108 = arith.constant 1.000000e+00 : f32
    %329 = vector.broadcast %cst_108 : f32 to vector<8x128xf32>
    %330 = arith.addf %328, %329 : vector<8x128xf32>
    %cst_109 = arith.constant 5.000000e-01 : f32
    %331 = vector.broadcast %cst_109 : f32 to vector<8x128xf32>
    %332 = arith.mulf %331, %330 : vector<8x128xf32>
    %333 = vector.extract_strided_slice %324 {offsets = [0, 128], sizes = [8, 128], strides = [1, 1]} : vector<8x512xf32> to vector<8x128xf32>
    %cst_110 = arith.constant 5.000000e-01 : f32
    %334 = vector.broadcast %cst_110 : f32 to vector<8x128xf32>
    %335 = arith.mulf %334, %333 : vector<8x128xf32>
    %336 = math.tanh %335 : vector<8x128xf32>
    %cst_111 = arith.constant 1.000000e+00 : f32
    %337 = vector.broadcast %cst_111 : f32 to vector<8x128xf32>
    %338 = arith.addf %336, %337 : vector<8x128xf32>
    %cst_112 = arith.constant 5.000000e-01 : f32
    %339 = vector.broadcast %cst_112 : f32 to vector<8x128xf32>
    %340 = arith.mulf %339, %338 : vector<8x128xf32>
    %341 = vector.extract_strided_slice %324 {offsets = [0, 256], sizes = [8, 128], strides = [1, 1]} : vector<8x512xf32> to vector<8x128xf32>
    %342 = math.tanh %341 : vector<8x128xf32>
    %343 = vector.extract_strided_slice %324 {offsets = [0, 384], sizes = [8, 128], strides = [1, 1]} : vector<8x512xf32> to vector<8x128xf32>
    %cst_113 = arith.constant 5.000000e-01 : f32
    %344 = vector.broadcast %cst_113 : f32 to vector<8x128xf32>
    %345 = arith.mulf %344, %343 : vector<8x128xf32>
    %346 = math.tanh %345 : vector<8x128xf32>
    %cst_114 = arith.constant 1.000000e+00 : f32
    %347 = vector.broadcast %cst_114 : f32 to vector<8x128xf32>
    %348 = arith.addf %346, %347 : vector<8x128xf32>
    %cst_115 = arith.constant 5.000000e-01 : f32
    %349 = vector.broadcast %cst_115 : f32 to vector<8x128xf32>
    %350 = arith.mulf %349, %348 : vector<8x128xf32>
    %351 = arith.mulf %340, %310 : vector<8x128xf32>
    %352 = arith.mulf %332, %342 : vector<8x128xf32>
    %353 = arith.addf %351, %352 : vector<8x128xf32>
    %354 = math.tanh %353 : vector<8x128xf32>
    %355 = arith.mulf %350, %354 : vector<8x128xf32>
    %356 = arith.addi %14, %c7_i32 : i32
    %357 = vector.broadcast %356 : i32 to vector<8x1xi32>
    %358 = arith.cmpi eq, %357, %6 : vector<8x1xi32>
    %359 = vector.shape_cast %358 : vector<8x1xi1> to vector<8x1xi1>
    %360 = vector.broadcast %359 : vector<8x1xi1> to vector<8x128xi1>
    %361 = arith.select %360, %355, %318 : vector<8x128xi1>, vector<8x128xf32>
    %c8_i32_116 = arith.constant 8 : i32
    %c0_117 = arith.constant 0 : index
    %c0_118 = arith.constant 0 : index
    %362 = vector.load %arg10[%c0_117, %c0_118] : memref<8x128xf32, #tpu.memory_space<vmem>>, vector<8x128xf32>
    tpu.vector_store %arg10[%c0_117, %c0_118], %355 {strides = array<i32>} : memref<8x128xf32, #tpu.memory_space<vmem>>, vector<8x128xf32>,
    %c0_119 = arith.constant 0 : index
    %c0_120 = arith.constant 0 : index
    %363 = vector.load %arg11[%c0_119, %c0_120] : memref<8x128xf32, #tpu.memory_space<vmem>>, vector<8x128xf32>
    tpu.vector_store %arg11[%c0_119, %c0_120], %353 {strides = array<i32>} : memref<8x128xf32, #tpu.memory_space<vmem>>, vector<8x128xf32>,
    %c0_121 = arith.constant 0 : index
    %c0_122 = arith.constant 0 : index
    %364 = vector.load %arg12[%c0_121, %c0_122] : memref<8x128xf32, #tpu.memory_space<vmem>>, vector<8x128xf32>
    tpu.vector_store %arg12[%c0_121, %c0_122], %361 {strides = array<i32>} : memref<8x128xf32, #tpu.memory_space<vmem>>, vector<8x128xf32>,
    %c0_i32_123 = arith.constant 0 : i32
    %365 = arith.cmpi eq, %arg1, %c0_i32_123 : i32
    %366 = arith.extui %365 : i1 to i32
    %c0_i32_124 = arith.constant 0 : i32
    %367 = arith.cmpi ne, %366, %c0_i32_124 : i32
    scf.if %367 {
      %c0_125 = arith.constant 0 : index
      %c0_126 = arith.constant 0 : index
      %368 = vector.load %arg7[%c0_125, %c0_126] : memref<128x8xf32, #tpu.memory_space<vmem>>, vector<128x8xf32>
      %cst_127 = arith.constant dense<0.000000e+00> : vector<8x8xf32>
      %369 = tpu.matmul %361, %368, %cst_127 {dimension_numbers = #tpu.dot_dimension_numbers<[1], [0], [0], [1], [0, 0, 1, 1], [], []>} : vector<8x128xf32>, vector<128x8xf32>, vector<8x8xf32> -> vector<8x8xf32>
      %c0_128 = arith.constant 0 : index
      %c0_129 = arith.constant 0 : index
      %370 = vector.load %arg8[%c0_128, %c0_129] : memref<1x8xf32, #tpu.memory_space<vmem>>, vector<1x8xf32>
      %371 = vector.broadcast %370 : vector<1x8xf32> to vector<8x8xf32>
      %372 = arith.addf %369, %371 : vector<8x8xf32>
      %c0_130 = arith.constant 0 : index
      %c0_131 = arith.constant 0 : index
      %373 = vector.load %arg9[%c0_130, %c0_131] : memref<8x8xf32, #tpu.memory_space<vmem>>, vector<8x8xf32>
      tpu.vector_store %arg9[%c0_130, %c0_131], %372 {strides = array<i32>} : memref<8x8xf32, #tpu.memory_space<vmem>>, vector<8x8xf32>,
    } else {
    }
    return
  }
  func.func @transform_0(%arg0: i32, %arg1: i32) -> (i32, i32) {
    %c1_i32 = arith.constant 1 : i32
    %0 = arith.muli %arg0, %c1_i32 : i32
    %1 = arith.addi %0, %arg1 : i32
    %c0_i32 = arith.constant 0 : i32
    %c0_i32_0 = arith.constant 0 : i32
    return %1, %c0_i32 : i32, i32
  }
  func.func @transform_1(%arg0: i32, %arg1: i32) -> (i32, i32) {
    %c0_i32 = arith.constant 0 : i32
    %c0_i32_0 = arith.constant 0 : i32
    return %arg0, %c0_i32 : i32, i32
  }
  func.func @transform_2(%arg0: i32, %arg1: i32) -> (i32, i32) {
    %c0_i32 = arith.constant 0 : i32
    %c0_i32_0 = arith.constant 0 : i32
    %c0_i32_1 = arith.constant 0 : i32
    return %c0_i32, %c0_i32_0 : i32, i32
  }
  func.func @transform_3(%arg0: i32, %arg1: i32) -> (i32, i32) {
    %c0_i32 = arith.constant 0 : i32
    %c0_i32_0 = arith.constant 0 : i32
    %c0_i32_1 = arith.constant 0 : i32
    return %c0_i32, %c0_i32_0 : i32, i32
  }
  func.func @transform_4(%arg0: i32, %arg1: i32) -> (i32, i32) {
    %c0_i32 = arith.constant 0 : i32
    %c0_i32_0 = arith.constant 0 : i32
    %c0_i32_1 = arith.constant 0 : i32
    return %c0_i32, %c0_i32_0 : i32, i32
  }
  func.func @transform_5(%arg0: i32, %arg1: i32) -> (i32, i32) {
    %c0_i32 = arith.constant 0 : i32
    %c0_i32_0 = arith.constant 0 : i32
    %c0_i32_1 = arith.constant 0 : i32
    return %c0_i32, %c0_i32_0 : i32, i32
  }
  func.func @transform_6(%arg0: i32, %arg1: i32) -> (i32, i32) {
    %c0_i32 = arith.constant 0 : i32
    %c0_i32_0 = arith.constant 0 : i32
    %c0_i32_1 = arith.constant 0 : i32
    return %c0_i32, %c0_i32_0 : i32, i32
  }
  func.func @transform_7(%arg0: i32, %arg1: i32) -> (i32, i32) {
    %c0_i32 = arith.constant 0 : i32
    %c0_i32_0 = arith.constant 0 : i32
    return %arg0, %c0_i32 : i32, i32
  }
}

module attributes {stable_mosaic.version = 11 : i64} {
  func.func @_lstm_chunk_kernel(%arg0: i32, %arg1: i32, %arg2: memref<64x16xf32, #tpu.memory_space<vmem>>, %arg3: memref<8x1xi32, #tpu.memory_space<vmem>>, %arg4: memref<16x512xf32, #tpu.memory_space<vmem>>, %arg5: memref<128x512xf32, #tpu.memory_space<vmem>>, %arg6: memref<1x512xf32, #tpu.memory_space<vmem>>, %arg7: memref<128x8xf32, #tpu.memory_space<vmem>>, %arg8: memref<1x8xf32, #tpu.memory_space<vmem>>, %arg9: memref<8x8xf32, #tpu.memory_space<vmem>>, %arg10: memref<8x128xf32, #tpu.memory_space<vmem>>, %arg11: memref<8x128xf32, #tpu.memory_space<vmem>>, %arg12: memref<8x128xf32, #tpu.memory_space<vmem>>, %arg13: memref<64x512xf32, #tpu.memory_space<vmem>>) attributes {dimension_semantics = [#tpu.dimension_semantics<parallel>, #tpu.dimension_semantics<arbitrary>], iteration_bounds = array<i64: 1, 1>, scalar_prefetch = 0 : i64, scratch_operands = 4 : i64, tpu.core_type = #tpu.core_type<tc>, window_params = [{transform_indices = @transform_0, window_bounds = array<i64: 64, 16>}, {transform_indices = @transform_1, window_bounds = array<i64: 8, 1>}, {pipeline_mode = #tpu.pipeline_mode<synchronous>, transform_indices = @transform_2, window_bounds = array<i64: 16, 512>}, {pipeline_mode = #tpu.pipeline_mode<synchronous>, transform_indices = @transform_3, window_bounds = array<i64: 128, 512>}, {pipeline_mode = #tpu.pipeline_mode<synchronous>, transform_indices = @transform_4, window_bounds = array<i64: 1, 512>}, {pipeline_mode = #tpu.pipeline_mode<synchronous>, transform_indices = @transform_5, window_bounds = array<i64: 128, 8>}, {pipeline_mode = #tpu.pipeline_mode<synchronous>, transform_indices = @transform_6, window_bounds = array<i64: 1, 8>}, {transform_indices = @transform_7, window_bounds = array<i64: 8, 8>}]} {
    %c0_i32 = arith.constant 0 : i32
    %0 = arith.cmpi eq, %arg1, %c0_i32 : i32
    %1 = arith.extui %0 : i1 to i32
    %c0_i32_0 = arith.constant 0 : i32
    %2 = arith.cmpi ne, %1, %c0_i32_0 : i32
    scf.if %2 {
      %cst_125 = arith.constant 0.000000e+00 : f32
      %368 = vector.broadcast %cst_125 : f32 to vector<8x128xf32>
      %c0_126 = arith.constant 0 : index
      %c0_127 = arith.constant 0 : index
      %369 = vector.load %arg10[%c0_126, %c0_127] : memref<8x128xf32, #tpu.memory_space<vmem>>, vector<8x128xf32>
      tpu.vector_store %arg10[%c0_126, %c0_127], %368 {strides = array<i32>} : memref<8x128xf32, #tpu.memory_space<vmem>>, vector<8x128xf32>,
      %cst_128 = arith.constant 0.000000e+00 : f32
      %370 = vector.broadcast %cst_128 : f32 to vector<8x128xf32>
      %c0_129 = arith.constant 0 : index
      %c0_130 = arith.constant 0 : index
      %371 = vector.load %arg11[%c0_129, %c0_130] : memref<8x128xf32, #tpu.memory_space<vmem>>, vector<8x128xf32>
      tpu.vector_store %arg11[%c0_129, %c0_130], %370 {strides = array<i32>} : memref<8x128xf32, #tpu.memory_space<vmem>>, vector<8x128xf32>,
      %cst_131 = arith.constant 0.000000e+00 : f32
      %372 = vector.broadcast %cst_131 : f32 to vector<8x128xf32>
      %c0_132 = arith.constant 0 : index
      %c0_133 = arith.constant 0 : index
      %373 = vector.load %arg12[%c0_132, %c0_133] : memref<8x128xf32, #tpu.memory_space<vmem>>, vector<8x128xf32>
      tpu.vector_store %arg12[%c0_132, %c0_133], %372 {strides = array<i32>} : memref<8x128xf32, #tpu.memory_space<vmem>>, vector<8x128xf32>,
    } else {
    }
    %c0 = arith.constant 0 : index
    %c0_1 = arith.constant 0 : index
    %3 = vector.load %arg5[%c0, %c0_1] : memref<128x512xf32, #tpu.memory_space<vmem>>, vector<128x512xf32>
    %c0_2 = arith.constant 0 : index
    %c0_3 = arith.constant 0 : index
    %4 = vector.load %arg3[%c0_2, %c0_3] : memref<8x1xi32, #tpu.memory_space<vmem>>, vector<8x1xi32>
    %c1_i32 = arith.constant 1 : i32
    %5 = vector.broadcast %c1_i32 : i32 to vector<8x1xi32>
    %6 = arith.subi %4, %5 : vector<8x1xi32>
    %c0_4 = arith.constant 0 : index
    %c0_5 = arith.constant 0 : index
    %7 = vector.load %arg2[%c0_4, %c0_5] : memref<64x16xf32, #tpu.memory_space<vmem>>, vector<64x16xf32>
    %c0_6 = arith.constant 0 : index
    %c0_7 = arith.constant 0 : index
    %8 = vector.load %arg4[%c0_6, %c0_7] : memref<16x512xf32, #tpu.memory_space<vmem>>, vector<16x512xf32>
    %cst = arith.constant dense<0.000000e+00> : vector<64x512xf32>
    %9 = tpu.matmul %7, %8, %cst {dimension_numbers = #tpu.dot_dimension_numbers<[1], [0], [0], [1], [0, 0, 1, 1], [], []>} : vector<64x16xf32>, vector<16x512xf32>, vector<64x512xf32> -> vector<64x512xf32>
    %c0_8 = arith.constant 0 : index
    %c0_9 = arith.constant 0 : index
    %10 = vector.load %arg6[%c0_8, %c0_9] : memref<1x512xf32, #tpu.memory_space<vmem>>, vector<1x512xf32>
    %11 = vector.broadcast %10 : vector<1x512xf32> to vector<64x512xf32>
    %12 = arith.addf %9, %11 : vector<64x512xf32>
    %c0_10 = arith.constant 0 : index
    %c0_11 = arith.constant 0 : index
    %13 = vector.load %arg13[%c0_10, %c0_11] : memref<64x512xf32, #tpu.memory_space<vmem>>, vector<64x512xf32>
    tpu.vector_store %arg13[%c0_10, %c0_11], %12 {strides = array<i32>} : memref<64x512xf32, #tpu.memory_space<vmem>>, vector<64x512xf32>,
    %c8_i32 = arith.constant 8 : i32
    %14 = arith.muli %arg1, %c8_i32 : i32
    %c0_12 = arith.constant 0 : index
    %c0_13 = arith.constant 0 : index
    %15 = vector.load %arg10[%c0_12, %c0_13] : memref<8x128xf32, #tpu.memory_space<vmem>>, vector<8x128xf32>
    %c0_14 = arith.constant 0 : index
    %c0_15 = arith.constant 0 : index
    %16 = vector.load %arg11[%c0_14, %c0_15] : memref<8x128xf32, #tpu.memory_space<vmem>>, vector<8x128xf32>
    %c0_16 = arith.constant 0 : index
    %c0_17 = arith.constant 0 : index
    %17 = vector.load %arg12[%c0_16, %c0_17] : memref<8x128xf32, #tpu.memory_space<vmem>>, vector<8x128xf32>
    %c0_i32_18 = arith.constant 0 : i32
    %c8_i32_19 = arith.constant 8 : i32
    %18 = arith.muli %c0_i32_18, %c8_i32_19 : i32
    %19 = tpu.assume_multiple %18, 8 : i32
    %20 = arith.index_cast %19 : i32 to index
    %c0_20 = arith.constant 0 : index
    %21 = vector.load %arg13[%20, %c0_20] : memref<64x512xf32, #tpu.memory_space<vmem>>, vector<8x512xf32>
    %cst_21 = arith.constant dense<0.000000e+00> : vector<8x512xf32>
    %22 = tpu.matmul %15, %3, %cst_21 {dimension_numbers = #tpu.dot_dimension_numbers<[1], [0], [0], [1], [0, 0, 1, 1], [], []>} : vector<8x128xf32>, vector<128x512xf32>, vector<8x512xf32> -> vector<8x512xf32>
    %23 = arith.addf %21, %22 : vector<8x512xf32>
    %24 = vector.extract_strided_slice %23 {offsets = [0, 0], sizes = [8, 128], strides = [1, 1]} : vector<8x512xf32> to vector<8x128xf32>
    %cst_22 = arith.constant 5.000000e-01 : f32
    %25 = vector.broadcast %cst_22 : f32 to vector<8x128xf32>
    %26 = arith.mulf %25, %24 : vector<8x128xf32>
    %27 = math.tanh %26 : vector<8x128xf32>
    %cst_23 = arith.constant 1.000000e+00 : f32
    %28 = vector.broadcast %cst_23 : f32 to vector<8x128xf32>
    %29 = arith.addf %27, %28 : vector<8x128xf32>
    %cst_24 = arith.constant 5.000000e-01 : f32
    %30 = vector.broadcast %cst_24 : f32 to vector<8x128xf32>
    %31 = arith.mulf %30, %29 : vector<8x128xf32>
    %32 = vector.extract_strided_slice %23 {offsets = [0, 128], sizes = [8, 128], strides = [1, 1]} : vector<8x512xf32> to vector<8x128xf32>
    %cst_25 = arith.constant 5.000000e-01 : f32
    %33 = vector.broadcast %cst_25 : f32 to vector<8x128xf32>
    %34 = arith.mulf %33, %32 : vector<8x128xf32>
    %35 = math.tanh %34 : vector<8x128xf32>
    %cst_26 = arith.constant 1.000000e+00 : f32
    %36 = vector.broadcast %cst_26 : f32 to vector<8x128xf32>
    %37 = arith.addf %35, %36 : vector<8x128xf32>
    %cst_27 = arith.constant 5.000000e-01 : f32
    %38 = vector.broadcast %cst_27 : f32 to vector<8x128xf32>
    %39 = arith.mulf %38, %37 : vector<8x128xf32>
    %40 = vector.extract_strided_slice %23 {offsets = [0, 256], sizes = [8, 128], strides = [1, 1]} : vector<8x512xf32> to vector<8x128xf32>
    %41 = math.tanh %40 : vector<8x128xf32>
    %42 = vector.extract_strided_slice %23 {offsets = [0, 384], sizes = [8, 128], strides = [1, 1]} : vector<8x512xf32> to vector<8x128xf32>
    %cst_28 = arith.constant 5.000000e-01 : f32
    %43 = vector.broadcast %cst_28 : f32 to vector<8x128xf32>
    %44 = arith.mulf %43, %42 : vector<8x128xf32>
    %45 = math.tanh %44 : vector<8x128xf32>
    %cst_29 = arith.constant 1.000000e+00 : f32
    %46 = vector.broadcast %cst_29 : f32 to vector<8x128xf32>
    %47 = arith.addf %45, %46 : vector<8x128xf32>
    %cst_30 = arith.constant 5.000000e-01 : f32
    %48 = vector.broadcast %cst_30 : f32 to vector<8x128xf32>
    %49 = arith.mulf %48, %47 : vector<8x128xf32>
    %50 = arith.mulf %39, %16 : vector<8x128xf32>
    %51 = arith.mulf %31, %41 : vector<8x128xf32>
    %52 = arith.addf %50, %51 : vector<8x128xf32>
    %53 = math.tanh %52 : vector<8x128xf32>
    %54 = arith.mulf %49, %53 : vector<8x128xf32>
    %55 = arith.addi %14, %c0_i32_18 : i32
    %56 = vector.broadcast %55 : i32 to vector<8x1xi32>
    %57 = arith.cmpi eq, %56, %6 : vector<8x1xi32>
    %58 = vector.shape_cast %57 : vector<8x1xi1> to vector<8x1xi1>
    %59 = vector.broadcast %58 : vector<8x1xi1> to vector<8x128xi1>
    %60 = arith.select %59, %54, %17 : vector<8x128xi1>, vector<8x128xf32>
    %c1_i32_31 = arith.constant 1 : i32
    %c8_i32_32 = arith.constant 8 : i32
    %61 = arith.muli %c1_i32_31, %c8_i32_32 : i32
    %62 = tpu.assume_multiple %61, 8 : i32
    %63 = arith.index_cast %62 : i32 to index
    %c0_33 = arith.constant 0 : index
    %64 = vector.load %arg13[%63, %c0_33] : memref<64x512xf32, #tpu.memory_space<vmem>>, vector<8x512xf32>
    %cst_34 = arith.constant dense<0.000000e+00> : vector<8x512xf32>
    %65 = tpu.matmul %54, %3, %cst_34 {dimension_numbers = #tpu.dot_dimension_numbers<[1], [0], [0], [1], [0, 0, 1, 1], [], []>} : vector<8x128xf32>, vector<128x512xf32>, vector<8x512xf32> -> vector<8x512xf32>
    %66 = arith.addf %64, %65 : vector<8x512xf32>
    %67 = vector.extract_strided_slice %66 {offsets = [0, 0], sizes = [8, 128], strides = [1, 1]} : vector<8x512xf32> to vector<8x128xf32>
    %cst_35 = arith.constant 5.000000e-01 : f32
    %68 = vector.broadcast %cst_35 : f32 to vector<8x128xf32>
    %69 = arith.mulf %68, %67 : vector<8x128xf32>
    %70 = math.tanh %69 : vector<8x128xf32>
    %cst_36 = arith.constant 1.000000e+00 : f32
    %71 = vector.broadcast %cst_36 : f32 to vector<8x128xf32>
    %72 = arith.addf %70, %71 : vector<8x128xf32>
    %cst_37 = arith.constant 5.000000e-01 : f32
    %73 = vector.broadcast %cst_37 : f32 to vector<8x128xf32>
    %74 = arith.mulf %73, %72 : vector<8x128xf32>
    %75 = vector.extract_strided_slice %66 {offsets = [0, 128], sizes = [8, 128], strides = [1, 1]} : vector<8x512xf32> to vector<8x128xf32>
    %cst_38 = arith.constant 5.000000e-01 : f32
    %76 = vector.broadcast %cst_38 : f32 to vector<8x128xf32>
    %77 = arith.mulf %76, %75 : vector<8x128xf32>
    %78 = math.tanh %77 : vector<8x128xf32>
    %cst_39 = arith.constant 1.000000e+00 : f32
    %79 = vector.broadcast %cst_39 : f32 to vector<8x128xf32>
    %80 = arith.addf %78, %79 : vector<8x128xf32>
    %cst_40 = arith.constant 5.000000e-01 : f32
    %81 = vector.broadcast %cst_40 : f32 to vector<8x128xf32>
    %82 = arith.mulf %81, %80 : vector<8x128xf32>
    %83 = vector.extract_strided_slice %66 {offsets = [0, 256], sizes = [8, 128], strides = [1, 1]} : vector<8x512xf32> to vector<8x128xf32>
    %84 = math.tanh %83 : vector<8x128xf32>
    %85 = vector.extract_strided_slice %66 {offsets = [0, 384], sizes = [8, 128], strides = [1, 1]} : vector<8x512xf32> to vector<8x128xf32>
    %cst_41 = arith.constant 5.000000e-01 : f32
    %86 = vector.broadcast %cst_41 : f32 to vector<8x128xf32>
    %87 = arith.mulf %86, %85 : vector<8x128xf32>
    %88 = math.tanh %87 : vector<8x128xf32>
    %cst_42 = arith.constant 1.000000e+00 : f32
    %89 = vector.broadcast %cst_42 : f32 to vector<8x128xf32>
    %90 = arith.addf %88, %89 : vector<8x128xf32>
    %cst_43 = arith.constant 5.000000e-01 : f32
    %91 = vector.broadcast %cst_43 : f32 to vector<8x128xf32>
    %92 = arith.mulf %91, %90 : vector<8x128xf32>
    %93 = arith.mulf %82, %52 : vector<8x128xf32>
    %94 = arith.mulf %74, %84 : vector<8x128xf32>
    %95 = arith.addf %93, %94 : vector<8x128xf32>
    %96 = math.tanh %95 : vector<8x128xf32>
    %97 = arith.mulf %92, %96 : vector<8x128xf32>
    %98 = arith.addi %14, %c1_i32_31 : i32
    %99 = vector.broadcast %98 : i32 to vector<8x1xi32>
    %100 = arith.cmpi eq, %99, %6 : vector<8x1xi32>
    %101 = vector.shape_cast %100 : vector<8x1xi1> to vector<8x1xi1>
    %102 = vector.broadcast %101 : vector<8x1xi1> to vector<8x128xi1>
    %103 = arith.select %102, %97, %60 : vector<8x128xi1>, vector<8x128xf32>
    %c2_i32 = arith.constant 2 : i32
    %c8_i32_44 = arith.constant 8 : i32
    %104 = arith.muli %c2_i32, %c8_i32_44 : i32
    %105 = tpu.assume_multiple %104, 8 : i32
    %106 = arith.index_cast %105 : i32 to index
    %c0_45 = arith.constant 0 : index
    %107 = vector.load %arg13[%106, %c0_45] : memref<64x512xf32, #tpu.memory_space<vmem>>, vector<8x512xf32>
    %cst_46 = arith.constant dense<0.000000e+00> : vector<8x512xf32>
    %108 = tpu.matmul %97, %3, %cst_46 {dimension_numbers = #tpu.dot_dimension_numbers<[1], [0], [0], [1], [0, 0, 1, 1], [], []>} : vector<8x128xf32>, vector<128x512xf32>, vector<8x512xf32> -> vector<8x512xf32>
    %109 = arith.addf %107, %108 : vector<8x512xf32>
    %110 = vector.extract_strided_slice %109 {offsets = [0, 0], sizes = [8, 128], strides = [1, 1]} : vector<8x512xf32> to vector<8x128xf32>
    %cst_47 = arith.constant 5.000000e-01 : f32
    %111 = vector.broadcast %cst_47 : f32 to vector<8x128xf32>
    %112 = arith.mulf %111, %110 : vector<8x128xf32>
    %113 = math.tanh %112 : vector<8x128xf32>
    %cst_48 = arith.constant 1.000000e+00 : f32
    %114 = vector.broadcast %cst_48 : f32 to vector<8x128xf32>
    %115 = arith.addf %113, %114 : vector<8x128xf32>
    %cst_49 = arith.constant 5.000000e-01 : f32
    %116 = vector.broadcast %cst_49 : f32 to vector<8x128xf32>
    %117 = arith.mulf %116, %115 : vector<8x128xf32>
    %118 = vector.extract_strided_slice %109 {offsets = [0, 128], sizes = [8, 128], strides = [1, 1]} : vector<8x512xf32> to vector<8x128xf32>
    %cst_50 = arith.constant 5.000000e-01 : f32
    %119 = vector.broadcast %cst_50 : f32 to vector<8x128xf32>
    %120 = arith.mulf %119, %118 : vector<8x128xf32>
    %121 = math.tanh %120 : vector<8x128xf32>
    %cst_51 = arith.constant 1.000000e+00 : f32
    %122 = vector.broadcast %cst_51 : f32 to vector<8x128xf32>
    %123 = arith.addf %121, %122 : vector<8x128xf32>
    %cst_52 = arith.constant 5.000000e-01 : f32
    %124 = vector.broadcast %cst_52 : f32 to vector<8x128xf32>
    %125 = arith.mulf %124, %123 : vector<8x128xf32>
    %126 = vector.extract_strided_slice %109 {offsets = [0, 256], sizes = [8, 128], strides = [1, 1]} : vector<8x512xf32> to vector<8x128xf32>
    %127 = math.tanh %126 : vector<8x128xf32>
    %128 = vector.extract_strided_slice %109 {offsets = [0, 384], sizes = [8, 128], strides = [1, 1]} : vector<8x512xf32> to vector<8x128xf32>
    %cst_53 = arith.constant 5.000000e-01 : f32
    %129 = vector.broadcast %cst_53 : f32 to vector<8x128xf32>
    %130 = arith.mulf %129, %128 : vector<8x128xf32>
    %131 = math.tanh %130 : vector<8x128xf32>
    %cst_54 = arith.constant 1.000000e+00 : f32
    %132 = vector.broadcast %cst_54 : f32 to vector<8x128xf32>
    %133 = arith.addf %131, %132 : vector<8x128xf32>
    %cst_55 = arith.constant 5.000000e-01 : f32
    %134 = vector.broadcast %cst_55 : f32 to vector<8x128xf32>
    %135 = arith.mulf %134, %133 : vector<8x128xf32>
    %136 = arith.mulf %125, %95 : vector<8x128xf32>
    %137 = arith.mulf %117, %127 : vector<8x128xf32>
    %138 = arith.addf %136, %137 : vector<8x128xf32>
    %139 = math.tanh %138 : vector<8x128xf32>
    %140 = arith.mulf %135, %139 : vector<8x128xf32>
    %141 = arith.addi %14, %c2_i32 : i32
    %142 = vector.broadcast %141 : i32 to vector<8x1xi32>
    %143 = arith.cmpi eq, %142, %6 : vector<8x1xi32>
    %144 = vector.shape_cast %143 : vector<8x1xi1> to vector<8x1xi1>
    %145 = vector.broadcast %144 : vector<8x1xi1> to vector<8x128xi1>
    %146 = arith.select %145, %140, %103 : vector<8x128xi1>, vector<8x128xf32>
    %c3_i32 = arith.constant 3 : i32
    %c8_i32_56 = arith.constant 8 : i32
    %147 = arith.muli %c3_i32, %c8_i32_56 : i32
    %148 = tpu.assume_multiple %147, 8 : i32
    %149 = arith.index_cast %148 : i32 to index
    %c0_57 = arith.constant 0 : index
    %150 = vector.load %arg13[%149, %c0_57] : memref<64x512xf32, #tpu.memory_space<vmem>>, vector<8x512xf32>
    %cst_58 = arith.constant dense<0.000000e+00> : vector<8x512xf32>
    %151 = tpu.matmul %140, %3, %cst_58 {dimension_numbers = #tpu.dot_dimension_numbers<[1], [0], [0], [1], [0, 0, 1, 1], [], []>} : vector<8x128xf32>, vector<128x512xf32>, vector<8x512xf32> -> vector<8x512xf32>
    %152 = arith.addf %150, %151 : vector<8x512xf32>
    %153 = vector.extract_strided_slice %152 {offsets = [0, 0], sizes = [8, 128], strides = [1, 1]} : vector<8x512xf32> to vector<8x128xf32>
    %cst_59 = arith.constant 5.000000e-01 : f32
    %154 = vector.broadcast %cst_59 : f32 to vector<8x128xf32>
    %155 = arith.mulf %154, %153 : vector<8x128xf32>
    %156 = math.tanh %155 : vector<8x128xf32>
    %cst_60 = arith.constant 1.000000e+00 : f32
    %157 = vector.broadcast %cst_60 : f32 to vector<8x128xf32>
    %158 = arith.addf %156, %157 : vector<8x128xf32>
    %cst_61 = arith.constant 5.000000e-01 : f32
    %159 = vector.broadcast %cst_61 : f32 to vector<8x128xf32>
    %160 = arith.mulf %159, %158 : vector<8x128xf32>
    %161 = vector.extract_strided_slice %152 {offsets = [0, 128], sizes = [8, 128], strides = [1, 1]} : vector<8x512xf32> to vector<8x128xf32>
    %cst_62 = arith.constant 5.000000e-01 : f32
    %162 = vector.broadcast %cst_62 : f32 to vector<8x128xf32>
    %163 = arith.mulf %162, %161 : vector<8x128xf32>
    %164 = math.tanh %163 : vector<8x128xf32>
    %cst_63 = arith.constant 1.000000e+00 : f32
    %165 = vector.broadcast %cst_63 : f32 to vector<8x128xf32>
    %166 = arith.addf %164, %165 : vector<8x128xf32>
    %cst_64 = arith.constant 5.000000e-01 : f32
    %167 = vector.broadcast %cst_64 : f32 to vector<8x128xf32>
    %168 = arith.mulf %167, %166 : vector<8x128xf32>
    %169 = vector.extract_strided_slice %152 {offsets = [0, 256], sizes = [8, 128], strides = [1, 1]} : vector<8x512xf32> to vector<8x128xf32>
    %170 = math.tanh %169 : vector<8x128xf32>
    %171 = vector.extract_strided_slice %152 {offsets = [0, 384], sizes = [8, 128], strides = [1, 1]} : vector<8x512xf32> to vector<8x128xf32>
    %cst_65 = arith.constant 5.000000e-01 : f32
    %172 = vector.broadcast %cst_65 : f32 to vector<8x128xf32>
    %173 = arith.mulf %172, %171 : vector<8x128xf32>
    %174 = math.tanh %173 : vector<8x128xf32>
    %cst_66 = arith.constant 1.000000e+00 : f32
    %175 = vector.broadcast %cst_66 : f32 to vector<8x128xf32>
    %176 = arith.addf %174, %175 : vector<8x128xf32>
    %cst_67 = arith.constant 5.000000e-01 : f32
    %177 = vector.broadcast %cst_67 : f32 to vector<8x128xf32>
    %178 = arith.mulf %177, %176 : vector<8x128xf32>
    %179 = arith.mulf %168, %138 : vector<8x128xf32>
    %180 = arith.mulf %160, %170 : vector<8x128xf32>
    %181 = arith.addf %179, %180 : vector<8x128xf32>
    %182 = math.tanh %181 : vector<8x128xf32>
    %183 = arith.mulf %178, %182 : vector<8x128xf32>
    %184 = arith.addi %14, %c3_i32 : i32
    %185 = vector.broadcast %184 : i32 to vector<8x1xi32>
    %186 = arith.cmpi eq, %185, %6 : vector<8x1xi32>
    %187 = vector.shape_cast %186 : vector<8x1xi1> to vector<8x1xi1>
    %188 = vector.broadcast %187 : vector<8x1xi1> to vector<8x128xi1>
    %189 = arith.select %188, %183, %146 : vector<8x128xi1>, vector<8x128xf32>
    %c4_i32 = arith.constant 4 : i32
    %c8_i32_68 = arith.constant 8 : i32
    %190 = arith.muli %c4_i32, %c8_i32_68 : i32
    %191 = tpu.assume_multiple %190, 8 : i32
    %192 = arith.index_cast %191 : i32 to index
    %c0_69 = arith.constant 0 : index
    %193 = vector.load %arg13[%192, %c0_69] : memref<64x512xf32, #tpu.memory_space<vmem>>, vector<8x512xf32>
    %cst_70 = arith.constant dense<0.000000e+00> : vector<8x512xf32>
    %194 = tpu.matmul %183, %3, %cst_70 {dimension_numbers = #tpu.dot_dimension_numbers<[1], [0], [0], [1], [0, 0, 1, 1], [], []>} : vector<8x128xf32>, vector<128x512xf32>, vector<8x512xf32> -> vector<8x512xf32>
    %195 = arith.addf %193, %194 : vector<8x512xf32>
    %196 = vector.extract_strided_slice %195 {offsets = [0, 0], sizes = [8, 128], strides = [1, 1]} : vector<8x512xf32> to vector<8x128xf32>
    %cst_71 = arith.constant 5.000000e-01 : f32
    %197 = vector.broadcast %cst_71 : f32 to vector<8x128xf32>
    %198 = arith.mulf %197, %196 : vector<8x128xf32>
    %199 = math.tanh %198 : vector<8x128xf32>
    %cst_72 = arith.constant 1.000000e+00 : f32
    %200 = vector.broadcast %cst_72 : f32 to vector<8x128xf32>
    %201 = arith.addf %199, %200 : vector<8x128xf32>
    %cst_73 = arith.constant 5.000000e-01 : f32
    %202 = vector.broadcast %cst_73 : f32 to vector<8x128xf32>
    %203 = arith.mulf %202, %201 : vector<8x128xf32>
    %204 = vector.extract_strided_slice %195 {offsets = [0, 128], sizes = [8, 128], strides = [1, 1]} : vector<8x512xf32> to vector<8x128xf32>
    %cst_74 = arith.constant 5.000000e-01 : f32
    %205 = vector.broadcast %cst_74 : f32 to vector<8x128xf32>
    %206 = arith.mulf %205, %204 : vector<8x128xf32>
    %207 = math.tanh %206 : vector<8x128xf32>
    %cst_75 = arith.constant 1.000000e+00 : f32
    %208 = vector.broadcast %cst_75 : f32 to vector<8x128xf32>
    %209 = arith.addf %207, %208 : vector<8x128xf32>
    %cst_76 = arith.constant 5.000000e-01 : f32
    %210 = vector.broadcast %cst_76 : f32 to vector<8x128xf32>
    %211 = arith.mulf %210, %209 : vector<8x128xf32>
    %212 = vector.extract_strided_slice %195 {offsets = [0, 256], sizes = [8, 128], strides = [1, 1]} : vector<8x512xf32> to vector<8x128xf32>
    %213 = math.tanh %212 : vector<8x128xf32>
    %214 = vector.extract_strided_slice %195 {offsets = [0, 384], sizes = [8, 128], strides = [1, 1]} : vector<8x512xf32> to vector<8x128xf32>
    %cst_77 = arith.constant 5.000000e-01 : f32
    %215 = vector.broadcast %cst_77 : f32 to vector<8x128xf32>
    %216 = arith.mulf %215, %214 : vector<8x128xf32>
    %217 = math.tanh %216 : vector<8x128xf32>
    %cst_78 = arith.constant 1.000000e+00 : f32
    %218 = vector.broadcast %cst_78 : f32 to vector<8x128xf32>
    %219 = arith.addf %217, %218 : vector<8x128xf32>
    %cst_79 = arith.constant 5.000000e-01 : f32
    %220 = vector.broadcast %cst_79 : f32 to vector<8x128xf32>
    %221 = arith.mulf %220, %219 : vector<8x128xf32>
    %222 = arith.mulf %211, %181 : vector<8x128xf32>
    %223 = arith.mulf %203, %213 : vector<8x128xf32>
    %224 = arith.addf %222, %223 : vector<8x128xf32>
    %225 = math.tanh %224 : vector<8x128xf32>
    %226 = arith.mulf %221, %225 : vector<8x128xf32>
    %227 = arith.addi %14, %c4_i32 : i32
    %228 = vector.broadcast %227 : i32 to vector<8x1xi32>
    %229 = arith.cmpi eq, %228, %6 : vector<8x1xi32>
    %230 = vector.shape_cast %229 : vector<8x1xi1> to vector<8x1xi1>
    %231 = vector.broadcast %230 : vector<8x1xi1> to vector<8x128xi1>
    %232 = arith.select %231, %226, %189 : vector<8x128xi1>, vector<8x128xf32>
    %c5_i32 = arith.constant 5 : i32
    %c8_i32_80 = arith.constant 8 : i32
    %233 = arith.muli %c5_i32, %c8_i32_80 : i32
    %234 = tpu.assume_multiple %233, 8 : i32
    %235 = arith.index_cast %234 : i32 to index
    %c0_81 = arith.constant 0 : index
    %236 = vector.load %arg13[%235, %c0_81] : memref<64x512xf32, #tpu.memory_space<vmem>>, vector<8x512xf32>
    %cst_82 = arith.constant dense<0.000000e+00> : vector<8x512xf32>
    %237 = tpu.matmul %226, %3, %cst_82 {dimension_numbers = #tpu.dot_dimension_numbers<[1], [0], [0], [1], [0, 0, 1, 1], [], []>} : vector<8x128xf32>, vector<128x512xf32>, vector<8x512xf32> -> vector<8x512xf32>
    %238 = arith.addf %236, %237 : vector<8x512xf32>
    %239 = vector.extract_strided_slice %238 {offsets = [0, 0], sizes = [8, 128], strides = [1, 1]} : vector<8x512xf32> to vector<8x128xf32>
    %cst_83 = arith.constant 5.000000e-01 : f32
    %240 = vector.broadcast %cst_83 : f32 to vector<8x128xf32>
    %241 = arith.mulf %240, %239 : vector<8x128xf32>
    %242 = math.tanh %241 : vector<8x128xf32>
    %cst_84 = arith.constant 1.000000e+00 : f32
    %243 = vector.broadcast %cst_84 : f32 to vector<8x128xf32>
    %244 = arith.addf %242, %243 : vector<8x128xf32>
    %cst_85 = arith.constant 5.000000e-01 : f32
    %245 = vector.broadcast %cst_85 : f32 to vector<8x128xf32>
    %246 = arith.mulf %245, %244 : vector<8x128xf32>
    %247 = vector.extract_strided_slice %238 {offsets = [0, 128], sizes = [8, 128], strides = [1, 1]} : vector<8x512xf32> to vector<8x128xf32>
    %cst_86 = arith.constant 5.000000e-01 : f32
    %248 = vector.broadcast %cst_86 : f32 to vector<8x128xf32>
    %249 = arith.mulf %248, %247 : vector<8x128xf32>
    %250 = math.tanh %249 : vector<8x128xf32>
    %cst_87 = arith.constant 1.000000e+00 : f32
    %251 = vector.broadcast %cst_87 : f32 to vector<8x128xf32>
    %252 = arith.addf %250, %251 : vector<8x128xf32>
    %cst_88 = arith.constant 5.000000e-01 : f32
    %253 = vector.broadcast %cst_88 : f32 to vector<8x128xf32>
    %254 = arith.mulf %253, %252 : vector<8x128xf32>
    %255 = vector.extract_strided_slice %238 {offsets = [0, 256], sizes = [8, 128], strides = [1, 1]} : vector<8x512xf32> to vector<8x128xf32>
    %256 = math.tanh %255 : vector<8x128xf32>
    %257 = vector.extract_strided_slice %238 {offsets = [0, 384], sizes = [8, 128], strides = [1, 1]} : vector<8x512xf32> to vector<8x128xf32>
    %cst_89 = arith.constant 5.000000e-01 : f32
    %258 = vector.broadcast %cst_89 : f32 to vector<8x128xf32>
    %259 = arith.mulf %258, %257 : vector<8x128xf32>
    %260 = math.tanh %259 : vector<8x128xf32>
    %cst_90 = arith.constant 1.000000e+00 : f32
    %261 = vector.broadcast %cst_90 : f32 to vector<8x128xf32>
    %262 = arith.addf %260, %261 : vector<8x128xf32>
    %cst_91 = arith.constant 5.000000e-01 : f32
    %263 = vector.broadcast %cst_91 : f32 to vector<8x128xf32>
    %264 = arith.mulf %263, %262 : vector<8x128xf32>
    %265 = arith.mulf %254, %224 : vector<8x128xf32>
    %266 = arith.mulf %246, %256 : vector<8x128xf32>
    %267 = arith.addf %265, %266 : vector<8x128xf32>
    %268 = math.tanh %267 : vector<8x128xf32>
    %269 = arith.mulf %264, %268 : vector<8x128xf32>
    %270 = arith.addi %14, %c5_i32 : i32
    %271 = vector.broadcast %270 : i32 to vector<8x1xi32>
    %272 = arith.cmpi eq, %271, %6 : vector<8x1xi32>
    %273 = vector.shape_cast %272 : vector<8x1xi1> to vector<8x1xi1>
    %274 = vector.broadcast %273 : vector<8x1xi1> to vector<8x128xi1>
    %275 = arith.select %274, %269, %232 : vector<8x128xi1>, vector<8x128xf32>
    %c6_i32 = arith.constant 6 : i32
    %c8_i32_92 = arith.constant 8 : i32
    %276 = arith.muli %c6_i32, %c8_i32_92 : i32
    %277 = tpu.assume_multiple %276, 8 : i32
    %278 = arith.index_cast %277 : i32 to index
    %c0_93 = arith.constant 0 : index
    %279 = vector.load %arg13[%278, %c0_93] : memref<64x512xf32, #tpu.memory_space<vmem>>, vector<8x512xf32>
    %cst_94 = arith.constant dense<0.000000e+00> : vector<8x512xf32>
    %280 = tpu.matmul %269, %3, %cst_94 {dimension_numbers = #tpu.dot_dimension_numbers<[1], [0], [0], [1], [0, 0, 1, 1], [], []>} : vector<8x128xf32>, vector<128x512xf32>, vector<8x512xf32> -> vector<8x512xf32>
    %281 = arith.addf %279, %280 : vector<8x512xf32>
    %282 = vector.extract_strided_slice %281 {offsets = [0, 0], sizes = [8, 128], strides = [1, 1]} : vector<8x512xf32> to vector<8x128xf32>
    %cst_95 = arith.constant 5.000000e-01 : f32
    %283 = vector.broadcast %cst_95 : f32 to vector<8x128xf32>
    %284 = arith.mulf %283, %282 : vector<8x128xf32>
    %285 = math.tanh %284 : vector<8x128xf32>
    %cst_96 = arith.constant 1.000000e+00 : f32
    %286 = vector.broadcast %cst_96 : f32 to vector<8x128xf32>
    %287 = arith.addf %285, %286 : vector<8x128xf32>
    %cst_97 = arith.constant 5.000000e-01 : f32
    %288 = vector.broadcast %cst_97 : f32 to vector<8x128xf32>
    %289 = arith.mulf %288, %287 : vector<8x128xf32>
    %290 = vector.extract_strided_slice %281 {offsets = [0, 128], sizes = [8, 128], strides = [1, 1]} : vector<8x512xf32> to vector<8x128xf32>
    %cst_98 = arith.constant 5.000000e-01 : f32
    %291 = vector.broadcast %cst_98 : f32 to vector<8x128xf32>
    %292 = arith.mulf %291, %290 : vector<8x128xf32>
    %293 = math.tanh %292 : vector<8x128xf32>
    %cst_99 = arith.constant 1.000000e+00 : f32
    %294 = vector.broadcast %cst_99 : f32 to vector<8x128xf32>
    %295 = arith.addf %293, %294 : vector<8x128xf32>
    %cst_100 = arith.constant 5.000000e-01 : f32
    %296 = vector.broadcast %cst_100 : f32 to vector<8x128xf32>
    %297 = arith.mulf %296, %295 : vector<8x128xf32>
    %298 = vector.extract_strided_slice %281 {offsets = [0, 256], sizes = [8, 128], strides = [1, 1]} : vector<8x512xf32> to vector<8x128xf32>
    %299 = math.tanh %298 : vector<8x128xf32>
    %300 = vector.extract_strided_slice %281 {offsets = [0, 384], sizes = [8, 128], strides = [1, 1]} : vector<8x512xf32> to vector<8x128xf32>
    %cst_101 = arith.constant 5.000000e-01 : f32
    %301 = vector.broadcast %cst_101 : f32 to vector<8x128xf32>
    %302 = arith.mulf %301, %300 : vector<8x128xf32>
    %303 = math.tanh %302 : vector<8x128xf32>
    %cst_102 = arith.constant 1.000000e+00 : f32
    %304 = vector.broadcast %cst_102 : f32 to vector<8x128xf32>
    %305 = arith.addf %303, %304 : vector<8x128xf32>
    %cst_103 = arith.constant 5.000000e-01 : f32
    %306 = vector.broadcast %cst_103 : f32 to vector<8x128xf32>
    %307 = arith.mulf %306, %305 : vector<8x128xf32>
    %308 = arith.mulf %297, %267 : vector<8x128xf32>
    %309 = arith.mulf %289, %299 : vector<8x128xf32>
    %310 = arith.addf %308, %309 : vector<8x128xf32>
    %311 = math.tanh %310 : vector<8x128xf32>
    %312 = arith.mulf %307, %311 : vector<8x128xf32>
    %313 = arith.addi %14, %c6_i32 : i32
    %314 = vector.broadcast %313 : i32 to vector<8x1xi32>
    %315 = arith.cmpi eq, %314, %6 : vector<8x1xi32>
    %316 = vector.shape_cast %315 : vector<8x1xi1> to vector<8x1xi1>
    %317 = vector.broadcast %316 : vector<8x1xi1> to vector<8x128xi1>
    %318 = arith.select %317, %312, %275 : vector<8x128xi1>, vector<8x128xf32>
    %c7_i32 = arith.constant 7 : i32
    %c8_i32_104 = arith.constant 8 : i32
    %319 = arith.muli %c7_i32, %c8_i32_104 : i32
    %320 = tpu.assume_multiple %319, 8 : i32
    %321 = arith.index_cast %320 : i32 to index
    %c0_105 = arith.constant 0 : index
    %322 = vector.load %arg13[%321, %c0_105] : memref<64x512xf32, #tpu.memory_space<vmem>>, vector<8x512xf32>
    %cst_106 = arith.constant dense<0.000000e+00> : vector<8x512xf32>
    %323 = tpu.matmul %312, %3, %cst_106 {dimension_numbers = #tpu.dot_dimension_numbers<[1], [0], [0], [1], [0, 0, 1, 1], [], []>} : vector<8x128xf32>, vector<128x512xf32>, vector<8x512xf32> -> vector<8x512xf32>
    %324 = arith.addf %322, %323 : vector<8x512xf32>
    %325 = vector.extract_strided_slice %324 {offsets = [0, 0], sizes = [8, 128], strides = [1, 1]} : vector<8x512xf32> to vector<8x128xf32>
    %cst_107 = arith.constant 5.000000e-01 : f32
    %326 = vector.broadcast %cst_107 : f32 to vector<8x128xf32>
    %327 = arith.mulf %326, %325 : vector<8x128xf32>
    %328 = math.tanh %327 : vector<8x128xf32>
    %cst_108 = arith.constant 1.000000e+00 : f32
    %329 = vector.broadcast %cst_108 : f32 to vector<8x128xf32>
    %330 = arith.addf %328, %329 : vector<8x128xf32>
    %cst_109 = arith.constant 5.000000e-01 : f32
    %331 = vector.broadcast %cst_109 : f32 to vector<8x128xf32>
    %332 = arith.mulf %331, %330 : vector<8x128xf32>
    %333 = vector.extract_strided_slice %324 {offsets = [0, 128], sizes = [8, 128], strides = [1, 1]} : vector<8x512xf32> to vector<8x128xf32>
    %cst_110 = arith.constant 5.000000e-01 : f32
    %334 = vector.broadcast %cst_110 : f32 to vector<8x128xf32>
    %335 = arith.mulf %334, %333 : vector<8x128xf32>
    %336 = math.tanh %335 : vector<8x128xf32>
    %cst_111 = arith.constant 1.000000e+00 : f32
    %337 = vector.broadcast %cst_111 : f32 to vector<8x128xf32>
    %338 = arith.addf %336, %337 : vector<8x128xf32>
    %cst_112 = arith.constant 5.000000e-01 : f32
    %339 = vector.broadcast %cst_112 : f32 to vector<8x128xf32>
    %340 = arith.mulf %339, %338 : vector<8x128xf32>
    %341 = vector.extract_strided_slice %324 {offsets = [0, 256], sizes = [8, 128], strides = [1, 1]} : vector<8x512xf32> to vector<8x128xf32>
    %342 = math.tanh %341 : vector<8x128xf32>
    %343 = vector.extract_strided_slice %324 {offsets = [0, 384], sizes = [8, 128], strides = [1, 1]} : vector<8x512xf32> to vector<8x128xf32>
    %cst_113 = arith.constant 5.000000e-01 : f32
    %344 = vector.broadcast %cst_113 : f32 to vector<8x128xf32>
    %345 = arith.mulf %344, %343 : vector<8x128xf32>
    %346 = math.tanh %345 : vector<8x128xf32>
    %cst_114 = arith.constant 1.000000e+00 : f32
    %347 = vector.broadcast %cst_114 : f32 to vector<8x128xf32>
    %348 = arith.addf %346, %347 : vector<8x128xf32>
    %cst_115 = arith.constant 5.000000e-01 : f32
    %349 = vector.broadcast %cst_115 : f32 to vector<8x128xf32>
    %350 = arith.mulf %349, %348 : vector<8x128xf32>
    %351 = arith.mulf %340, %310 : vector<8x128xf32>
    %352 = arith.mulf %332, %342 : vector<8x128xf32>
    %353 = arith.addf %351, %352 : vector<8x128xf32>
    %354 = math.tanh %353 : vector<8x128xf32>
    %355 = arith.mulf %350, %354 : vector<8x128xf32>
    %356 = arith.addi %14, %c7_i32 : i32
    %357 = vector.broadcast %356 : i32 to vector<8x1xi32>
    %358 = arith.cmpi eq, %357, %6 : vector<8x1xi32>
    %359 = vector.shape_cast %358 : vector<8x1xi1> to vector<8x1xi1>
    %360 = vector.broadcast %359 : vector<8x1xi1> to vector<8x128xi1>
    %361 = arith.select %360, %355, %318 : vector<8x128xi1>, vector<8x128xf32>
    %c8_i32_116 = arith.constant 8 : i32
    %c0_117 = arith.constant 0 : index
    %c0_118 = arith.constant 0 : index
    %362 = vector.load %arg10[%c0_117, %c0_118] : memref<8x128xf32, #tpu.memory_space<vmem>>, vector<8x128xf32>
    tpu.vector_store %arg10[%c0_117, %c0_118], %355 {strides = array<i32>} : memref<8x128xf32, #tpu.memory_space<vmem>>, vector<8x128xf32>,
    %c0_119 = arith.constant 0 : index
    %c0_120 = arith.constant 0 : index
    %363 = vector.load %arg11[%c0_119, %c0_120] : memref<8x128xf32, #tpu.memory_space<vmem>>, vector<8x128xf32>
    tpu.vector_store %arg11[%c0_119, %c0_120], %353 {strides = array<i32>} : memref<8x128xf32, #tpu.memory_space<vmem>>, vector<8x128xf32>,
    %c0_121 = arith.constant 0 : index
    %c0_122 = arith.constant 0 : index
    %364 = vector.load %arg12[%c0_121, %c0_122] : memref<8x128xf32, #tpu.memory_space<vmem>>, vector<8x128xf32>
    tpu.vector_store %arg12[%c0_121, %c0_122], %361 {strides = array<i32>} : memref<8x128xf32, #tpu.memory_space<vmem>>, vector<8x128xf32>,
    %c0_i32_123 = arith.constant 0 : i32
    %365 = arith.cmpi eq, %arg1, %c0_i32_123 : i32
    %366 = arith.extui %365 : i1 to i32
    %c0_i32_124 = arith.constant 0 : i32
    %367 = arith.cmpi ne, %366, %c0_i32_124 : i32
    scf.if %367 {
      %c0_125 = arith.constant 0 : index
      %c0_126 = arith.constant 0 : index
      %368 = vector.load %arg7[%c0_125, %c0_126] : memref<128x8xf32, #tpu.memory_space<vmem>>, vector<128x8xf32>
      %cst_127 = arith.constant dense<0.000000e+00> : vector<8x8xf32>
      %369 = tpu.matmul %361, %368, %cst_127 {dimension_numbers = #tpu.dot_dimension_numbers<[1], [0], [0], [1], [0, 0, 1, 1], [], []>} : vector<8x128xf32>, vector<128x8xf32>, vector<8x8xf32> -> vector<8x8xf32>
      %c0_128 = arith.constant 0 : index
      %c0_129 = arith.constant 0 : index
      %370 = vector.load %arg8[%c0_128, %c0_129] : memref<1x8xf32, #tpu.memory_space<vmem>>, vector<1x8xf32>
      %371 = vector.broadcast %370 : vector<1x8xf32> to vector<8x8xf32>
      %372 = arith.addf %369, %371 : vector<8x8xf32>
      %c0_130 = arith.constant 0 : index
      %c0_131 = arith.constant 0 : index
      %373 = vector.load %arg9[%c0_130, %c0_131] : memref<8x8xf32, #tpu.memory_space<vmem>>, vector<8x8xf32>
      tpu.vector_store %arg9[%c0_130, %c0_131], %372 {strides = array<i32>} : memref<8x8xf32, #tpu.memory_space<vmem>>, vector<8x8xf32>,
    } else {
    }
    return
  }
  func.func @transform_0(%arg0: i32, %arg1: i32) -> (i32, i32) {
    %c1_i32 = arith.constant 1 : i32
    %0 = arith.muli %arg0, %c1_i32 : i32
    %1 = arith.addi %0, %arg1 : i32
    %c0_i32 = arith.constant 0 : i32
    %c0_i32_0 = arith.constant 0 : i32
    return %1, %c0_i32 : i32, i32
  }
  func.func @transform_1(%arg0: i32, %arg1: i32) -> (i32, i32) {
    %c0_i32 = arith.constant 0 : i32
    %c0_i32_0 = arith.constant 0 : i32
    return %arg0, %c0_i32 : i32, i32
  }
  func.func @transform_2(%arg0: i32, %arg1: i32) -> (i32, i32) {
    %c0_i32 = arith.constant 0 : i32
    %c0_i32_0 = arith.constant 0 : i32
    %c0_i32_1 = arith.constant 0 : i32
    return %c0_i32, %c0_i32_0 : i32, i32
  }
  func.func @transform_3(%arg0: i32, %arg1: i32) -> (i32, i32) {
    %c0_i32 = arith.constant 0 : i32
    %c0_i32_0 = arith.constant 0 : i32
    %c0_i32_1 = arith.constant 0 : i32
    return %c0_i32, %c0_i32_0 : i32, i32
  }
  func.func @transform_4(%arg0: i32, %arg1: i32) -> (i32, i32) {
    %c0_i32 = arith.constant 0 : i32
    %c0_i32_0 = arith.constant 0 : i32
    %c0_i32_1 = arith.constant 0 : i32
    return %c0_i32, %c0_i32_0 : i32, i32
  }
  func.func @transform_5(%arg0: i32, %arg1: i32) -> (i32, i32) {
    %c0_i32 = arith.constant 0 : i32
    %c0_i32_0 = arith.constant 0 : i32
    %c0_i32_1 = arith.constant 0 : i32
    return %c0_i32, %c0_i32_0 : i32, i32
  }
  func.func @transform_6(%arg0: i32, %arg1: i32) -> (i32, i32) {
    %c0_i32 = arith.constant 0 : i32
    %c0_i32_0 = arith.constant 0 : i32
    %c0_i32_1 = arith.constant 0 : i32
    return %c0_i32, %c0_i32_0 : i32, i32
  }
  func.func @transform_7(%arg0: i32, %arg1: i32) -> (i32, i32) {
    %c0_i32 = arith.constant 0 : i32
    %c0_i32_0 = arith.constant 0 : i32
    return %arg0, %c0_i32 : i32, i32
  }
}

</mosaic_0001>

<bundles_post_ra>
// kernel: tpu_custom_call.1
= control target key start
LH: loop header
LB: loop body
LE: loop exit
PB: predicated region body
PF: predicated region fallthrough
CT: control target
= control target key end

     0   :  { %12 = vsyncpa [#allocation7], 0  ;;  %s3512_s0 = inlined_call_operand.vmem [shape: f32[64,16], index: 0, kind: input, shape index: {}]   ;;  %s3513_s1 = inlined_call_operand.vmem [shape: s32[8,1], index: 1, kind: input, shape index: {}]   ;;  %s3514_s2 = inlined_call_operand.vmem [shape: f32[16,512], index: 2, kind: input, shape index: {}]   ;;  %s3515_s3 = inlined_call_operand.hbm [shape: f32[128,512], index: 3, kind: input, shape index: {}]   ;;  %s3516_s4 = inlined_call_operand.vmem [shape: f32[1,512], index: 4, kind: input, shape index: {}]   ;;  %s3517_s5 = inlined_call_operand.vmem [shape: f32[128,8], index: 5, kind: input, shape index: {}]   ;;  %s3518_s6 = inlined_call_operand.vmem [shape: f32[1,8], index: 6, kind: input, shape index: {}]   ;;  %s3519_s7 = inlined_call_operand.hbm [shape: f32[8,8], index: 7, kind: output, shape index: {}]  }
   0x1   :  { %13 = vsyncpa [#allocation8], 0  ;;  %s2853_s24 = smov [#allocation6]   ;;  %s2805_s28 = scalar_lea.hbm %s3515_s3, 8192 }
   0x2   :  { %s33_s25 = sshll.u32 %s2853_s24, 4  ;;  %p2806_p0 = scmp.ne.s32.totalorder %s3515_s3, %s2805_s28  ;;  %s34_s25 = int_to_ptr.vmem [resolvable:$true] %s33_s25 }
   0x3   :  { %p2809_p1 = scmp.lt.u32.totalorder %s2805_s28, %s3515_s3 }
   0x5   :  { %p2811_p2 = pnand %p2809_p1, %p2806_p0 }
   0x7   :  { %2814 = shalt.err (!%p2811_p2)
}
   0x8   :  { %s2815_s10 = scalar_lea.vmem %s34_s25, 8192  ;;  %p2820_p4 = scmp.lt.s32.totalorder %s34_s25, %s34_s25 }
   0x9   :  { %p2816_p3 = scmp.ne.s32.totalorder %s34_s25, %s2815_s10  ;;  %p2821_p5 = scmp.lt.s32.totalorder %s2815_s10, %s2815_s10 }
   0xb   :  { %p2822_p6 = por %p2821_p5, %p2820_p4 }
   0xd   :  { %p2823_p7 = pnand %p2822_p6, %p2816_p3 }
   0xf   :  { %2826 = shalt.err (!%p2823_p7)
}
  0x10   :  { %s2854_s11 = smov 512   ;;  %s2855_s12 = smov 32  }
  0x11   :  { %39 = dma.hbm_to_vmem [thread:$0]  %s3515_s3, 8192, %s34_s25, [#allocation7], %s2854_s11, %s2854_s11, %s2855_s12  }
  0x12   :  { %2849 = dma.done.wait [#allocation7], 8192  }
  0x13   :  { %2850 = vsyncadd [#allocation7], 4294959104  ;;  %v2856_v0 = vmov 0.0   ;;  %v2857_v1 = vmov 0   ;;  %v145_v2 = vld [vmem:[%s3514_s2 + $0x8] sm:$0xff]  ;;  %v147_v4 = vld [vmem:[%s3514_s2 + $0x18] sm:$0xff] }
  0x14   :  { %263 = vmatprep.mubr.f32.mxu0 %v2856_v0  ;;  %376 = vmatprep.mubr.f32.mxu1 %v2856_v0  ;;  %v149_v3 = vld [vmem:[%s3514_s2 + $0x28] sm:$0xff]  ;;  %v151_v6 = vld [vmem:[%s3514_s2 + $0x38] sm:$0xff]  ;;  %v144_v7 = vld [vmem:[%s3514_s2] sm:$0xff]  ;;  %vm174_vm0 = vcmask 130048   ;;  %s2860_s27 = smov [#allocation9]  }
  0x15   :  { %2723 = vset.pattern.permute.xlu0 %v2857_v1  ;;  %2724 = vset.pattern.permute.xlu1 %v2857_v1  ;;  %v2107_v5 = vpack.c.bf16 %v149_v3, %v145_v2  ;;  %v148_v8 = vld [vmem:[%s3514_s2 + $0x20] sm:$0xff]  ;;  %v2111_v9 = vpack.c.bf16 %v151_v6, %v147_v4  ;;  %v146_v11 = vld [vmem:[%s3514_s2 + $0x10] sm:$0xff]  ;;  %v71_v15 = vld [vmem:[#allocation6 + $0x8] sm:$0xff]  ;;  %s2007_s28 = sshll.u32 %s2860_s27, 4  ;;  %s2008_s28 = int_to_ptr.vmem [resolvable:$true] %s2007_s28 }
  0x16   :  { %v2109_v10 = vpack.c.bf16 %v148_v8, %v144_v7  ;;  %v150_v12 = vld [vmem:[%s3514_s2 + $0x30] sm:$0xff]  ;;  %v136_v13 = vld [vmem:[%s3512_s0] sm:$0xff]  ;;  %v75_v16 = vld [vmem:[#allocation6 + $0x28] sm:$0xff]  ;;  %s2827_s29 = scalar_lea.vmem %s2008_s28, 128  ;;  %p2832_p9 = scmp.lt.s32.totalorder %s2008_s28, %s2008_s28 }
  0x17   :  { %2108 = vmatprep.subr.bf16.mxu0 %v2107_v5  ;;  %v2113_v14 = vpack.c.bf16 %v150_v12, %v146_v11  ;;  %v73_v17 = vld [vmem:[#allocation6 + $0x18] sm:$0xff]  ;;  %2112 = vmatprep.subr.bf16.mxu1 %v2111_v9  ;;  %v2944_v18 = vpack.c.bf16 %v75_v16, %v71_v15  ;;  %v70_v20 = vld [vmem:[#allocation6] sm:$0xff]  ;;  %v72_v24 = vld [vmem:[#allocation6 + $0x10] sm:$0xff]  ;;  %p2828_p8 = scmp.ne.s32.totalorder %s2008_s28, %s2827_s29  ;;  %p2833_p10 = scmp.lt.s32.totalorder %s2827_s29, %s2827_s29 }
  0x18   :  { %2110 = vmatpush1.bf16.msra.mxu0 %v2109_v10  ;;  %v77_v19 = vld [vmem:[#allocation6 + $0x38] sm:$0xff]  ;;  %v74_v21 = vld [vmem:[#allocation6 + $0x20] sm:$0xff]  ;;  %v76_v25 = vld [vmem:[#allocation6 + $0x30] sm:$0xff] }
  0x19   :  { %2114 = vmatpush1.bf16.msra.mxu1 %v2113_v14  ;;  %v2946_v22 = vpack.c.bf16 %v77_v19, %v73_v17  ;;  %v2948_v23 = vpack.c.bf16 %v74_v21, %v70_v20  ;;  %2116 = vmatprep.subr.bf16.mxu0 %v2944_v18  ;;  %v2951_v26 = vpack.c.bf16 %v76_v25, %v72_v24  ;;  %v79_v27 = vld [vmem:[#allocation6 + $0x48] sm:$0xff]  ;;  %v81_v29 = vld [vmem:[#allocation6 + $0x58] sm:$0xff]  ;;  %v78_v32 = vld [vmem:[#allocation6 + $0x40] sm:$0xff]  ;;  %p2834_p11 = por %p2833_p10, %p2832_p9 }
  0x1a   :  { %v83_v28 = vld [vmem:[#allocation6 + $0x68] sm:$0xff]  ;;  %v85_v31 = vld [vmem:[#allocation6 + $0x78] sm:$0xff]  ;;  %v82_v33 = vld [vmem:[#allocation6 + $0x60] sm:$0xff] }
  0x1b   :  { %2030 = vmatmul.mubr.msk.f32.vlgmr.msra.gmra.mrb[0].mxu0 %vm174_vm0, %v136_v13  ;;  %2148 = vmatprep.subr.bf16.mxu1 %v2946_v22  ;;  %v2955_v30 = vpack.c.bf16 %v83_v28, %v79_v27  ;;  %v137_v34 = vld [vmem:[%s3512_s0 + $0x8] sm:$0xff]  ;;  %v2962_v35 = vpack.c.bf16 %v85_v31, %v81_v29  ;;  %v2964_v36 = vpack.c.bf16 %v82_v33, %v78_v32  ;;  %v80_v37 = vld [vmem:[#allocation6 + $0x50] sm:$0xff]  ;;  %v89_v42 = vld [vmem:[#allocation6 + $0x98] sm:$0xff]  ;;  %p2835_p12 = pnand %p2834_p11, %p2828_p8 }
  0x1c   :  { %2038 = vmatmul.mubr.msk.f32.vlgmr.msra.gmra.mrb[0].mxu1 %vm174_vm0, %v136_v13  ;;  %2118 = vmatpush1.bf16.msra.mxu0 %v2948_v23  ;;  %v84_v38 = vld [vmem:[#allocation6 + $0x70] sm:$0xff]  ;;  %v87_v40 = vld [vmem:[#allocation6 + $0x88] sm:$0xff]  ;;  %v93_v44 = vld [vmem:[#allocation6 + $0xb8] sm:$0xff] }
  0x1d   :  { %2150 = vmatpush1.bf16.msra.mxu1 %v2951_v26  ;;  %269 = vmatprep.mubr.f32.mxu0 %v2856_v0  ;;  %v2968_v39 = vpack.c.bf16 %v84_v38, %v80_v37  ;;  %v91_v41 = vld [vmem:[#allocation6 + $0xa8] sm:$0xff]  ;;  %v86_v45 = vld [vmem:[#allocation6 + $0x80] sm:$0xff]  ;;  %v138_v47 = vld [vmem:[%s3512_s0 + $0x10] sm:$0xff]  ;;  %v2979_v48 = vpack.c.bf16 %v93_v44, %v89_v42 }
  0x1e   :  { %382 = vmatprep.mubr.f32.mxu1 %v2856_v0  ;;  %2120 = vmatprep.subr.bf16.mxu0 %v2955_v30  ;;  %v2972_v43 = vpack.c.bf16 %v91_v41, %v87_v40  ;;  %v90_v46 = vld [vmem:[#allocation6 + $0xa0] sm:$0xff]  ;;  %v88_v49 = vld [vmem:[#allocation6 + $0x90] sm:$0xff]  ;;  %v95_v52 = vld [vmem:[#allocation6 + $0xc8] sm:$0xff] }
  0x1f   :  { %2031 = vmatmul.mubr.msk.f32.gmra.mrb[2].mxu0 %vm174_vm0, %v137_v34  ;;  %2152 = vmatprep.subr.bf16.mxu1 %v2962_v35  ;;  %v92_v50 = vld [vmem:[#allocation6 + $0xb0] sm:$0xff]  ;;  %v2983_v51 = vpack.c.bf16 %v90_v46, %v86_v45  ;;  %v99_v53 = vld [vmem:[#allocation6 + $0xe8] sm:$0xff]  ;;  %v97_v54 = vld [vmem:[#allocation6 + $0xd8] sm:$0xff] }
  0x20   :  { %2039 = vmatmul.mubr.msk.f32.gmra.mrb[2].mxu1 %vm174_vm0, %v137_v34  ;;  %2122 = vmatpush1.bf16.msra.mxu0 %v2964_v36  ;;  %v2987_v55 = vpack.c.bf16 %v92_v50, %v88_v49  ;;  %v101_v56 = vld [vmem:[#allocation6 + $0xf8] sm:$0xff]  ;;  %v94_v57 = vld [vmem:[#allocation6 + $0xc0] sm:$0xff]  ;;  %v2991_v59 = vpack.c.bf16 %v99_v53, %v95_v52  ;;  %v96_v60 = vld [vmem:[#allocation6 + $0xd0] sm:$0xff] }
  0x21   :  { %2154 = vmatpush1.bf16.msra.mxu1 %v2968_v39  ;;  %275 = vmatprep.mubr.f32.mxu0 %v2856_v0  ;;  %v98_v58 = vld [vmem:[#allocation6 + $0xe0] sm:$0xff]  ;;  %v100_v61 = vld [vmem:[#allocation6 + $0xf0] sm:$0xff]  ;;  %v2995_v62 = vpack.c.bf16 %v101_v56, %v97_v54  ;;  %v103_v63 = vld [vmem:[#allocation6 + $0x108] sm:$0xff] }
  0x22   :  { %388 = vmatprep.mubr.f32.mxu1 %v2856_v0  ;;  %2124 = vmatprep.subr.bf16.mxu0 %v2972_v43  ;;  %v107_v2 = vld [vmem:[#allocation6 + $0x128] sm:$0xff]  ;;  %v139_v3 = vld [vmem:[%s3512_s0 + $0x18] sm:$0xff]  ;;  %v3002_v4 = vpack.c.bf16 %v98_v58, %v94_v57  ;;  %v3006_v7 = vpack.c.bf16 %v100_v61, %v96_v60  ;;  %v102_v8 = vld [vmem:[#allocation6 + $0x100] sm:$0xff] }
  0x23   :  { %2032 = vmatmul.mubr.msk.f32.gmra.mrb[4].mxu0 %vm174_vm0, %v138_v47  ;;  %2156 = vmatprep.subr.bf16.mxu1 %v2979_v48  ;;  %v105_v5 = vld [vmem:[#allocation6 + $0x118] sm:$0xff]  ;;  %v106_v9 = vld [vmem:[#allocation6 + $0x120] sm:$0xff]  ;;  %v3010_v10 = vpack.c.bf16 %v107_v2, %v103_v63  ;;  %v104_v11 = vld [vmem:[#allocation6 + $0x110] sm:$0xff] }
  0x24   :  { %2040 = vmatmul.mubr.msk.f32.gmra.mrb[4].mxu1 %vm174_vm0, %v138_v47  ;;  %2126 = vmatpush1.bf16.msra.mxu0 %v2983_v51  ;;  %v109_v6 = vld [vmem:[#allocation6 + $0x138] sm:$0xff]  ;;  %v108_v12 = vld [vmem:[#allocation6 + $0x130] sm:$0xff]  ;;  %v111_v14 = vld [vmem:[#allocation6 + $0x148] sm:$0xff]  ;;  %v3021_v17 = vpack.c.bf16 %v106_v9, %v102_v8 }
  0x25   :  { %2158 = vmatpush1.bf16.msra.mxu1 %v2987_v55  ;;  %281 = vmatprep.mubr.f32.mxu0 %v2856_v0  ;;  %v3014_v13 = vpack.c.bf16 %v109_v6, %v105_v5  ;;  %v115_v15 = vld [vmem:[#allocation6 + $0x168] sm:$0xff]  ;;  %v140_v16 = vld [vmem:[%s3512_s0 + $0x20] sm:$0xff]  ;;  %v113_v19 = vld [vmem:[#allocation6 + $0x158] sm:$0xff]  ;;  %v3025_v21 = vpack.c.bf16 %v108_v12, %v104_v11 }
  0x26   :  { %394 = vmatprep.mubr.f32.mxu1 %v2856_v0  ;;  %2128 = vmatprep.subr.bf16.mxu0 %v2991_v59  ;;  %v117_v20 = vld [vmem:[#allocation6 + $0x178] sm:$0xff]  ;;  %v110_v24 = vld [vmem:[#allocation6 + $0x140] sm:$0xff]  ;;  %v3029_v27 = vpack.c.bf16 %v115_v15, %v111_v14  ;;  %v112_v28 = vld [vmem:[#allocation6 + $0x150] sm:$0xff] }
  0x27   :  { %2033 = vmatmul.mubr.msk.f32.gmra.mrb[6].mxu0 %vm174_vm0, %v139_v3  ;;  %2160 = vmatprep.subr.bf16.mxu1 %v2995_v62  ;;  %v114_v25 = vld [vmem:[#allocation6 + $0x160] sm:$0xff]  ;;  %v116_v29 = vld [vmem:[#allocation6 + $0x170] sm:$0xff]  ;;  %v3033_v31 = vpack.c.bf16 %v117_v20, %v113_v19  ;;  %v119_v32 = vld [vmem:[#allocation6 + $0x188] sm:$0xff] }
  0x28   :  { %2041 = vmatmul.mubr.msk.f32.gmra.mrb[6].mxu1 %vm174_vm0, %v139_v3  ;;  %2130 = vmatpush1.bf16.msra.mxu0 %v3002_v4  ;;  %v123_v33 = vld [vmem:[#allocation6 + $0x1a8] sm:$0xff]  ;;  %v3040_v37 = vpack.c.bf16 %v114_v25, %v110_v24  ;;  %v121_v38 = vld [vmem:[#allocation6 + $0x198] sm:$0xff]  ;;  %v3044_v41 = vpack.c.bf16 %v116_v29, %v112_v28  ;;  %v118_v42 = vld [vmem:[#allocation6 + $0x180] sm:$0xff] }
  0x29   :  { %2162 = vmatpush1.bf16.msra.mxu1 %v3006_v7  ;;  %287 = vmatprep.mubr.f32.mxu0 %v2856_v0  ;;  %v141_v34 = vld [vmem:[%s3512_s0 + $0x28] sm:$0xff]  ;;  %v125_v40 = vld [vmem:[#allocation6 + $0x1b8] sm:$0xff]  ;;  %v122_v44 = vld [vmem:[#allocation6 + $0x1a0] sm:$0xff]  ;;  %v3048_v45 = vpack.c.bf16 %v123_v33, %v119_v32 }
  0x2a   :  { %400 = vmatprep.mubr.f32.mxu1 %v2856_v0  ;;  %2132 = vmatprep.subr.bf16.mxu0 %v3010_v10  ;;  %v120_v46 = vld [vmem:[#allocation6 + $0x190] sm:$0xff]  ;;  %v134_v49 = vld [vmem:[%s3513_s1] sm:$0xff]  ;;  %v3055_v50 = vpack.c.bf16 %v125_v40, %v121_v38  ;;  %v127_v52 = vld [vmem:[#allocation6 + $0x1c8] sm:$0xff]  ;;  %v3062_v56 = vpack.c.bf16 %v122_v44, %v118_v42 }
  0x2b   :  { %2034 = vmatmul.mubr.msk.f32.gmra.mrb[8].mxu0 %vm174_vm0, %v140_v16  ;;  %2164 = vmatprep.subr.bf16.mxu1 %v3014_v13  ;;  %v124_v47 = vld [vmem:[#allocation6 + $0x1b0] sm:$0xff]  ;;  %v131_v53 = vld [vmem:[#allocation6 + $0x1e8] sm:$0xff]  ;;  %v129_v57 = vld [vmem:[#allocation6 + $0x1d8] sm:$0xff]  ;;  %v3064_v60 = vadd.s32 4294967295, %v134_v49 }
  0x2c   :  { %2042 = vmatmul.mubr.msk.f32.gmra.mrb[8].mxu1 %vm174_vm0, %v140_v16  ;;  %2134 = vmatpush1.bf16.msra.mxu0 %v3021_v17  ;;  %v142_v54 = vld [vmem:[%s3512_s0 + $0x30] sm:$0xff]  ;;  %v133_v58 = vld [vmem:[#allocation6 + $0x1f8] sm:$0xff]  ;;  %v3068_v61 = vpack.c.bf16 %v124_v47, %v120_v46  ;;  %v126_v63 = vld [vmem:[#allocation6 + $0x1c0] sm:$0xff]  ;;  %v3072_v3 = vpack.c.bf16 %v131_v53, %v127_v52  ;;  %v154_v16 = vlaneseq }
  0x2d   :  { %2166 = vmatpush1.bf16.msra.mxu1 %v3025_v21  ;;  %293 = vmatprep.mubr.f32.mxu0 %v2856_v0  ;;  %v130_v2 = vld [vmem:[#allocation6 + $0x1e0] sm:$0xff]  ;;  %v128_v5 = vld [vmem:[#allocation6 + $0x1d0] sm:$0xff]  ;;  %v3076_v8 = vpack.c.bf16 %v133_v58, %v129_v57  ;;  %v143_v9 = vld [vmem:[%s3512_s0 + $0x38] sm:$0xff]  ;;  %vm2046_vm1 = vcmp.eq.s32.totalorder %v3064_v60, 0  ;;  %vm2047_vm2 = vcmp.eq.s32.totalorder %v3064_v60, 1  ;;  %vm2048_vm3 = vcmp.eq.s32.totalorder %v3064_v60, 2 }
  0x2e   :  { %406 = vmatprep.mubr.f32.mxu1 %v2856_v0  ;;  %2136 = vmatprep.subr.bf16.mxu0 %v3029_v27  ;;  %v132_v6 = vld [vmem:[#allocation6 + $0x1f0] sm:$0xff]  ;;  %v3083_v11 = vpack.c.bf16 %v130_v2, %v126_v63  ;;  %v634_v14 = vsel %vm2046_vm1, 1, %v2857_v1  ;;  %v814_v15 = vsel %vm2047_vm2, 1, %v2857_v1  ;;  %v155_v19 = vshrl.u32 %v154_v16, 7  ;;  %v152_v24 = vld [vmem:[%s3516_s4] sm:$0xf] }
  0x2f   :  { %2035 = vmatmul.mubr.msk.f32.gmra.mrb[10].mxu0 %vm174_vm0, %v141_v34  ;;  %2168 = vmatprep.subr.bf16.mxu1 %v3033_v31  ;;  %v3088_v12 = vpack.c.bf16 %v132_v6, %v128_v5  ;;  %vm2049_vm6 = vcmp.eq.s32.totalorder %v3064_v60, 3  ;;  %vm2050_vm8 = vcmp.eq.s32.totalorder %v3064_v60, 4  ;;  %vm2051_vm10 = vcmp.eq.s32.totalorder %v3064_v60, 5 }
  0x30   :  { %2043 = vmatmul.mubr.msk.f32.gmra.mrb[10].mxu1 %vm174_vm0, %v141_v34  ;;  %2138 = vmatpush1.bf16.msra.mxu0 %v3040_v37  ;;  %v156_v20 = vsub.s32 0, %v155_v19  ;;  %v160_v25 = vsub.s32 1, %v155_v19  ;;  %v164_v29 = vsub.s32 2, %v155_v19  ;;  %v168_v44 = vsub.s32 3, %v155_v19 }
  0x31   :  { %2170 = vmatpush1.bf16.msra.mxu1 %v3044_v41  ;;  %299 = vmatprep.mubr.f32.mxu0 %v2856_v0  ;;  %vm2052_vm12 = vcmp.eq.s32.totalorder %v3064_v60, 6  ;;  %vm2053_vm14 = vcmp.eq.s32.totalorder %v3064_v60, 7  ;;  %vm1999_vm2 = vcmask 64512  }
  0x32   :  { %412 = vmatprep.mubr.f32.mxu1 %v2856_v0  ;;  %2140 = vmatprep.subr.bf16.mxu0 %v3048_v45  ;;  %v3143_v28 = vrot.slane %v152_v24, %v156_v20  ;;  %v3145_v32 = vrot.slane %v152_v24, %v160_v25  ;;  %v3148_v38 = vrot.slane %v152_v24, %v164_v29 }
  0x33   :  { %2036 = vmatmul.mubr.msk.f32.gmra.mrb[12].mxu0 %vm174_vm0, %v142_v54  ;;  %2172 = vmatprep.subr.bf16.mxu1 %v3055_v50 }
  0x34   :  { %2044 = vmatmul.mubr.msk.f32.gmra.mrb[12].mxu1 %vm174_vm0, %v142_v54  ;;  %2142 = vmatpush1.bf16.msra.mxu0 %v3062_v56  ;;  %v3152_v54 = vrot.slane %v152_v24, %v168_v44 }
  0x35   :  { %2174 = vmatpush1.bf16.msra.mxu1 %v3068_v61  ;;  %305 = vmatprep.mubr.f32.mxu0 %v2856_v0 }
  0x36   :  { %418 = vmatprep.mubr.f32.mxu1 %v2856_v0  ;;  %2144 = vmatprep.subr.bf16.mxu0 %v3072_v3 }
  0x37   :  { %2037 = vmatmul.mubr.msk.f32.gmra.mrb[14].mxu0 %vm174_vm0, %v143_v9  ;;  %2176 = vmatprep.subr.bf16.mxu1 %v3076_v8 }
  0x38   :  { %2045 = vmatmul.mubr.msk.f32.gmra.mrb[14].mxu1 %vm174_vm0, %v143_v9  ;;  %2146 = vmatpush1.bf16.msra.mxu0 %v3083_v11  ;;  %vm2859_vm0 = vmmov 0  }
  0x39   :  { %2178 = vmatpush1.bf16.msra.mxu1 %v3088_v12  ;;  %532 = vmatprep.mubr.f32.mxu0 %v2856_v0 }
  0x3a   :  { %603 = vmatprep.mubr.f32.mxu1 %v2856_v0  ;;  %636 = vperm.xlu0 %2723, %v634_v14  }
  0x3b   :  { %533 = vmatmul.mubr.f32.vlgmr.msra.gmra.mrb[0].mxu0 %v2856_v0  ;;  %2180 = vmatprep.subr.bf16.mxu0 %v2944_v18 }
  0x3c   :  { %604 = vmatmul.mubr.f32.vlgmr.msra.gmra.mrb[0].mxu1 %v2856_v0  ;;  %2212 = vmatprep.subr.bf16.mxu1 %v2946_v22 }
  0x3d   :  { %2182 = vmatpush1.bf16.msra.mxu0 %v2948_v23  ;;  %2214 = vmatpush1.bf16.msra.mxu1 %v2951_v26 }
  0x3e   :  { %2184 = vmatprep.subr.bf16.mxu0 %v2955_v30  ;;  %2216 = vmatprep.subr.bf16.mxu1 %v2962_v35 }
  0x3f   :  { %711 = vmatprep.mubr.f32.mxu0 %v2856_v0  ;;  %782 = vmatprep.mubr.f32.mxu1 %v2856_v0 }
  0x40   :  { %816 = vperm.xlu0 %2723, %v814_v15  }
  0x41   :  { %2186 = vmatpush1.bf16.msra.mxu0 %v2964_v36  ;;  %2218 = vmatpush1.bf16.msra.mxu1 %v2968_v39 }
  0x42   :  { %2188 = vmatprep.subr.bf16.mxu0 %v2972_v43  ;;  %2220 = vmatprep.subr.bf16.mxu1 %v2979_v48 }
  0x45   :  { %2190 = vmatpush1.bf16.msra.mxu0 %v2983_v51  ;;  %2222 = vmatpush1.bf16.msra.mxu1 %v2987_v55 }
  0x46   :  { %2192 = vmatprep.subr.bf16.mxu0 %v2991_v59  ;;  %2224 = vmatprep.subr.bf16.mxu1 %v2995_v62 }
  0x49   :  { %2194 = vmatpush1.bf16.msra.mxu0 %v3002_v4  ;;  %2226 = vmatpush1.bf16.msra.mxu1 %v3006_v7 }
  0x4a   :  { %2196 = vmatprep.subr.bf16.mxu0 %v3010_v10  ;;  %2228 = vmatprep.subr.bf16.mxu1 %v3014_v13 }
  0x4d   :  { %2198 = vmatpush1.bf16.msra.mxu0 %v3021_v17  ;;  %2230 = vmatpush1.bf16.msra.mxu1 %v3025_v21 }
  0x4e   :  { %2200 = vmatprep.subr.bf16.mxu0 %v3029_v27  ;;  %2232 = vmatprep.subr.bf16.mxu1 %v3033_v31 }
  0x51   :  { %2202 = vmatpush1.bf16.msra.mxu0 %v3040_v37  ;;  %2234 = vmatpush1.bf16.msra.mxu1 %v3044_v41 }
  0x52   :  { %2204 = vmatprep.subr.bf16.mxu0 %v3048_v45  ;;  %2236 = vmatprep.subr.bf16.mxu1 %v3055_v50 }
  0x55   :  { %2206 = vmatpush1.bf16.msra.mxu0 %v3062_v56  ;;  %2238 = vmatpush1.bf16.msra.mxu1 %v3068_v61 }
  0x56   :  { %2208 = vmatprep.subr.bf16.mxu0 %v3072_v3  ;;  %2240 = vmatprep.subr.bf16.mxu1 %v3076_v8 }
  0x59   :  { %2210 = vmatpush1.bf16.msra.mxu0 %v3083_v11  ;;  %2242 = vmatpush1.bf16.msra.mxu1 %v3088_v12 }
  0x5a   :  { %2244 = vmatprep.subr.bf16.mxu0 %v2944_v18  ;;  %2276 = vmatprep.subr.bf16.mxu1 %v2946_v22 }
 0x10e   :  { %v534_v33 = vpop.f32.mrb[0].mxu0 }
 0x10f   :  { %v2651_v34 = vadd.f32 %v534_v33, %v3143_v28  ;;  %v605_v40 = vpop.f32.mrb[0].mxu1  ;;  %v536_v42 = vpop.f32.mrb[1].mxu0 }
 0x110   :  { %v2652_v46 = vadd.f32 %v536_v42, %v3145_v32  ;;  %v607_v47 = vpop.f32.mrb[1].mxu1  ;;  %v2667_v53 = vadd.f32 %v605_v40, %v3148_v38  ;;  %v994_v40 = vsel %vm2048_vm3, 1, %v2857_v1 }
 0x111   :  { %v614_v49 = vmul.f32 0.5, %v2651_v34  ;;  %v2668_v57 = vadd.f32 %v607_v47, %v3152_v54  ;;  %996 = vperm.xlu1 %2724, %v994_v40   ;;  %v637_v40 = vpop.permute.xlu0 %636 }
 0x112   :  { %v618_v52 = vmul.f32 0.5, %v2652_v46  ;;  %vm638_vm4 = vcmp.eq.s32.totalorder %v637_v40, 1 }
 0x113   :  { %2725 = vtanh.f32 %v614_v49  ;;  %v623_v58 = vmul.f32 0.5, %v2668_v57 }
 0x114   :  { %2727 = vtanh.f32 %v618_v52 }
 0x115   :  { %2729 = vtanh.f32 %v2667_v53 }
 0x116   :  { %2731 = vtanh.f32 %v623_v58 }
 0x11d   :  { %v2726_v63 = vpop.eup %2725 }
 0x11e   :  { %v2728_v2 = vpop.eup %2727  ;;  %v616_v5 = vadd.f32 1.0, %v2726_v63 }
 0x11f   :  { %v620_v6 = vadd.f32 1.0, %v2728_v2  ;;  %v2730_v14 = vpop.eup %2729 }
 0x120   :  { %v617_v9 = vmul.f32 0.5, %v616_v5  ;;  %v2732_v24 = vpop.eup %2731 }
 0x121   :  { %v621_v15 = vmul.f32 0.5, %v620_v6  ;;  %v625_v25 = vadd.f32 1.0, %v2732_v24 }
 0x122   :  { %v628_v16 = vmul.f32 %v2730_v14, %v617_v9 }
 0x123   :  { %v627_v19 = vmul.f32 0.0, %v621_v15  ;;  %v626_v29 = vmul.f32 0.5, %v625_v25 }
 0x125   :  { %v3155_v20 = vadd.f32 %v628_v16, %v627_v19 }
 0x127   :  { %2733 = vtanh.f32 %v3155_v20 }
 0x131   :  { %v2734_v33 = vpop.eup %2733 }
 0x132   :  { %v3158_v34 = vmul.f32 %v2734_v33, %v626_v29 }
 0x134   :  { %712 = vmatmul.mubr.f32.vlgmr.msra.gmra.mrb[2].mxu0 %v3158_v34  ;;  %783 = vmatmul.mubr.f32.vlgmr.msra.gmra.mrb[2].mxu1 %v3158_v34 }
 0x135   :  { %2246 = vmatpush1.bf16.msra.mxu0 %v2948_v23  ;;  %2278 = vmatpush1.bf16.msra.mxu1 %v2951_v26 }
 0x136   :  { %2248 = vmatprep.subr.bf16.mxu0 %v2955_v30  ;;  %2280 = vmatprep.subr.bf16.mxu1 %v2962_v35 }
 0x137   :  { %891 = vmatprep.mubr.f32.mxu0 %v2856_v0  ;;  %962 = vmatprep.mubr.f32.mxu1 %v2856_v0 }
 0x139   :  { %2250 = vmatpush1.bf16.msra.mxu0 %v2964_v36  ;;  %2282 = vmatpush1.bf16.msra.mxu1 %v2968_v39 }
 0x13a   :  { %2252 = vmatprep.subr.bf16.mxu0 %v2972_v43  ;;  %2284 = vmatprep.subr.bf16.mxu1 %v2979_v48 }
 0x13d   :  { %2254 = vmatpush1.bf16.msra.mxu0 %v2983_v51  ;;  %2286 = vmatpush1.bf16.msra.mxu1 %v2987_v55 }
 0x13e   :  { %2256 = vmatprep.subr.bf16.mxu0 %v2991_v59  ;;  %2288 = vmatprep.subr.bf16.mxu1 %v2995_v62 }
 0x141   :  { %2258 = vmatpush1.bf16.msra.mxu0 %v3002_v4  ;;  %2290 = vmatpush1.bf16.msra.mxu1 %v3006_v7 }
 0x142   :  { %2260 = vmatprep.subr.bf16.mxu0 %v3010_v10  ;;  %2292 = vmatprep.subr.bf16.mxu1 %v3014_v13 }
 0x145   :  { %2262 = vmatpush1.bf16.msra.mxu0 %v3021_v17  ;;  %2294 = vmatpush1.bf16.msra.mxu1 %v3025_v21 }
 0x146   :  { %2264 = vmatprep.subr.bf16.mxu0 %v3029_v27  ;;  %2296 = vmatprep.subr.bf16.mxu1 %v3033_v31 }
 0x149   :  { %2266 = vmatpush1.bf16.msra.mxu0 %v3040_v37  ;;  %2298 = vmatpush1.bf16.msra.mxu1 %v3044_v41 }
 0x14a   :  { %2268 = vmatprep.subr.bf16.mxu0 %v3048_v45  ;;  %2300 = vmatprep.subr.bf16.mxu1 %v3055_v50 }
 0x14d   :  { %2270 = vmatpush1.bf16.msra.mxu0 %v3062_v56  ;;  %2302 = vmatpush1.bf16.msra.mxu1 %v3068_v61 }
 0x14e   :  { %2272 = vmatprep.subr.bf16.mxu0 %v3072_v3  ;;  %2304 = vmatprep.subr.bf16.mxu1 %v3076_v8 }
 0x151   :  { %2274 = vmatpush1.bf16.msra.mxu0 %v3083_v11  ;;  %2306 = vmatpush1.bf16.msra.mxu1 %v3088_v12 }
 0x152   :  { %2308 = vmatprep.subr.bf16.mxu0 %v2944_v18  ;;  %2340 = vmatprep.subr.bf16.mxu1 %v2946_v22 }
 0x207   :  { %v713_v42 = vpop.f32.mrb[2].mxu0  ;;  %v784_v44 = vpop.f32.mrb[2].mxu1 }
 0x208   :  { %v2653_v46 = vadd.f32 %v713_v42, %v3143_v28  ;;  %v715_v47 = vpop.f32.mrb[3].mxu0  ;;  %v786_v49 = vpop.f32.mrb[3].mxu1  ;;  %v2669_v58 = vadd.f32 %v784_v44, %v3148_v38 }
 0x209   :  { %v2654_v52 = vadd.f32 %v715_v47, %v3145_v32  ;;  %v2670_v63 = vadd.f32 %v786_v49, %v3152_v54  ;;  %v817_v44 = vpop.permute.xlu0 %816 }
 0x20a   :  { %v793_v53 = vmul.f32 0.5, %v2653_v46  ;;  %vm818_vm5 = vcmp.eq.s32.totalorder %v817_v44, 1 }
 0x20b   :  { %v797_v57 = vmul.f32 0.5, %v2654_v52  ;;  %v802_v2 = vmul.f32 0.5, %v2670_v63  ;;  %v639_v52 = vsel %vm638_vm4, %v3158_v34, 0.0 }
 0x20c   :  { %2735 = vtanh.f32 %v793_v53 }
 0x20d   :  { %2737 = vtanh.f32 %v797_v57 }
 0x20e   :  { %2739 = vtanh.f32 %v2669_v58 }
 0x20f   :  { %2741 = vtanh.f32 %v802_v2 }
 0x216   :  { %v2736_v5 = vpop.eup %2735 }
 0x217   :  { %v2738_v6 = vpop.eup %2737  ;;  %v795_v9 = vadd.f32 1.0, %v2736_v5 }
 0x218   :  { %v799_v14 = vadd.f32 1.0, %v2738_v6  ;;  %v2740_v16 = vpop.eup %2739 }
 0x219   :  { %v796_v15 = vmul.f32 0.5, %v795_v9  ;;  %v2742_v33 = vpop.eup %2741 }
 0x21a   :  { %v800_v19 = vmul.f32 0.5, %v799_v14  ;;  %v804_v42 = vadd.f32 1.0, %v2742_v33 }
 0x21b   :  { %v807_v24 = vmul.f32 %v2740_v16, %v796_v15 }
 0x21c   :  { %v806_v25 = vmul.f32 %v800_v19, %v3155_v20  ;;  %v805_v46 = vmul.f32 0.5, %v804_v42  ;;  %v1174_v20 = vsel %vm2049_vm6, 1, %v2857_v1 }
 0x21d   :  { %1176 = vperm.xlu1 %2724, %v1174_v20  }
 0x21e   :  { %v3203_v29 = vadd.f32 %v807_v24, %v806_v25 }
 0x220   :  { %2743 = vtanh.f32 %v3203_v29 }
 0x22a   :  { %v2744_v47 = vpop.eup %2743 }
 0x22b   :  { %v810_v49 = vmul.f32 %v2744_v47, %v805_v46 }
 0x22d   :  { %v3207_v53 = vsel %vm818_vm5, %v810_v49, %v639_v52  ;;  %892 = vmatmul.mubr.f32.vlgmr.msra.gmra.mrb[4].mxu0 %v810_v49  ;;  %963 = vmatmul.mubr.f32.vlgmr.msra.gmra.mrb[4].mxu1 %v810_v49 }
 0x22e   :  { %2310 = vmatpush1.bf16.msra.mxu0 %v2948_v23  ;;  %2342 = vmatpush1.bf16.msra.mxu1 %v2951_v26 }
 0x22f   :  { %2312 = vmatprep.subr.bf16.mxu0 %v2955_v30  ;;  %2344 = vmatprep.subr.bf16.mxu1 %v2962_v35 }
 0x230   :  { %1071 = vmatprep.mubr.f32.mxu0 %v2856_v0  ;;  %1142 = vmatprep.mubr.f32.mxu1 %v2856_v0 }
 0x232   :  { %2314 = vmatpush1.bf16.msra.mxu0 %v2964_v36  ;;  %2346 = vmatpush1.bf16.msra.mxu1 %v2968_v39 }
 0x233   :  { %2316 = vmatprep.subr.bf16.mxu0 %v2972_v43  ;;  %2348 = vmatprep.subr.bf16.mxu1 %v2979_v48 }
 0x236   :  { %2318 = vmatpush1.bf16.msra.mxu0 %v2983_v51  ;;  %2350 = vmatpush1.bf16.msra.mxu1 %v2987_v55 }
 0x237   :  { %2320 = vmatprep.subr.bf16.mxu0 %v2991_v59  ;;  %2352 = vmatprep.subr.bf16.mxu1 %v2995_v62 }
 0x23a   :  { %2322 = vmatpush1.bf16.msra.mxu0 %v3002_v4  ;;  %2354 = vmatpush1.bf16.msra.mxu1 %v3006_v7 }
 0x23b   :  { %2324 = vmatprep.subr.bf16.mxu0 %v3010_v10  ;;  %2356 = vmatprep.subr.bf16.mxu1 %v3014_v13 }
 0x23e   :  { %2326 = vmatpush1.bf16.msra.mxu0 %v3021_v17  ;;  %2358 = vmatpush1.bf16.msra.mxu1 %v3025_v21 }
 0x23f   :  { %2328 = vmatprep.subr.bf16.mxu0 %v3029_v27  ;;  %2360 = vmatprep.subr.bf16.mxu1 %v3033_v31 }
 0x242   :  { %2330 = vmatpush1.bf16.msra.mxu0 %v3040_v37  ;;  %2362 = vmatpush1.bf16.msra.mxu1 %v3044_v41 }
 0x243   :  { %2332 = vmatprep.subr.bf16.mxu0 %v3048_v45  ;;  %2364 = vmatprep.subr.bf16.mxu1 %v3055_v50 }
 0x246   :  { %2334 = vmatpush1.bf16.msra.mxu0 %v3062_v56  ;;  %2366 = vmatpush1.bf16.msra.mxu1 %v3068_v61 }
 0x247   :  { %2336 = vmatprep.subr.bf16.mxu0 %v3072_v3  ;;  %2368 = vmatprep.subr.bf16.mxu1 %v3076_v8 }
 0x24a   :  { %2338 = vmatpush1.bf16.msra.mxu0 %v3083_v11  ;;  %2370 = vmatpush1.bf16.msra.mxu1 %v3088_v12 }
 0x24b   :  { %2372 = vmatprep.subr.bf16.mxu0 %v2944_v18  ;;  %2404 = vmatprep.subr.bf16.mxu1 %v2946_v22 }
 0x300   :  { %v893_v34 = vpop.f32.mrb[4].mxu0  ;;  %v964_v57 = vpop.f32.mrb[4].mxu1 }
 0x301   :  { %v2655_v58 = vadd.f32 %v893_v34, %v3143_v28  ;;  %v895_v63 = vpop.f32.mrb[5].mxu0  ;;  %v966_v2 = vpop.f32.mrb[5].mxu1  ;;  %v2671_v14 = vadd.f32 %v964_v57, %v3148_v38 }
 0x302   :  { %v2656_v5 = vadd.f32 %v895_v63, %v3145_v32  ;;  %v2672_v15 = vadd.f32 %v966_v2, %v3152_v54  ;;  %v997_v34 = vpop.permute.xlu1 %996 }
 0x303   :  { %v973_v6 = vmul.f32 0.5, %v2655_v58  ;;  %vm998_vm7 = vcmp.eq.s32.totalorder %v997_v34, 1 }
 0x304   :  { %v977_v9 = vmul.f32 0.5, %v2656_v5  ;;  %v982_v16 = vmul.f32 0.5, %v2672_v15 }
 0x305   :  { %2745 = vtanh.f32 %v973_v6 }
 0x306   :  { %2747 = vtanh.f32 %v977_v9 }
 0x307   :  { %2749 = vtanh.f32 %v2671_v14 }
 0x308   :  { %2751 = vtanh.f32 %v982_v16 }
 0x30f   :  { %v2746_v19 = vpop.eup %2745 }
 0x310   :  { %v2748_v24 = vpop.eup %2747  ;;  %v975_v25 = vadd.f32 1.0, %v2746_v19 }
 0x311   :  { %v979_v33 = vadd.f32 1.0, %v2748_v24  ;;  %v2750_v42 = vpop.eup %2749 }
 0x312   :  { %v976_v40 = vmul.f32 0.5, %v975_v25  ;;  %v2752_v52 = vpop.eup %2751 }
 0x313   :  { %v980_v44 = vmul.f32 0.5, %v979_v33  ;;  %v984_v20 = vadd.f32 1.0, %v2752_v52 }
 0x314   :  { %v987_v46 = vmul.f32 %v2750_v42, %v976_v40 }
 0x315   :  { %v986_v47 = vmul.f32 %v980_v44, %v3203_v29  ;;  %v985_v57 = vmul.f32 0.5, %v984_v20  ;;  %v1354_v29 = vsel %vm2050_vm8, 1, %v2857_v1 }
 0x316   :  { %1356 = vperm.xlu0 %2723, %v1354_v29  }
 0x317   :  { %v3250_v49 = vadd.f32 %v987_v46, %v986_v47 }
 0x319   :  { %2753 = vtanh.f32 %v3250_v49 }
 0x323   :  { %v2754_v58 = vpop.eup %2753 }
 0x324   :  { %v990_v63 = vmul.f32 %v2754_v58, %v985_v57 }
 0x326   :  { %v3254_v2 = vsel %vm998_vm7, %v990_v63, %v3207_v53  ;;  %1072 = vmatmul.mubr.f32.vlgmr.msra.gmra.mrb[6].mxu0 %v990_v63  ;;  %1143 = vmatmul.mubr.f32.vlgmr.msra.gmra.mrb[6].mxu1 %v990_v63 }
 0x327   :  { %2374 = vmatpush1.bf16.msra.mxu0 %v2948_v23  ;;  %2406 = vmatpush1.bf16.msra.mxu1 %v2951_v26 }
 0x328   :  { %2376 = vmatprep.subr.bf16.mxu0 %v2955_v30  ;;  %2408 = vmatprep.subr.bf16.mxu1 %v2962_v35 }
 0x329   :  { %1251 = vmatprep.mubr.f32.mxu0 %v2856_v0  ;;  %1322 = vmatprep.mubr.f32.mxu1 %v2856_v0 }
 0x32b   :  { %2378 = vmatpush1.bf16.msra.mxu0 %v2964_v36  ;;  %2410 = vmatpush1.bf16.msra.mxu1 %v2968_v39 }
 0x32c   :  { %2380 = vmatprep.subr.bf16.mxu0 %v2972_v43  ;;  %2412 = vmatprep.subr.bf16.mxu1 %v2979_v48 }
 0x32f   :  { %2382 = vmatpush1.bf16.msra.mxu0 %v2983_v51  ;;  %2414 = vmatpush1.bf16.msra.mxu1 %v2987_v55 }
 0x330   :  { %2384 = vmatprep.subr.bf16.mxu0 %v2991_v59  ;;  %2416 = vmatprep.subr.bf16.mxu1 %v2995_v62 }
 0x333   :  { %2386 = vmatpush1.bf16.msra.mxu0 %v3002_v4  ;;  %2418 = vmatpush1.bf16.msra.mxu1 %v3006_v7 }
 0x334   :  { %2388 = vmatprep.subr.bf16.mxu0 %v3010_v10  ;;  %2420 = vmatprep.subr.bf16.mxu1 %v3014_v13 }
 0x337   :  { %2390 = vmatpush1.bf16.msra.mxu0 %v3021_v17  ;;  %2422 = vmatpush1.bf16.msra.mxu1 %v3025_v21 }
 0x338   :  { %2392 = vmatprep.subr.bf16.mxu0 %v3029_v27  ;;  %2424 = vmatprep.subr.bf16.mxu1 %v3033_v31 }
 0x33b   :  { %2394 = vmatpush1.bf16.msra.mxu0 %v3040_v37  ;;  %2426 = vmatpush1.bf16.msra.mxu1 %v3044_v41 }
 0x33c   :  { %2396 = vmatprep.subr.bf16.mxu0 %v3048_v45  ;;  %2428 = vmatprep.subr.bf16.mxu1 %v3055_v50 }
 0x33f   :  { %2398 = vmatpush1.bf16.msra.mxu0 %v3062_v56  ;;  %2430 = vmatpush1.bf16.msra.mxu1 %v3068_v61 }
 0x340   :  { %2400 = vmatprep.subr.bf16.mxu0 %v3072_v3  ;;  %2432 = vmatprep.subr.bf16.mxu1 %v3076_v8 }
 0x343   :  { %2402 = vmatpush1.bf16.msra.mxu0 %v3083_v11  ;;  %2434 = vmatpush1.bf16.msra.mxu1 %v3088_v12 }
 0x344   :  { %2436 = vmatprep.subr.bf16.mxu0 %v2944_v18  ;;  %2468 = vmatprep.subr.bf16.mxu1 %v2946_v22 }
 0x3f9   :  { %v1073_v53 = vpop.f32.mrb[6].mxu0  ;;  %v1144_v5 = vpop.f32.mrb[6].mxu1 }
 0x3fa   :  { %v2657_v6 = vadd.f32 %v1073_v53, %v3143_v28  ;;  %v1075_v9 = vpop.f32.mrb[7].mxu0  ;;  %v1146_v14 = vpop.f32.mrb[7].mxu1  ;;  %v2673_v24 = vadd.f32 %v1144_v5, %v3148_v38 }
 0x3fb   :  { %v2658_v15 = vadd.f32 %v1075_v9, %v3145_v32  ;;  %v2674_v25 = vadd.f32 %v1146_v14, %v3152_v54  ;;  %v1177_v53 = vpop.permute.xlu1 %1176 }
 0x3fc   :  { %v1153_v16 = vmul.f32 0.5, %v2657_v6  ;;  %vm1178_vm9 = vcmp.eq.s32.totalorder %v1177_v53, 1 }
 0x3fd   :  { %v1157_v19 = vmul.f32 0.5, %v2658_v15  ;;  %v1162_v33 = vmul.f32 0.5, %v2674_v25 }
 0x3fe   :  { %2755 = vtanh.f32 %v1153_v16 }
 0x3ff   :  { %2757 = vtanh.f32 %v1157_v19 }
 0x400   :  { %2759 = vtanh.f32 %v2673_v24 }
 0x401   :  { %2761 = vtanh.f32 %v1162_v33 }
 0x408   :  { %v2756_v40 = vpop.eup %2755 }
 0x409   :  { %v2758_v42 = vpop.eup %2757  ;;  %v1155_v44 = vadd.f32 1.0, %v2756_v40 }
 0x40a   :  { %v1159_v46 = vadd.f32 1.0, %v2758_v42  ;;  %v2760_v52 = vpop.eup %2759 }
 0x40b   :  { %v1156_v47 = vmul.f32 0.5, %v1155_v44  ;;  %v2762_v63 = vpop.eup %2761 }
 0x40c   :  { %v1160_v20 = vmul.f32 0.5, %v1159_v46  ;;  %v1164_v29 = vadd.f32 1.0, %v2762_v63 }
 0x40d   :  { %v1167_v34 = vmul.f32 %v2760_v52, %v1156_v47 }
 0x40e   :  { %v1166_v57 = vmul.f32 %v1160_v20, %v3250_v49  ;;  %v1165_v5 = vmul.f32 0.5, %v1164_v29  ;;  %v1534_v49 = vsel %vm2051_vm10, 1, %v2857_v1 }
 0x40f   :  { %1536 = vperm.xlu1 %2724, %v1534_v49  }
 0x410   :  { %v3297_v58 = vadd.f32 %v1167_v34, %v1166_v57 }
 0x412   :  { %2763 = vtanh.f32 %v3297_v58 }
 0x41c   :  { %v2764_v6 = vpop.eup %2763 }
 0x41d   :  { %v1170_v9 = vmul.f32 %v2764_v6, %v1165_v5 }
 0x41f   :  { %v3301_v14 = vsel %vm1178_vm9, %v1170_v9, %v3254_v2  ;;  %1252 = vmatmul.mubr.f32.vlgmr.msra.gmra.mrb[8].mxu0 %v1170_v9  ;;  %1323 = vmatmul.mubr.f32.vlgmr.msra.gmra.mrb[8].mxu1 %v1170_v9 }
 0x420   :  { %2438 = vmatpush1.bf16.msra.mxu0 %v2948_v23  ;;  %2470 = vmatpush1.bf16.msra.mxu1 %v2951_v26 }
 0x421   :  { %2440 = vmatprep.subr.bf16.mxu0 %v2955_v30  ;;  %2472 = vmatprep.subr.bf16.mxu1 %v2962_v35 }
 0x422   :  { %1431 = vmatprep.mubr.f32.mxu0 %v2856_v0  ;;  %1502 = vmatprep.mubr.f32.mxu1 %v2856_v0 }
 0x424   :  { %2442 = vmatpush1.bf16.msra.mxu0 %v2964_v36  ;;  %2474 = vmatpush1.bf16.msra.mxu1 %v2968_v39 }
 0x425   :  { %2444 = vmatprep.subr.bf16.mxu0 %v2972_v43  ;;  %2476 = vmatprep.subr.bf16.mxu1 %v2979_v48 }
 0x428   :  { %2446 = vmatpush1.bf16.msra.mxu0 %v2983_v51  ;;  %2478 = vmatpush1.bf16.msra.mxu1 %v2987_v55 }
 0x429   :  { %2448 = vmatprep.subr.bf16.mxu0 %v2991_v59  ;;  %2480 = vmatprep.subr.bf16.mxu1 %v2995_v62 }
 0x42c   :  { %2450 = vmatpush1.bf16.msra.mxu0 %v3002_v4  ;;  %2482 = vmatpush1.bf16.msra.mxu1 %v3006_v7 }
 0x42d   :  { %2452 = vmatprep.subr.bf16.mxu0 %v3010_v10  ;;  %2484 = vmatprep.subr.bf16.mxu1 %v3014_v13 }
 0x430   :  { %2454 = vmatpush1.bf16.msra.mxu0 %v3021_v17  ;;  %2486 = vmatpush1.bf16.msra.mxu1 %v3025_v21 }
 0x431   :  { %2456 = vmatprep.subr.bf16.mxu0 %v3029_v27  ;;  %2488 = vmatprep.subr.bf16.mxu1 %v3033_v31 }
 0x434   :  { %2458 = vmatpush1.bf16.msra.mxu0 %v3040_v37  ;;  %2490 = vmatpush1.bf16.msra.mxu1 %v3044_v41 }
 0x435   :  { %2460 = vmatprep.subr.bf16.mxu0 %v3048_v45  ;;  %2492 = vmatprep.subr.bf16.mxu1 %v3055_v50 }
 0x438   :  { %2462 = vmatpush1.bf16.msra.mxu0 %v3062_v56  ;;  %2494 = vmatpush1.bf16.msra.mxu1 %v3068_v61 }
 0x439   :  { %2464 = vmatprep.subr.bf16.mxu0 %v3072_v3  ;;  %2496 = vmatprep.subr.bf16.mxu1 %v3076_v8 }
 0x43c   :  { %2466 = vmatpush1.bf16.msra.mxu0 %v3083_v11  ;;  %2498 = vmatpush1.bf16.msra.mxu1 %v3088_v12 }
 0x43d   :  { %2500 = vmatprep.subr.bf16.mxu0 %v2944_v18  ;;  %2532 = vmatprep.subr.bf16.mxu1 %v2946_v22 }
 0x4f2   :  { %v1253_v2 = vpop.f32.mrb[8].mxu0  ;;  %v1324_v15 = vpop.f32.mrb[8].mxu1 }
 0x4f3   :  { %v2659_v16 = vadd.f32 %v1253_v2, %v3143_v28  ;;  %v1255_v19 = vpop.f32.mrb[9].mxu0  ;;  %v1326_v24 = vpop.f32.mrb[9].mxu1  ;;  %v2675_v42 = vadd.f32 %v1324_v15, %v3148_v38 }
 0x4f4   :  { %v2660_v25 = vadd.f32 %v1255_v19, %v3145_v32  ;;  %v2676_v44 = vadd.f32 %v1326_v24, %v3152_v54  ;;  %v1357_v2 = vpop.permute.xlu0 %1356 }
 0x4f5   :  { %v1333_v33 = vmul.f32 0.5, %v2659_v16  ;;  %vm1358_vm11 = vcmp.eq.s32.totalorder %v1357_v2, 1 }
 0x4f6   :  { %v1337_v40 = vmul.f32 0.5, %v2660_v25  ;;  %v1342_v46 = vmul.f32 0.5, %v2676_v44 }
 0x4f7   :  { %2765 = vtanh.f32 %v1333_v33 }
 0x4f8   :  { %2767 = vtanh.f32 %v1337_v40 }
 0x4f9   :  { %2769 = vtanh.f32 %v2675_v42 }
 0x4fa   :  { %2771 = vtanh.f32 %v1342_v46 }
 0x501   :  { %v2766_v47 = vpop.eup %2765 }
 0x502   :  { %v2768_v52 = vpop.eup %2767  ;;  %v1335_v20 = vadd.f32 1.0, %v2766_v47 }
 0x503   :  { %v1339_v34 = vadd.f32 1.0, %v2768_v52  ;;  %v2770_v63 = vpop.eup %2769 }
 0x504   :  { %v1336_v57 = vmul.f32 0.5, %v1335_v20  ;;  %v2772_v9 = vpop.eup %2771 }
 0x505   :  { %v1340_v29 = vmul.f32 0.5, %v1339_v34  ;;  %v1344_v49 = vadd.f32 1.0, %v2772_v9 }
 0x506   :  { %v1347_v53 = vmul.f32 %v2770_v63, %v1336_v57 }
 0x507   :  { %v1346_v5 = vmul.f32 %v1340_v29, %v3297_v58  ;;  %v1345_v15 = vmul.f32 0.5, %v1344_v49  ;;  %v1714_v58 = vsel %vm2052_vm12, 1, %v2857_v1 }
 0x508   :  { %1716 = vperm.xlu0 %2723, %v1714_v58  }
 0x509   :  { %v3344_v6 = vadd.f32 %v1347_v53, %v1346_v5 }
 0x50b   :  { %2773 = vtanh.f32 %v3344_v6 }
 0x515   :  { %v2774_v16 = vpop.eup %2773 }
 0x516   :  { %v1350_v19 = vmul.f32 %v2774_v16, %v1345_v15 }
 0x518   :  { %v3348_v24 = vsel %vm1358_vm11, %v1350_v19, %v3301_v14  ;;  %1432 = vmatmul.mubr.f32.vlgmr.msra.gmra.mrb[10].mxu0 %v1350_v19  ;;  %1503 = vmatmul.mubr.f32.vlgmr.msra.gmra.mrb[10].mxu1 %v1350_v19  ;;  %v1537_v19 = vpop.permute.xlu1 %1536 }
 0x519   :  { %2502 = vmatpush1.bf16.msra.mxu0 %v2948_v23  ;;  %2534 = vmatpush1.bf16.msra.mxu1 %v2951_v26  ;;  %vm1538_vm13 = vcmp.eq.s32.totalorder %v1537_v19, 1 }
 0x51a   :  { %2504 = vmatprep.subr.bf16.mxu0 %v2955_v30  ;;  %2536 = vmatprep.subr.bf16.mxu1 %v2962_v35 }
 0x51b   :  { %1611 = vmatprep.mubr.f32.mxu0 %v2856_v0  ;;  %1682 = vmatprep.mubr.f32.mxu1 %v2856_v0 }
 0x51d   :  { %2506 = vmatpush1.bf16.msra.mxu0 %v2964_v36  ;;  %2538 = vmatpush1.bf16.msra.mxu1 %v2968_v39 }
 0x51e   :  { %2508 = vmatprep.subr.bf16.mxu0 %v2972_v43  ;;  %2540 = vmatprep.subr.bf16.mxu1 %v2979_v48 }
 0x521   :  { %2510 = vmatpush1.bf16.msra.mxu0 %v2983_v51  ;;  %2542 = vmatpush1.bf16.msra.mxu1 %v2987_v55 }
 0x522   :  { %2512 = vmatprep.subr.bf16.mxu0 %v2991_v59  ;;  %2544 = vmatprep.subr.bf16.mxu1 %v2995_v62 }
 0x525   :  { %2514 = vmatpush1.bf16.msra.mxu0 %v3002_v4  ;;  %2546 = vmatpush1.bf16.msra.mxu1 %v3006_v7 }
 0x526   :  { %2516 = vmatprep.subr.bf16.mxu0 %v3010_v10  ;;  %2548 = vmatprep.subr.bf16.mxu1 %v3014_v13 }
 0x529   :  { %2518 = vmatpush1.bf16.msra.mxu0 %v3021_v17  ;;  %2550 = vmatpush1.bf16.msra.mxu1 %v3025_v21 }
 0x52a   :  { %2520 = vmatprep.subr.bf16.mxu0 %v3029_v27  ;;  %2552 = vmatprep.subr.bf16.mxu1 %v3033_v31 }
 0x52d   :  { %2522 = vmatpush1.bf16.msra.mxu0 %v3040_v37  ;;  %2554 = vmatpush1.bf16.msra.mxu1 %v3044_v41 }
 0x52e   :  { %2524 = vmatprep.subr.bf16.mxu0 %v3048_v45  ;;  %2556 = vmatprep.subr.bf16.mxu1 %v3055_v50 }
 0x531   :  { %2526 = vmatpush1.bf16.msra.mxu0 %v3062_v56  ;;  %2558 = vmatpush1.bf16.msra.mxu1 %v3068_v61 }
 0x532   :  { %2528 = vmatprep.subr.bf16.mxu0 %v3072_v3  ;;  %2560 = vmatprep.subr.bf16.mxu1 %v3076_v8 }
 0x535   :  { %2530 = vmatpush1.bf16.msra.mxu0 %v3083_v11  ;;  %2562 = vmatpush1.bf16.msra.mxu1 %v3088_v12 }
 0x536   :  { %2564 = vmatprep.subr.bf16.mxu0 %v2944_v18  ;;  %2596 = vmatprep.subr.bf16.mxu1 %v2946_v22 }
 0x5eb   :  { %v1433_v14 = vpop.f32.mrb[10].mxu0  ;;  %v1504_v25 = vpop.f32.mrb[10].mxu1 }
 0x5ec   :  { %v2661_v33 = vadd.f32 %v1433_v14, %v3143_v28  ;;  %v1435_v40 = vpop.f32.mrb[11].mxu0  ;;  %v1506_v42 = vpop.f32.mrb[11].mxu1  ;;  %v2677_v18 = vadd.f32 %v1504_v25, %v3148_v38 }
 0x5ed   :  { %v2662_v44 = vadd.f32 %v1435_v40, %v3145_v32  ;;  %v2678_v22 = vadd.f32 %v1506_v42, %v3152_v54  ;;  %v1909_v40 = vld [vmem:[%s3517_s5 + $0x18] sm:$0xff] }
 0x5ee   :  { %v1513_v46 = vmul.f32 0.5, %v2661_v33 }
 0x5ef   :  { %v1517_v47 = vmul.f32 0.5, %v2662_v44  ;;  %v1522_v52 = vmul.f32 0.5, %v2678_v22  ;;  %v1910_v44 = vld [vmem:[%s3517_s5 + $0x20] sm:$0xff]  ;;  %v1913_v22 = vld [vmem:[%s3517_s5 + $0x38] sm:$0xff] }
 0x5f0   :  { %2775 = vtanh.f32 %v1513_v46  ;;  %v1911_v46 = vld [vmem:[%s3517_s5 + $0x28] sm:$0xff] }
 0x5f1   :  { %2777 = vtanh.f32 %v1517_v47  ;;  %v2634_v47 = vpack.c.bf16 %v1911_v46, %v1910_v44 }
 0x5f2   :  { %2779 = vtanh.f32 %v2677_v18  ;;  %v1912_v18 = vld [vmem:[%s3517_s5 + $0x30] sm:$0xff] }
 0x5f3   :  { %2781 = vtanh.f32 %v1522_v52  ;;  %v2637_v52 = vpack.c.bf16 %v1913_v22, %v1912_v18 }
 0x5fa   :  { %v2776_v20 = vpop.eup %2775 }
 0x5fb   :  { %v2778_v34 = vpop.eup %2777  ;;  %v1515_v57 = vadd.f32 1.0, %v2776_v20  ;;  %v1914_v20 = vld [vmem:[%s3517_s5 + $0x40] sm:$0xff] }
 0x5fc   :  { %v1519_v63 = vadd.f32 1.0, %v2778_v34  ;;  %v2780_v53 = vpop.eup %2779  ;;  %v1915_v34 = vld [vmem:[%s3517_s5 + $0x48] sm:$0xff] }
 0x5fd   :  { %v1516_v29 = vmul.f32 0.5, %v1515_v57  ;;  %v2782_v15 = vpop.eup %2781  ;;  %v2640_v57 = vpack.c.bf16 %v1915_v34, %v1914_v20 }
 0x5fe   :  { %v1520_v5 = vmul.f32 0.5, %v1519_v63  ;;  %v1524_v16 = vadd.f32 1.0, %v2782_v15  ;;  %v1916_v63 = vld [vmem:[%s3517_s5 + $0x50] sm:$0xff]  ;;  %v1921_v15 = vld [vmem:[%s3517_s5 + $0x78] sm:$0xff] }
 0x5ff   :  { %v1527_v9 = vmul.f32 %v2780_v53, %v1516_v29  ;;  %v1917_v29 = vld [vmem:[%s3517_s5 + $0x58] sm:$0xff] }
 0x600   :  { %v1526_v49 = vmul.f32 %v1520_v5, %v3344_v6  ;;  %v1525_v58 = vmul.f32 0.5, %v1524_v16  ;;  %v2858_v6 = vmov 0.0|0.0   ;;  %v2643_v53 = vpack.c.bf16 %v1917_v29, %v1916_v63  ;;  %v1918_v5 = vld [vmem:[%s3517_s5 + $0x60] sm:$0xff] }
 0x602   :  { %v3391_v2 = vadd.f32 %v1527_v9, %v1526_v49  ;;  %v1919_v9 = vld [vmem:[%s3517_s5 + $0x68] sm:$0xff] }
 0x603   :  { %v2646_v49 = vpack.c.bf16 %v1919_v9, %v1918_v5 }
 0x604   :  { %2783 = vtanh.f32 %v3391_v2 }
 0x60e   :  { %v2784_v14 = vpop.eup %2783 }
 0x60f   :  { %v1530_v25 = vmul.f32 %v2784_v14, %v1525_v58 }
 0x611   :  { %v3395_v33 = vsel %vm1538_vm13, %v1530_v25, %v3348_v24  ;;  %1612 = vmatmul.mubr.f32.vlgmr.msra.gmra.mrb[12].mxu0 %v1530_v25  ;;  %1683 = vmatmul.mubr.f32.vlgmr.msra.gmra.mrb[12].mxu1 %v1530_v25  ;;  %v1908_v24 = vld [vmem:[%s3517_s5 + $0x10] sm:$0xff] }
 0x612   :  { %2566 = vmatpush1.bf16.msra.mxu0 %v2948_v23  ;;  %2598 = vmatpush1.bf16.msra.mxu1 %v2951_v26  ;;  %v1894_v23 = vsel %vm2053_vm14, 1, %v2857_v1  ;;  %v2631_v42 = vpack.c.bf16 %v1909_v40, %v1908_v24 }
 0x613   :  { %2568 = vmatprep.subr.bf16.mxu0 %v2955_v30  ;;  %2600 = vmatprep.subr.bf16.mxu1 %v2962_v35 }
 0x614   :  { %1791 = vmatprep.mubr.f32.mxu0 %v2856_v0  ;;  %1862 = vmatprep.mubr.f32.mxu1 %v2856_v0 }
 0x615   :  { %1896 = vperm.xlu1 %2724, %v1894_v23  }
 0x616   :  { %2570 = vmatpush1.bf16.msra.mxu0 %v2964_v36  ;;  %2602 = vmatpush1.bf16.msra.mxu1 %v2968_v39 }
 0x617   :  { %2572 = vmatprep.subr.bf16.mxu0 %v2972_v43  ;;  %2604 = vmatprep.subr.bf16.mxu1 %v2979_v48 }
 0x61a   :  { %2574 = vmatpush1.bf16.msra.mxu0 %v2983_v51  ;;  %2606 = vmatpush1.bf16.msra.mxu1 %v2987_v55 }
 0x61b   :  { %2576 = vmatprep.subr.bf16.mxu0 %v2991_v59  ;;  %2608 = vmatprep.subr.bf16.mxu1 %v2995_v62 }
 0x61e   :  { %2578 = vmatpush1.bf16.msra.mxu0 %v3002_v4  ;;  %2610 = vmatpush1.bf16.msra.mxu1 %v3006_v7 }
 0x61f   :  { %2580 = vmatprep.subr.bf16.mxu0 %v3010_v10  ;;  %2612 = vmatprep.subr.bf16.mxu1 %v3014_v13 }
 0x622   :  { %2582 = vmatpush1.bf16.msra.mxu0 %v3021_v17  ;;  %2614 = vmatpush1.bf16.msra.mxu1 %v3025_v21 }
 0x623   :  { %2584 = vmatprep.subr.bf16.mxu0 %v3029_v27  ;;  %2616 = vmatprep.subr.bf16.mxu1 %v3033_v31 }
 0x626   :  { %2586 = vmatpush1.bf16.msra.mxu0 %v3040_v37  ;;  %2618 = vmatpush1.bf16.msra.mxu1 %v3044_v41 }
 0x627   :  { %2588 = vmatprep.subr.bf16.mxu0 %v3048_v45  ;;  %2620 = vmatprep.subr.bf16.mxu1 %v3055_v50  ;;  %v1717_v50 = vpop.permute.xlu0 %1716 }
 0x628   :  { %vm1718_vm15 = vcmp.eq.s32.totalorder %v1717_v50, 1 }
 0x62a   :  { %2590 = vmatpush1.bf16.msra.mxu0 %v3062_v56  ;;  %2622 = vmatpush1.bf16.msra.mxu1 %v3068_v61 }
 0x62b   :  { %2592 = vmatprep.subr.bf16.mxu0 %v3072_v3  ;;  %2624 = vmatprep.subr.bf16.mxu1 %v3076_v8  ;;  %v1906_v8 = vld [vmem:[%s3517_s5] sm:$0xff] }
 0x62e   :  { %2594 = vmatpush1.bf16.msra.mxu0 %v3083_v11  ;;  %2626 = vmatpush1.bf16.msra.mxu1 %v3088_v12  ;;  %v1907_v11 = vld [vmem:[%s3517_s5 + $0x8] sm:$0xff] }
 0x62f   :  { %v2628_v12 = vpack.c.bf16 %v1907_v11, %v1906_v8  ;;  %2627 = vmatprep.subr.bf16.mxu0 %v2858_v6 }
 0x6e4   :  { %v1613_v26 = vpop.f32.mrb[12].mxu0  ;;  %v1684_v30 = vpop.f32.mrb[12].mxu1 }
 0x6e5   :  { %v2663_v35 = vadd.f32 %v1613_v26, %v3143_v28  ;;  %v1615_v36 = vpop.f32.mrb[13].mxu0  ;;  %v1686_v39 = vpop.f32.mrb[13].mxu1  ;;  %v2679_v55 = vadd.f32 %v1684_v30, %v3148_v38 }
 0x6e6   :  { %v2664_v43 = vadd.f32 %v1615_v36, %v3145_v32  ;;  %v2680_v59 = vadd.f32 %v1686_v39, %v3152_v54 }
 0x6e7   :  { %v1693_v48 = vmul.f32 0.5, %v2663_v35 }
 0x6e8   :  { %v1697_v51 = vmul.f32 0.5, %v2664_v43  ;;  %v1702_v62 = vmul.f32 0.5, %v2680_v59 }
 0x6e9   :  { %2785 = vtanh.f32 %v1693_v48 }
 0x6ea   :  { %2787 = vtanh.f32 %v1697_v51 }
 0x6eb   :  { %2789 = vtanh.f32 %v2679_v55 }
 0x6ec   :  { %2791 = vtanh.f32 %v1702_v62 }
 0x6f3   :  { %v2786_v1 = vpop.eup %2785 }
 0x6f4   :  { %v2788_v4 = vpop.eup %2787  ;;  %v1695_v7 = vadd.f32 1.0, %v2786_v1 }
 0x6f5   :  { %v1699_v10 = vadd.f32 1.0, %v2788_v4  ;;  %v2790_v17 = vpop.eup %2789 }
 0x6f6   :  { %v1696_v13 = vmul.f32 0.5, %v1695_v7  ;;  %v2792_v41 = vpop.eup %2791 }
 0x6f7   :  { %v1700_v21 = vmul.f32 0.5, %v1699_v10  ;;  %v1704_v45 = vadd.f32 1.0, %v2792_v41  ;;  %v1897_v10 = vpop.permute.xlu1 %1896 }
 0x6f8   :  { %v1707_v27 = vmul.f32 %v2790_v17, %v1696_v13  ;;  %vm1898_vm1 = vcmp.eq.s32.totalorder %v1897_v10, 1 }
 0x6f9   :  { %v1706_v31 = vmul.f32 %v1700_v21, %v3391_v2  ;;  %v1705_v56 = vmul.f32 0.5, %v1704_v45  ;;  %v1920_v2 = vld [vmem:[%s3517_s5 + $0x70] sm:$0xff]  ;;  %v2054_v21 = vld [vmem:[%s3518_s6] ss:$0 sm:$0xff] }
 0x6fa   :  { %v2649_v16 = vpack.c.bf16 %v1921_v15, %v1920_v2 }
 0x6fb   :  { %v3436_v37 = vadd.f32 %v1707_v27, %v1706_v31 }
 0x6fd   :  { %2793 = vtanh.f32 %v3436_v37 }
 0x707   :  { %v2794_v60 = vpop.eup %2793 }
 0x708   :  { %v1710_v61 = vmul.f32 %v2794_v60, %v1705_v56 }
 0x70a   :  { %v3440_v3 = vsel %vm1718_vm15, %v1710_v61, %v3395_v33  ;;  %1792 = vmatmul.mubr.f32.vlgmr.msra.gmra.mrb[14].mxu0 %v1710_v61  ;;  %1863 = vmatmul.mubr.f32.vlgmr.msra.gmra.mrb[14].mxu1 %v1710_v61 }
 0x70b   :  { %2629 = vmatpush3.bf16.msra.mxu0 %v2628_v12  ;;  %2104 = vmatprep.mubr.msk.f32.mxu0 %vm2859_vm0, %v2856_v0 }
 0x70c   :  { %2630 = vmatprep.subr.bf16.mxu0 %v2858_v6 }
 0x70f   :  { %2632 = vmatpush3.bf16.msra.mxu0 %v2631_v42 }
 0x710   :  { %2633 = vmatprep.subr.bf16.mxu0 %v2858_v6 }
 0x713   :  { %2635 = vmatpush3.bf16.msra.mxu0 %v2634_v47 }
 0x714   :  { %2636 = vmatprep.subr.bf16.mxu0 %v2858_v6 }
 0x717   :  { %2638 = vmatpush3.bf16.msra.mxu0 %v2637_v52 }
 0x718   :  { %2639 = vmatprep.subr.bf16.mxu0 %v2858_v6 }
 0x71b   :  { %2641 = vmatpush3.bf16.msra.mxu0 %v2640_v57 }
 0x71c   :  { %2642 = vmatprep.subr.bf16.mxu0 %v2858_v6 }
 0x71f   :  { %2644 = vmatpush3.bf16.msra.mxu0 %v2643_v53 }
 0x720   :  { %2645 = vmatprep.subr.bf16.mxu0 %v2858_v6 }
 0x723   :  { %2647 = vmatpush3.bf16.msra.mxu0 %v2646_v49 }
 0x724   :  { %2648 = vmatprep.subr.bf16.mxu0 %v2858_v6 }
 0x727   :  { %2650 = vmatpush3.bf16.msra.mxu0 %v2649_v16 }
 0x7dd   :  { %v1793_v19 = vpop.f32.mrb[14].mxu0  ;;  %v1864_v58 = vpop.f32.mrb[14].mxu1 }
 0x7de   :  { %v2665_v14 = vadd.f32 %v1793_v19, %v3143_v28  ;;  %v1795_v25 = vpop.f32.mrb[15].mxu0  ;;  %v1866_v33 = vpop.f32.mrb[15].mxu1  ;;  %v2681_v35 = vadd.f32 %v1864_v58, %v3148_v38 }
 0x7df   :  { %v2666_v23 = vadd.f32 %v1795_v25, %v3145_v32  ;;  %v2682_v36 = vadd.f32 %v1866_v33, %v3152_v54 }
 0x7e0   :  { %v1873_v26 = vmul.f32 0.5, %v2665_v14 }
 0x7e1   :  { %v1877_v30 = vmul.f32 0.5, %v2666_v23  ;;  %v1882_v39 = vmul.f32 0.5, %v2682_v36 }
 0x7e2   :  { %2795 = vtanh.f32 %v1873_v26 }
 0x7e3   :  { %2797 = vtanh.f32 %v1877_v30 }
 0x7e4   :  { %2799 = vtanh.f32 %v2681_v35 }
 0x7e5   :  { %2801 = vtanh.f32 %v1882_v39 }
 0x7ec   :  { %v2796_v43 = vpop.eup %2795 }
 0x7ed   :  { %v2798_v0 = vpop.eup %2797  ;;  %v1875_v48 = vadd.f32 1.0, %v2796_v43 }
 0x7ee   :  { %v1879_v51 = vadd.f32 1.0, %v2798_v0  ;;  %v2800_v55 = vpop.eup %2799 }
 0x7ef   :  { %v1876_v28 = vmul.f32 0.5, %v1875_v48  ;;  %v2802_v4 = vpop.eup %2801 }
 0x7f0   :  { %v1880_v59 = vmul.f32 0.5, %v1879_v51  ;;  %v1884_v38 = vadd.f32 1.0, %v2802_v4 }
 0x7f1   :  { %v1887_v62 = vmul.f32 %v2800_v55, %v1876_v28 }
 0x7f2   :  { %v1886_v32 = vmul.f32 %v1880_v59, %v3436_v37  ;;  %v1885_v7 = vmul.f32 0.5, %v1884_v38 }
 0x7f4   :  { %v1888_v1 = vadd.f32 %v1887_v62, %v1886_v32 }
 0x7f6   :  { %2803 = vtanh.f32 %v1888_v1 }
 0x800   :  { %v2804_v13 = vpop.eup %2803 }
 0x801   :  { %v1890_v54 = vmul.f32 %v2804_v13, %v1885_v7 }
 0x803   :  { %v1899_v17 = vsel %vm1898_vm1, %v1890_v54, %v3440_v3 }
 0x804   :  { %2105 = vmatmul.mubr.f32.vlgmr.msra.gmra.mrb[16].mxu0 %v1899_v17 }
 0x8d7   :  { %v1995_v27 = vpop.f32.mrb[16].mxu0 }
 0x8d8   :  { %v1996_v31 = vadd.f32 %v2054_v21, %v1995_v27  ;;  %v2106_v37 = vpop.f32.mrb[17].mxu0 }
 0x8da   :  { %2000 = vst.msk [vmem:[#allocation9] sm:$0xff] %vm1999_vm2, %v1996_v31 }
 0x8db   :  { %2838 = shalt.err (!%p2835_p12)
}
 0x8dc   :  { %s2839_s2 = scalar_lea.hbm %s3519_s7, 128 }
 0x8dd   :  { %p2840_p13 = scmp.ne.s32.totalorder %s3519_s7, %s2839_s2  ;;  %p2843_p0 = scmp.lt.u32.totalorder %s2839_s2, %s3519_s7 }
 0x8df   :  { %p2845_p1 = pnand %p2843_p0, %p2840_p13 }
 0x8e1   :  { %2848 = shalt.err (!%p2845_p1)
}
 0x8e2   :  { %2010 = dma.vmem_to_hbm [thread:$0]  %s2008_s28, 128, %s3519_s7, [#allocation8]  }
 0x8e3   :  { %2851 = dma.done.wait [#allocation8], 128  }
 0x8e4   :  { %2852 = vsyncadd [#allocation8], 4294967168 }
 0x8e5   :  { %2014 = vsyncpa [#allocation7], 1 }
 0x8e6   :  { %2015 = vsyncpa [#allocation8], 1 }

// kernel: tpu_custom_call.1
= control target key start
LH: loop header
LB: loop body
LE: loop exit
PB: predicated region body
PF: predicated region fallthrough
CT: control target
= control target key end

     0   :  { %12 = vsyncpa [#allocation7], 0  ;;  %s3512_s0 = inlined_call_operand.vmem [shape: f32[64,16], index: 0, kind: input, shape index: {}]   ;;  %s3513_s1 = inlined_call_operand.vmem [shape: s32[8,1], index: 1, kind: input, shape index: {}]   ;;  %s3514_s2 = inlined_call_operand.vmem [shape: f32[16,512], index: 2, kind: input, shape index: {}]   ;;  %s3515_s3 = inlined_call_operand.hbm [shape: f32[128,512], index: 3, kind: input, shape index: {}]   ;;  %s3516_s4 = inlined_call_operand.vmem [shape: f32[1,512], index: 4, kind: input, shape index: {}]   ;;  %s3517_s5 = inlined_call_operand.vmem [shape: f32[128,8], index: 5, kind: input, shape index: {}]   ;;  %s3518_s6 = inlined_call_operand.vmem [shape: f32[1,8], index: 6, kind: input, shape index: {}]   ;;  %s3519_s7 = inlined_call_operand.hbm [shape: f32[8,8], index: 7, kind: output, shape index: {}]  }
   0x1   :  { %13 = vsyncpa [#allocation8], 0  ;;  %s2853_s24 = smov [#allocation6]   ;;  %s2805_s28 = scalar_lea.hbm %s3515_s3, 8192 }
   0x2   :  { %s33_s25 = sshll.u32 %s2853_s24, 4  ;;  %p2806_p0 = scmp.ne.s32.totalorder %s3515_s3, %s2805_s28  ;;  %s34_s25 = int_to_ptr.vmem [resolvable:$true] %s33_s25 }
   0x3   :  { %p2809_p1 = scmp.lt.u32.totalorder %s2805_s28, %s3515_s3 }
   0x5   :  { %p2811_p2 = pnand %p2809_p1, %p2806_p0 }
   0x7   :  { %2814 = shalt.err (!%p2811_p2)
}
   0x8   :  { %s2815_s10 = scalar_lea.vmem %s34_s25, 8192  ;;  %p2820_p4 = scmp.lt.s32.totalorder %s34_s25, %s34_s25 }
   0x9   :  { %p2816_p3 = scmp.ne.s32.totalorder %s34_s25, %s2815_s10  ;;  %p2821_p5 = scmp.lt.s32.totalorder %s2815_s10, %s2815_s10 }
   0xb   :  { %p2822_p6 = por %p2821_p5, %p2820_p4 }
   0xd   :  { %p2823_p7 = pnand %p2822_p6, %p2816_p3 }
   0xf   :  { %2826 = shalt.err (!%p2823_p7)
}
  0x10   :  { %s2854_s11 = smov 512   ;;  %s2855_s12 = smov 32  }
  0x11   :  { %39 = dma.hbm_to_vmem [thread:$0]  %s3515_s3, 8192, %s34_s25, [#allocation7], %s2854_s11, %s2854_s11, %s2855_s12  }
  0x12   :  { %2849 = dma.done.wait [#allocation7], 8192  }
  0x13   :  { %2850 = vsyncadd [#allocation7], 4294959104  ;;  %v2856_v0 = vmov 0.0   ;;  %v2857_v1 = vmov 0   ;;  %v145_v2 = vld [vmem:[%s3514_s2 + $0x8] sm:$0xff]  ;;  %v147_v4 = vld [vmem:[%s3514_s2 + $0x18] sm:$0xff] }
  0x14   :  { %263 = vmatprep.mubr.f32.mxu0 %v2856_v0  ;;  %376 = vmatprep.mubr.f32.mxu1 %v2856_v0  ;;  %v149_v3 = vld [vmem:[%s3514_s2 + $0x28] sm:$0xff]  ;;  %v151_v6 = vld [vmem:[%s3514_s2 + $0x38] sm:$0xff]  ;;  %v144_v7 = vld [vmem:[%s3514_s2] sm:$0xff]  ;;  %vm174_vm0 = vcmask 130048   ;;  %s2860_s27 = smov [#allocation9]  }
  0x15   :  { %2723 = vset.pattern.permute.xlu0 %v2857_v1  ;;  %2724 = vset.pattern.permute.xlu1 %v2857_v1  ;;  %v2107_v5 = vpack.c.bf16 %v149_v3, %v145_v2  ;;  %v148_v8 = vld [vmem:[%s3514_s2 + $0x20] sm:$0xff]  ;;  %v2111_v9 = vpack.c.bf16 %v151_v6, %v147_v4  ;;  %v146_v11 = vld [vmem:[%s3514_s2 + $0x10] sm:$0xff]  ;;  %v71_v15 = vld [vmem:[#allocation6 + $0x8] sm:$0xff]  ;;  %s2007_s28 = sshll.u32 %s2860_s27, 4  ;;  %s2008_s28 = int_to_ptr.vmem [resolvable:$true] %s2007_s28 }
  0x16   :  { %v2109_v10 = vpack.c.bf16 %v148_v8, %v144_v7  ;;  %v150_v12 = vld [vmem:[%s3514_s2 + $0x30] sm:$0xff]  ;;  %v136_v13 = vld [vmem:[%s3512_s0] sm:$0xff]  ;;  %v75_v16 = vld [vmem:[#allocation6 + $0x28] sm:$0xff]  ;;  %s2827_s29 = scalar_lea.vmem %s2008_s28, 128  ;;  %p2832_p9 = scmp.lt.s32.totalorder %s2008_s28, %s2008_s28 }
  0x17   :  { %2108 = vmatprep.subr.bf16.mxu0 %v2107_v5  ;;  %v2113_v14 = vpack.c.bf16 %v150_v12, %v146_v11  ;;  %v73_v17 = vld [vmem:[#allocation6 + $0x18] sm:$0xff]  ;;  %2112 = vmatprep.subr.bf16.mxu1 %v2111_v9  ;;  %v2944_v18 = vpack.c.bf16 %v75_v16, %v71_v15  ;;  %v70_v20 = vld [vmem:[#allocation6] sm:$0xff]  ;;  %v72_v24 = vld [vmem:[#allocation6 + $0x10] sm:$0xff]  ;;  %p2828_p8 = scmp.ne.s32.totalorder %s2008_s28, %s2827_s29  ;;  %p2833_p10 = scmp.lt.s32.totalorder %s2827_s29, %s2827_s29 }
  0x18   :  { %2110 = vmatpush1.bf16.msra.mxu0 %v2109_v10  ;;  %v77_v19 = vld [vmem:[#allocation6 + $0x38] sm:$0xff]  ;;  %v74_v21 = vld [vmem:[#allocation6 + $0x20] sm:$0xff]  ;;  %v76_v25 = vld [vmem:[#allocation6 + $0x30] sm:$0xff] }
  0x19   :  { %2114 = vmatpush1.bf16.msra.mxu1 %v2113_v14  ;;  %v2946_v22 = vpack.c.bf16 %v77_v19, %v73_v17  ;;  %v2948_v23 = vpack.c.bf16 %v74_v21, %v70_v20  ;;  %2116 = vmatprep.subr.bf16.mxu0 %v2944_v18  ;;  %v2951_v26 = vpack.c.bf16 %v76_v25, %v72_v24  ;;  %v79_v27 = vld [vmem:[#allocation6 + $0x48] sm:$0xff]  ;;  %v81_v29 = vld [vmem:[#allocation6 + $0x58] sm:$0xff]  ;;  %v78_v32 = vld [vmem:[#allocation6 + $0x40] sm:$0xff]  ;;  %p2834_p11 = por %p2833_p10, %p2832_p9 }
  0x1a   :  { %v83_v28 = vld [vmem:[#allocation6 + $0x68] sm:$0xff]  ;;  %v85_v31 = vld [vmem:[#allocation6 + $0x78] sm:$0xff]  ;;  %v82_v33 = vld [vmem:[#allocation6 + $0x60] sm:$0xff] }
  0x1b   :  { %2030 = vmatmul.mubr.msk.f32.vlgmr.msra.gmra.mrb[0].mxu0 %vm174_vm0, %v136_v13  ;;  %2148 = vmatprep.subr.bf16.mxu1 %v2946_v22  ;;  %v2955_v30 = vpack.c.bf16 %v83_v28, %v79_v27  ;;  %v137_v34 = vld [vmem:[%s3512_s0 + $0x8] sm:$0xff]  ;;  %v2962_v35 = vpack.c.bf16 %v85_v31, %v81_v29  ;;  %v2964_v36 = vpack.c.bf16 %v82_v33, %v78_v32  ;;  %v80_v37 = vld [vmem:[#allocation6 + $0x50] sm:$0xff]  ;;  %v89_v42 = vld [vmem:[#allocation6 + $0x98] sm:$0xff]  ;;  %p2835_p12 = pnand %p2834_p11, %p2828_p8 }
  0x1c   :  { %2038 = vmatmul.mubr.msk.f32.vlgmr.msra.gmra.mrb[0].mxu1 %vm174_vm0, %v136_v13  ;;  %2118 = vmatpush1.bf16.msra.mxu0 %v2948_v23  ;;  %v84_v38 = vld [vmem:[#allocation6 + $0x70] sm:$0xff]  ;;  %v87_v40 = vld [vmem:[#allocation6 + $0x88] sm:$0xff]  ;;  %v93_v44 = vld [vmem:[#allocation6 + $0xb8] sm:$0xff] }
  0x1d   :  { %2150 = vmatpush1.bf16.msra.mxu1 %v2951_v26  ;;  %269 = vmatprep.mubr.f32.mxu0 %v2856_v0  ;;  %v2968_v39 = vpack.c.bf16 %v84_v38, %v80_v37  ;;  %v91_v41 = vld [vmem:[#allocation6 + $0xa8] sm:$0xff]  ;;  %v86_v45 = vld [vmem:[#allocation6 + $0x80] sm:$0xff]  ;;  %v138_v47 = vld [vmem:[%s3512_s0 + $0x10] sm:$0xff]  ;;  %v2979_v48 = vpack.c.bf16 %v93_v44, %v89_v42 }
  0x1e   :  { %382 = vmatprep.mubr.f32.mxu1 %v2856_v0  ;;  %2120 = vmatprep.subr.bf16.mxu0 %v2955_v30  ;;  %v2972_v43 = vpack.c.bf16 %v91_v41, %v87_v40  ;;  %v90_v46 = vld [vmem:[#allocation6 + $0xa0] sm:$0xff]  ;;  %v88_v49 = vld [vmem:[#allocation6 + $0x90] sm:$0xff]  ;;  %v95_v52 = vld [vmem:[#allocation6 + $0xc8] sm:$0xff] }
  0x1f   :  { %2031 = vmatmul.mubr.msk.f32.gmra.mrb[2].mxu0 %vm174_vm0, %v137_v34  ;;  %2152 = vmatprep.subr.bf16.mxu1 %v2962_v35  ;;  %v92_v50 = vld [vmem:[#allocation6 + $0xb0] sm:$0xff]  ;;  %v2983_v51 = vpack.c.bf16 %v90_v46, %v86_v45  ;;  %v99_v53 = vld [vmem:[#allocation6 + $0xe8] sm:$0xff]  ;;  %v97_v54 = vld [vmem:[#allocation6 + $0xd8] sm:$0xff] }
  0x20   :  { %2039 = vmatmul.mubr.msk.f32.gmra.mrb[2].mxu1 %vm174_vm0, %v137_v34  ;;  %2122 = vmatpush1.bf16.msra.mxu0 %v2964_v36  ;;  %v2987_v55 = vpack.c.bf16 %v92_v50, %v88_v49  ;;  %v101_v56 = vld [vmem:[#allocation6 + $0xf8] sm:$0xff]  ;;  %v94_v57 = vld [vmem:[#allocation6 + $0xc0] sm:$0xff]  ;;  %v2991_v59 = vpack.c.bf16 %v99_v53, %v95_v52  ;;  %v96_v60 = vld [vmem:[#allocation6 + $0xd0] sm:$0xff] }
  0x21   :  { %2154 = vmatpush1.bf16.msra.mxu1 %v2968_v39  ;;  %275 = vmatprep.mubr.f32.mxu0 %v2856_v0  ;;  %v98_v58 = vld [vmem:[#allocation6 + $0xe0] sm:$0xff]  ;;  %v100_v61 = vld [vmem:[#allocation6 + $0xf0] sm:$0xff]  ;;  %v2995_v62 = vpack.c.bf16 %v101_v56, %v97_v54  ;;  %v103_v63 = vld [vmem:[#allocation6 + $0x108] sm:$0xff] }
  0x22   :  { %388 = vmatprep.mubr.f32.mxu1 %v2856_v0  ;;  %2124 = vmatprep.subr.bf16.mxu0 %v2972_v43  ;;  %v107_v2 = vld [vmem:[#allocation6 + $0x128] sm:$0xff]  ;;  %v139_v3 = vld [vmem:[%s3512_s0 + $0x18] sm:$0xff]  ;;  %v3002_v4 = vpack.c.bf16 %v98_v58, %v94_v57  ;;  %v3006_v7 = vpack.c.bf16 %v100_v61, %v96_v60  ;;  %v102_v8 = vld [vmem:[#allocation6 + $0x100] sm:$0xff] }
  0x23   :  { %2032 = vmatmul.mubr.msk.f32.gmra.mrb[4].mxu0 %vm174_vm0, %v138_v47  ;;  %2156 = vmatprep.subr.bf16.mxu1 %v2979_v48  ;;  %v105_v5 = vld [vmem:[#allocation6 + $0x118] sm:$0xff]  ;;  %v106_v9 = vld [vmem:[#allocation6 + $0x120] sm:$0xff]  ;;  %v3010_v10 = vpack.c.bf16 %v107_v2, %v103_v63  ;;  %v104_v11 = vld [vmem:[#allocation6 + $0x110] sm:$0xff] }
  0x24   :  { %2040 = vmatmul.mubr.msk.f32.gmra.mrb[4].mxu1 %vm174_vm0, %v138_v47  ;;  %2126 = vmatpush1.bf16.msra.mxu0 %v2983_v51  ;;  %v109_v6 = vld [vmem:[#allocation6 + $0x138] sm:$0xff]  ;;  %v108_v12 = vld [vmem:[#allocation6 + $0x130] sm:$0xff]  ;;  %v111_v14 = vld [vmem:[#allocation6 + $0x148] sm:$0xff]  ;;  %v3021_v17 = vpack.c.bf16 %v106_v9, %v102_v8 }
  0x25   :  { %2158 = vmatpush1.bf16.msra.mxu1 %v2987_v55  ;;  %281 = vmatprep.mubr.f32.mxu0 %v2856_v0  ;;  %v3014_v13 = vpack.c.bf16 %v109_v6, %v105_v5  ;;  %v115_v15 = vld [vmem:[#allocation6 + $0x168] sm:$0xff]  ;;  %v140_v16 = vld [vmem:[%s3512_s0 + $0x20] sm:$0xff]  ;;  %v113_v19 = vld [vmem:[#allocation6 + $0x158] sm:$0xff]  ;;  %v3025_v21 = vpack.c.bf16 %v108_v12, %v104_v11 }
  0x26   :  { %394 = vmatprep.mubr.f32.mxu1 %v2856_v0  ;;  %2128 = vmatprep.subr.bf16.mxu0 %v2991_v59  ;;  %v117_v20 = vld [vmem:[#allocation6 + $0x178] sm:$0xff]  ;;  %v110_v24 = vld [vmem:[#allocation6 + $0x140] sm:$0xff]  ;;  %v3029_v27 = vpack.c.bf16 %v115_v15, %v111_v14  ;;  %v112_v28 = vld [vmem:[#allocation6 + $0x150] sm:$0xff] }
  0x27   :  { %2033 = vmatmul.mubr.msk.f32.gmra.mrb[6].mxu0 %vm174_vm0, %v139_v3  ;;  %2160 = vmatprep.subr.bf16.mxu1 %v2995_v62  ;;  %v114_v25 = vld [vmem:[#allocation6 + $0x160] sm:$0xff]  ;;  %v116_v29 = vld [vmem:[#allocation6 + $0x170] sm:$0xff]  ;;  %v3033_v31 = vpack.c.bf16 %v117_v20, %v113_v19  ;;  %v119_v32 = vld [vmem:[#allocation6 + $0x188] sm:$0xff] }
  0x28   :  { %2041 = vmatmul.mubr.msk.f32.gmra.mrb[6].mxu1 %vm174_vm0, %v139_v3  ;;  %2130 = vmatpush1.bf16.msra.mxu0 %v3002_v4  ;;  %v123_v33 = vld [vmem:[#allocation6 + $0x1a8] sm:$0xff]  ;;  %v3040_v37 = vpack.c.bf16 %v114_v25, %v110_v24  ;;  %v121_v38 = vld [vmem:[#allocation6 + $0x198] sm:$0xff]  ;;  %v3044_v41 = vpack.c.bf16 %v116_v29, %v112_v28  ;;  %v118_v42 = vld [vmem:[#allocation6 + $0x180] sm:$0xff] }
  0x29   :  { %2162 = vmatpush1.bf16.msra.mxu1 %v3006_v7  ;;  %287 = vmatprep.mubr.f32.mxu0 %v2856_v0  ;;  %v141_v34 = vld [vmem:[%s3512_s0 + $0x28] sm:$0xff]  ;;  %v125_v40 = vld [vmem:[#allocation6 + $0x1b8] sm:$0xff]  ;;  %v122_v44 = vld [vmem:[#allocation6 + $0x1a0] sm:$0xff]  ;;  %v3048_v45 = vpack.c.bf16 %v123_v33, %v119_v32 }
  0x2a   :  { %400 = vmatprep.mubr.f32.mxu1 %v2856_v0  ;;  %2132 = vmatprep.subr.bf16.mxu0 %v3010_v10  ;;  %v120_v46 = vld [vmem:[#allocation6 + $0x190] sm:$0xff]  ;;  %v134_v49 = vld [vmem:[%s3513_s1] sm:$0xff]  ;;  %v3055_v50 = vpack.c.bf16 %v125_v40, %v121_v38  ;;  %v127_v52 = vld [vmem:[#allocation6 + $0x1c8] sm:$0xff]  ;;  %v3062_v56 = vpack.c.bf16 %v122_v44, %v118_v42 }
  0x2b   :  { %2034 = vmatmul.mubr.msk.f32.gmra.mrb[8].mxu0 %vm174_vm0, %v140_v16  ;;  %2164 = vmatprep.subr.bf16.mxu1 %v3014_v13  ;;  %v124_v47 = vld [vmem:[#allocation6 + $0x1b0] sm:$0xff]  ;;  %v131_v53 = vld [vmem:[#allocation6 + $0x1e8] sm:$0xff]  ;;  %v129_v57 = vld [vmem:[#allocation6 + $0x1d8] sm:$0xff]  ;;  %v3064_v60 = vadd.s32 4294967295, %v134_v49 }
  0x2c   :  { %2042 = vmatmul.mubr.msk.f32.gmra.mrb[8].mxu1 %vm174_vm0, %v140_v16  ;;  %2134 = vmatpush1.bf16.msra.mxu0 %v3021_v17  ;;  %v142_v54 = vld [vmem:[%s3512_s0 + $0x30] sm:$0xff]  ;;  %v133_v58 = vld [vmem:[#allocation6 + $0x1f8] sm:$0xff]  ;;  %v3068_v61 = vpack.c.bf16 %v124_v47, %v120_v46  ;;  %v126_v63 = vld [vmem:[#allocation6 + $0x1c0] sm:$0xff]  ;;  %v3072_v3 = vpack.c.bf16 %v131_v53, %v127_v52  ;;  %v154_v16 = vlaneseq }
  0x2d   :  { %2166 = vmatpush1.bf16.msra.mxu1 %v3025_v21  ;;  %293 = vmatprep.mubr.f32.mxu0 %v2856_v0  ;;  %v130_v2 = vld [vmem:[#allocation6 + $0x1e0] sm:$0xff]  ;;  %v128_v5 = vld [vmem:[#allocation6 + $0x1d0] sm:$0xff]  ;;  %v3076_v8 = vpack.c.bf16 %v133_v58, %v129_v57  ;;  %v143_v9 = vld [vmem:[%s3512_s0 + $0x38] sm:$0xff]  ;;  %vm2046_vm1 = vcmp.eq.s32.totalorder %v3064_v60, 0  ;;  %vm2047_vm2 = vcmp.eq.s32.totalorder %v3064_v60, 1  ;;  %vm2048_vm3 = vcmp.eq.s32.totalorder %v3064_v60, 2 }
  0x2e   :  { %406 = vmatprep.mubr.f32.mxu1 %v2856_v0  ;;  %2136 = vmatprep.subr.bf16.mxu0 %v3029_v27  ;;  %v132_v6 = vld [vmem:[#allocation6 + $0x1f0] sm:$0xff]  ;;  %v3083_v11 = vpack.c.bf16 %v130_v2, %v126_v63  ;;  %v634_v14 = vsel %vm2046_vm1, 1, %v2857_v1  ;;  %v814_v15 = vsel %vm2047_vm2, 1, %v2857_v1  ;;  %v155_v19 = vshrl.u32 %v154_v16, 7  ;;  %v152_v24 = vld [vmem:[%s3516_s4] sm:$0xf] }
  0x2f   :  { %2035 = vmatmul.mubr.msk.f32.gmra.mrb[10].mxu0 %vm174_vm0, %v141_v34  ;;  %2168 = vmatprep.subr.bf16.mxu1 %v3033_v31  ;;  %v3088_v12 = vpack.c.bf16 %v132_v6, %v128_v5  ;;  %vm2049_vm6 = vcmp.eq.s32.totalorder %v3064_v60, 3  ;;  %vm2050_vm8 = vcmp.eq.s32.totalorder %v3064_v60, 4  ;;  %vm2051_vm10 = vcmp.eq.s32.totalorder %v3064_v60, 5 }
  0x30   :  { %2043 = vmatmul.mubr.msk.f32.gmra.mrb[10].mxu1 %vm174_vm0, %v141_v34  ;;  %2138 = vmatpush1.bf16.msra.mxu0 %v3040_v37  ;;  %v156_v20 = vsub.s32 0, %v155_v19  ;;  %v160_v25 = vsub.s32 1, %v155_v19  ;;  %v164_v29 = vsub.s32 2, %v155_v19  ;;  %v168_v44 = vsub.s32 3, %v155_v19 }
  0x31   :  { %2170 = vmatpush1.bf16.msra.mxu1 %v3044_v41  ;;  %299 = vmatprep.mubr.f32.mxu0 %v2856_v0  ;;  %vm2052_vm12 = vcmp.eq.s32.totalorder %v3064_v60, 6  ;;  %vm2053_vm14 = vcmp.eq.s32.totalorder %v3064_v60, 7  ;;  %vm1999_vm2 = vcmask 64512  }
  0x32   :  { %412 = vmatprep.mubr.f32.mxu1 %v2856_v0  ;;  %2140 = vmatprep.subr.bf16.mxu0 %v3048_v45  ;;  %v3143_v28 = vrot.slane %v152_v24, %v156_v20  ;;  %v3145_v32 = vrot.slane %v152_v24, %v160_v25  ;;  %v3148_v38 = vrot.slane %v152_v24, %v164_v29 }
  0x33   :  { %2036 = vmatmul.mubr.msk.f32.gmra.mrb[12].mxu0 %vm174_vm0, %v142_v54  ;;  %2172 = vmatprep.subr.bf16.mxu1 %v3055_v50 }
  0x34   :  { %2044 = vmatmul.mubr.msk.f32.gmra.mrb[12].mxu1 %vm174_vm0, %v142_v54  ;;  %2142 = vmatpush1.bf16.msra.mxu0 %v3062_v56  ;;  %v3152_v54 = vrot.slane %v152_v24, %v168_v44 }
  0x35   :  { %2174 = vmatpush1.bf16.msra.mxu1 %v3068_v61  ;;  %305 = vmatprep.mubr.f32.mxu0 %v2856_v0 }
  0x36   :  { %418 = vmatprep.mubr.f32.mxu1 %v2856_v0  ;;  %2144 = vmatprep.subr.bf16.mxu0 %v3072_v3 }
  0x37   :  { %2037 = vmatmul.mubr.msk.f32.gmra.mrb[14].mxu0 %vm174_vm0, %v143_v9  ;;  %2176 = vmatprep.subr.bf16.mxu1 %v3076_v8 }
  0x38   :  { %2045 = vmatmul.mubr.msk.f32.gmra.mrb[14].mxu1 %vm174_vm0, %v143_v9  ;;  %2146 = vmatpush1.bf16.msra.mxu0 %v3083_v11  ;;  %vm2859_vm0 = vmmov 0  }
  0x39   :  { %2178 = vmatpush1.bf16.msra.mxu1 %v3088_v12  ;;  %532 = vmatprep.mubr.f32.mxu0 %v2856_v0 }
  0x3a   :  { %603 = vmatprep.mubr.f32.mxu1 %v2856_v0  ;;  %636 = vperm.xlu0 %2723, %v634_v14  }
  0x3b   :  { %533 = vmatmul.mubr.f32.vlgmr.msra.gmra.mrb[0].mxu0 %v2856_v0  ;;  %2180 = vmatprep.subr.bf16.mxu0 %v2944_v18 }
  0x3c   :  { %604 = vmatmul.mubr.f32.vlgmr.msra.gmra.mrb[0].mxu1 %v2856_v0  ;;  %2212 = vmatprep.subr.bf16.mxu1 %v2946_v22 }
  0x3d   :  { %2182 = vmatpush1.bf16.msra.mxu0 %v2948_v23  ;;  %2214 = vmatpush1.bf16.msra.mxu1 %v2951_v26 }
  0x3e   :  { %2184 = vmatprep.subr.bf16.mxu0 %v2955_v30  ;;  %2216 = vmatprep.subr.bf16.mxu1 %v2962_v35 }
  0x3f   :  { %711 = vmatprep.mubr.f32.mxu0 %v2856_v0  ;;  %782 = vmatprep.mubr.f32.mxu1 %v2856_v0 }
  0x40   :  { %816 = vperm.xlu0 %2723, %v814_v15  }
  0x41   :  { %2186 = vmatpush1.bf16.msra.mxu0 %v2964_v36  ;;  %2218 = vmatpush1.bf16.msra.mxu1 %v2968_v39 }
  0x42   :  { %2188 = vmatprep.subr.bf16.mxu0 %v2972_v43  ;;  %2220 = vmatprep.subr.bf16.mxu1 %v2979_v48 }
  0x45   :  { %2190 = vmatpush1.bf16.msra.mxu0 %v2983_v51  ;;  %2222 = vmatpush1.bf16.msra.mxu1 %v2987_v55 }
  0x46   :  { %2192 = vmatprep.subr.bf16.mxu0 %v2991_v59  ;;  %2224 = vmatprep.subr.bf16.mxu1 %v2995_v62 }
  0x49   :  { %2194 = vmatpush1.bf16.msra.mxu0 %v3002_v4  ;;  %2226 = vmatpush1.bf16.msra.mxu1 %v3006_v7 }
  0x4a   :  { %2196 = vmatprep.subr.bf16.mxu0 %v3010_v10  ;;  %2228 = vmatprep.subr.bf16.mxu1 %v3014_v13 }
  0x4d   :  { %2198 = vmatpush1.bf16.msra.mxu0 %v3021_v17  ;;  %2230 = vmatpush1.bf16.msra.mxu1 %v3025_v21 }
  0x4e   :  { %2200 = vmatprep.subr.bf16.mxu0 %v3029_v27  ;;  %2232 = vmatprep.subr.bf16.mxu1 %v3033_v31 }
  0x51   :  { %2202 = vmatpush1.bf16.msra.mxu0 %v3040_v37  ;;  %2234 = vmatpush1.bf16.msra.mxu1 %v3044_v41 }
  0x52   :  { %2204 = vmatprep.subr.bf16.mxu0 %v3048_v45  ;;  %2236 = vmatprep.subr.bf16.mxu1 %v3055_v50 }
  0x55   :  { %2206 = vmatpush1.bf16.msra.mxu0 %v3062_v56  ;;  %2238 = vmatpush1.bf16.msra.mxu1 %v3068_v61 }
  0x56   :  { %2208 = vmatprep.subr.bf16.mxu0 %v3072_v3  ;;  %2240 = vmatprep.subr.bf16.mxu1 %v3076_v8 }
  0x59   :  { %2210 = vmatpush1.bf16.msra.mxu0 %v3083_v11  ;;  %2242 = vmatpush1.bf16.msra.mxu1 %v3088_v12 }
  0x5a   :  { %2244 = vmatprep.subr.bf16.mxu0 %v2944_v18  ;;  %2276 = vmatprep.subr.bf16.mxu1 %v2946_v22 }
 0x10e   :  { %v534_v33 = vpop.f32.mrb[0].mxu0 }
 0x10f   :  { %v2651_v34 = vadd.f32 %v534_v33, %v3143_v28  ;;  %v605_v40 = vpop.f32.mrb[0].mxu1  ;;  %v536_v42 = vpop.f32.mrb[1].mxu0 }
 0x110   :  { %v2652_v46 = vadd.f32 %v536_v42, %v3145_v32  ;;  %v607_v47 = vpop.f32.mrb[1].mxu1  ;;  %v2667_v53 = vadd.f32 %v605_v40, %v3148_v38  ;;  %v994_v40 = vsel %vm2048_vm3, 1, %v2857_v1 }
 0x111   :  { %v614_v49 = vmul.f32 0.5, %v2651_v34  ;;  %v2668_v57 = vadd.f32 %v607_v47, %v3152_v54  ;;  %996 = vperm.xlu1 %2724, %v994_v40   ;;  %v637_v40 = vpop.permute.xlu0 %636 }
 0x112   :  { %v618_v52 = vmul.f32 0.5, %v2652_v46  ;;  %vm638_vm4 = vcmp.eq.s32.totalorder %v637_v40, 1 }
 0x113   :  { %2725 = vtanh.f32 %v614_v49  ;;  %v623_v58 = vmul.f32 0.5, %v2668_v57 }
 0x114   :  { %2727 = vtanh.f32 %v618_v52 }
 0x115   :  { %2729 = vtanh.f32 %v2667_v53 }
 0x116   :  { %2731 = vtanh.f32 %v623_v58 }
 0x11d   :  { %v2726_v63 = vpop.eup %2725 }
 0x11e   :  { %v2728_v2 = vpop.eup %2727  ;;  %v616_v5 = vadd.f32 1.0, %v2726_v63 }
 0x11f   :  { %v620_v6 = vadd.f32 1.0, %v2728_v2  ;;  %v2730_v14 = vpop.eup %2729 }
 0x120   :  { %v617_v9 = vmul.f32 0.5, %v616_v5  ;;  %v2732_v24 = vpop.eup %2731 }
 0x121   :  { %v621_v15 = vmul.f32 0.5, %v620_v6  ;;  %v625_v25 = vadd.f32 1.0, %v2732_v24 }
 0x122   :  { %v628_v16 = vmul.f32 %v2730_v14, %v617_v9 }
 0x123   :  { %v627_v19 = vmul.f32 0.0, %v621_v15  ;;  %v626_v29 = vmul.f32 0.5, %v625_v25 }
 0x125   :  { %v3155_v20 = vadd.f32 %v628_v16, %v627_v19 }
 0x127   :  { %2733 = vtanh.f32 %v3155_v20 }
 0x131   :  { %v2734_v33 = vpop.eup %2733 }
 0x132   :  { %v3158_v34 = vmul.f32 %v2734_v33, %v626_v29 }
 0x134   :  { %712 = vmatmul.mubr.f32.vlgmr.msra.gmra.mrb[2].mxu0 %v3158_v34  ;;  %783 = vmatmul.mubr.f32.vlgmr.msra.gmra.mrb[2].mxu1 %v3158_v34 }
 0x135   :  { %2246 = vmatpush1.bf16.msra.mxu0 %v2948_v23  ;;  %2278 = vmatpush1.bf16.msra.mxu1 %v2951_v26 }
 0x136   :  { %2248 = vmatprep.subr.bf16.mxu0 %v2955_v30  ;;  %2280 = vmatprep.subr.bf16.mxu1 %v2962_v35 }
 0x137   :  { %891 = vmatprep.mubr.f32.mxu0 %v2856_v0  ;;  %962 = vmatprep.mubr.f32.mxu1 %v2856_v0 }
 0x139   :  { %2250 = vmatpush1.bf16.msra.mxu0 %v2964_v36  ;;  %2282 = vmatpush1.bf16.msra.mxu1 %v2968_v39 }
 0x13a   :  { %2252 = vmatprep.subr.bf16.mxu0 %v2972_v43  ;;  %2284 = vmatprep.subr.bf16.mxu1 %v2979_v48 }
 0x13d   :  { %2254 = vmatpush1.bf16.msra.mxu0 %v2983_v51  ;;  %2286 = vmatpush1.bf16.msra.mxu1 %v2987_v55 }
 0x13e   :  { %2256 = vmatprep.subr.bf16.mxu0 %v2991_v59  ;;  %2288 = vmatprep.subr.bf16.mxu1 %v2995_v62 }
 0x141   :  { %2258 = vmatpush1.bf16.msra.mxu0 %v3002_v4  ;;  %2290 = vmatpush1.bf16.msra.mxu1 %v3006_v7 }
 0x142   :  { %2260 = vmatprep.subr.bf16.mxu0 %v3010_v10  ;;  %2292 = vmatprep.subr.bf16.mxu1 %v3014_v13 }
 0x145   :  { %2262 = vmatpush1.bf16.msra.mxu0 %v3021_v17  ;;  %2294 = vmatpush1.bf16.msra.mxu1 %v3025_v21 }
 0x146   :  { %2264 = vmatprep.subr.bf16.mxu0 %v3029_v27  ;;  %2296 = vmatprep.subr.bf16.mxu1 %v3033_v31 }
 0x149   :  { %2266 = vmatpush1.bf16.msra.mxu0 %v3040_v37  ;;  %2298 = vmatpush1.bf16.msra.mxu1 %v3044_v41 }
 0x14a   :  { %2268 = vmatprep.subr.bf16.mxu0 %v3048_v45  ;;  %2300 = vmatprep.subr.bf16.mxu1 %v3055_v50 }
 0x14d   :  { %2270 = vmatpush1.bf16.msra.mxu0 %v3062_v56  ;;  %2302 = vmatpush1.bf16.msra.mxu1 %v3068_v61 }
 0x14e   :  { %2272 = vmatprep.subr.bf16.mxu0 %v3072_v3  ;;  %2304 = vmatprep.subr.bf16.mxu1 %v3076_v8 }
 0x151   :  { %2274 = vmatpush1.bf16.msra.mxu0 %v3083_v11  ;;  %2306 = vmatpush1.bf16.msra.mxu1 %v3088_v12 }
 0x152   :  { %2308 = vmatprep.subr.bf16.mxu0 %v2944_v18  ;;  %2340 = vmatprep.subr.bf16.mxu1 %v2946_v22 }
 0x207   :  { %v713_v42 = vpop.f32.mrb[2].mxu0  ;;  %v784_v44 = vpop.f32.mrb[2].mxu1 }
 0x208   :  { %v2653_v46 = vadd.f32 %v713_v42, %v3143_v28  ;;  %v715_v47 = vpop.f32.mrb[3].mxu0  ;;  %v786_v49 = vpop.f32.mrb[3].mxu1  ;;  %v2669_v58 = vadd.f32 %v784_v44, %v3148_v38 }
 0x209   :  { %v2654_v52 = vadd.f32 %v715_v47, %v3145_v32  ;;  %v2670_v63 = vadd.f32 %v786_v49, %v3152_v54  ;;  %v817_v44 = vpop.permute.xlu0 %816 }
 0x20a   :  { %v793_v53 = vmul.f32 0.5, %v2653_v46  ;;  %vm818_vm5 = vcmp.eq.s32.totalorder %v817_v44, 1 }
 0x20b   :  { %v797_v57 = vmul.f32 0.5, %v2654_v52  ;;  %v802_v2 = vmul.f32 0.5, %v2670_v63  ;;  %v639_v52 = vsel %vm638_vm4, %v3158_v34, 0.0 }
 0x20c   :  { %2735 = vtanh.f32 %v793_v53 }
 0x20d   :  { %2737 = vtanh.f32 %v797_v57 }
 0x20e   :  { %2739 = vtanh.f32 %v2669_v58 }
 0x20f   :  { %2741 = vtanh.f32 %v802_v2 }
 0x216   :  { %v2736_v5 = vpop.eup %2735 }
 0x217   :  { %v2738_v6 = vpop.eup %2737  ;;  %v795_v9 = vadd.f32 1.0, %v2736_v5 }
 0x218   :  { %v799_v14 = vadd.f32 1.0, %v2738_v6  ;;  %v2740_v16 = vpop.eup %2739 }
 0x219   :  { %v796_v15 = vmul.f32 0.5, %v795_v9  ;;  %v2742_v33 = vpop.eup %2741 }
 0x21a   :  { %v800_v19 = vmul.f32 0.5, %v799_v14  ;;  %v804_v42 = vadd.f32 1.0, %v2742_v33 }
 0x21b   :  { %v807_v24 = vmul.f32 %v2740_v16, %v796_v15 }
 0x21c   :  { %v806_v25 = vmul.f32 %v800_v19, %v3155_v20  ;;  %v805_v46 = vmul.f32 0.5, %v804_v42  ;;  %v1174_v20 = vsel %vm2049_vm6, 1, %v2857_v1 }
 0x21d   :  { %1176 = vperm.xlu1 %2724, %v1174_v20  }
 0x21e   :  { %v3203_v29 = vadd.f32 %v807_v24, %v806_v25 }
 0x220   :  { %2743 = vtanh.f32 %v3203_v29 }
 0x22a   :  { %v2744_v47 = vpop.eup %2743 }
 0x22b   :  { %v810_v49 = vmul.f32 %v2744_v47, %v805_v46 }
 0x22d   :  { %v3207_v53 = vsel %vm818_vm5, %v810_v49, %v639_v52  ;;  %892 = vmatmul.mubr.f32.vlgmr.msra.gmra.mrb[4].mxu0 %v810_v49  ;;  %963 = vmatmul.mubr.f32.vlgmr.msra.gmra.mrb[4].mxu1 %v810_v49 }
 0x22e   :  { %2310 = vmatpush1.bf16.msra.mxu0 %v2948_v23  ;;  %2342 = vmatpush1.bf16.msra.mxu1 %v2951_v26 }
 0x22f   :  { %2312 = vmatprep.subr.bf16.mxu0 %v2955_v30  ;;  %2344 = vmatprep.subr.bf16.mxu1 %v2962_v35 }
 0x230   :  { %1071 = vmatprep.mubr.f32.mxu0 %v2856_v0  ;;  %1142 = vmatprep.mubr.f32.mxu1 %v2856_v0 }
 0x232   :  { %2314 = vmatpush1.bf16.msra.mxu0 %v2964_v36  ;;  %2346 = vmatpush1.bf16.msra.mxu1 %v2968_v39 }
 0x233   :  { %2316 = vmatprep.subr.bf16.mxu0 %v2972_v43  ;;  %2348 = vmatprep.subr.bf16.mxu1 %v2979_v48 }
 0x236   :  { %2318 = vmatpush1.bf16.msra.mxu0 %v2983_v51  ;;  %2350 = vmatpush1.bf16.msra.mxu1 %v2987_v55 }
 0x237   :  { %2320 = vmatprep.subr.bf16.mxu0 %v2991_v59  ;;  %2352 = vmatprep.subr.bf16.mxu1 %v2995_v62 }
 0x23a   :  { %2322 = vmatpush1.bf16.msra.mxu0 %v3002_v4  ;;  %2354 = vmatpush1.bf16.msra.mxu1 %v3006_v7 }
 0x23b   :  { %2324 = vmatprep.subr.bf16.mxu0 %v3010_v10  ;;  %2356 = vmatprep.subr.bf16.mxu1 %v3014_v13 }
 0x23e   :  { %2326 = vmatpush1.bf16.msra.mxu0 %v3021_v17  ;;  %2358 = vmatpush1.bf16.msra.mxu1 %v3025_v21 }
 0x23f   :  { %2328 = vmatprep.subr.bf16.mxu0 %v3029_v27  ;;  %2360 = vmatprep.subr.bf16.mxu1 %v3033_v31 }
 0x242   :  { %2330 = vmatpush1.bf16.msra.mxu0 %v3040_v37  ;;  %2362 = vmatpush1.bf16.msra.mxu1 %v3044_v41 }
 0x243   :  { %2332 = vmatprep.subr.bf16.mxu0 %v3048_v45  ;;  %2364 = vmatprep.subr.bf16.mxu1 %v3055_v50 }
 0x246   :  { %2334 = vmatpush1.bf16.msra.mxu0 %v3062_v56  ;;  %2366 = vmatpush1.bf16.msra.mxu1 %v3068_v61 }
 0x247   :  { %2336 = vmatprep.subr.bf16.mxu0 %v3072_v3  ;;  %2368 = vmatprep.subr.bf16.mxu1 %v3076_v8 }
 0x24a   :  { %2338 = vmatpush1.bf16.msra.mxu0 %v3083_v11  ;;  %2370 = vmatpush1.bf16.msra.mxu1 %v3088_v12 }
 0x24b   :  { %2372 = vmatprep.subr.bf16.mxu0 %v2944_v18  ;;  %2404 = vmatprep.subr.bf16.mxu1 %v2946_v22 }
 0x300   :  { %v893_v34 = vpop.f32.mrb[4].mxu0  ;;  %v964_v57 = vpop.f32.mrb[4].mxu1 }
 0x301   :  { %v2655_v58 = vadd.f32 %v893_v34, %v3143_v28  ;;  %v895_v63 = vpop.f32.mrb[5].mxu0  ;;  %v966_v2 = vpop.f32.mrb[5].mxu1  ;;  %v2671_v14 = vadd.f32 %v964_v57, %v3148_v38 }
 0x302   :  { %v2656_v5 = vadd.f32 %v895_v63, %v3145_v32  ;;  %v2672_v15 = vadd.f32 %v966_v2, %v3152_v54  ;;  %v997_v34 = vpop.permute.xlu1 %996 }
 0x303   :  { %v973_v6 = vmul.f32 0.5, %v2655_v58  ;;  %vm998_vm7 = vcmp.eq.s32.totalorder %v997_v34, 1 }
 0x304   :  { %v977_v9 = vmul.f32 0.5, %v2656_v5  ;;  %v982_v16 = vmul.f32 0.5, %v2672_v15 }
 0x305   :  { %2745 = vtanh.f32 %v973_v6 }
 0x306   :  { %2747 = vtanh.f32 %v977_v9 }
 0x307   :  { %2749 = vtanh.f32 %v2671_v14 }
 0x308   :  { %2751 = vtanh.f32 %v982_v16 }
 0x30f   :  { %v2746_v19 = vpop.eup %2745 }
 0x310   :  { %v2748_v24 = vpop.eup %2747  ;;  %v975_v25 = vadd.f32 1.0, %v2746_v19 }
 0x311   :  { %v979_v33 = vadd.f32 1.0, %v2748_v24  ;;  %v2750_v42 = vpop.eup %2749 }
 0x312   :  { %v976_v40 = vmul.f32 0.5, %v975_v25  ;;  %v2752_v52 = vpop.eup %2751 }
 0x313   :  { %v980_v44 = vmul.f32 0.5, %v979_v33  ;;  %v984_v20 = vadd.f32 1.0, %v2752_v52 }
 0x314   :  { %v987_v46 = vmul.f32 %v2750_v42, %v976_v40 }
 0x315   :  { %v986_v47 = vmul.f32 %v980_v44, %v3203_v29  ;;  %v985_v57 = vmul.f32 0.5, %v984_v20  ;;  %v1354_v29 = vsel %vm2050_vm8, 1, %v2857_v1 }
 0x316   :  { %1356 = vperm.xlu0 %2723, %v1354_v29  }
 0x317   :  { %v3250_v49 = vadd.f32 %v987_v46, %v986_v47 }
 0x319   :  { %2753 = vtanh.f32 %v3250_v49 }
 0x323   :  { %v2754_v58 = vpop.eup %2753 }
 0x324   :  { %v990_v63 = vmul.f32 %v2754_v58, %v985_v57 }
 0x326   :  { %v3254_v2 = vsel %vm998_vm7, %v990_v63, %v3207_v53  ;;  %1072 = vmatmul.mubr.f32.vlgmr.msra.gmra.mrb[6].mxu0 %v990_v63  ;;  %1143 = vmatmul.mubr.f32.vlgmr.msra.gmra.mrb[6].mxu1 %v990_v63 }
 0x327   :  { %2374 = vmatpush1.bf16.msra.mxu0 %v2948_v23  ;;  %2406 = vmatpush1.bf16.msra.mxu1 %v2951_v26 }
 0x328   :  { %2376 = vmatprep.subr.bf16.mxu0 %v2955_v30  ;;  %2408 = vmatprep.subr.bf16.mxu1 %v2962_v35 }
 0x329   :  { %1251 = vmatprep.mubr.f32.mxu0 %v2856_v0  ;;  %1322 = vmatprep.mubr.f32.mxu1 %v2856_v0 }
 0x32b   :  { %2378 = vmatpush1.bf16.msra.mxu0 %v2964_v36  ;;  %2410 = vmatpush1.bf16.msra.mxu1 %v2968_v39 }
 0x32c   :  { %2380 = vmatprep.subr.bf16.mxu0 %v2972_v43  ;;  %2412 = vmatprep.subr.bf16.mxu1 %v2979_v48 }
 0x32f   :  { %2382 = vmatpush1.bf16.msra.mxu0 %v2983_v51  ;;  %2414 = vmatpush1.bf16.msra.mxu1 %v2987_v55 }
 0x330   :  { %2384 = vmatprep.subr.bf16.mxu0 %v2991_v59  ;;  %2416 = vmatprep.subr.bf16.mxu1 %v2995_v62 }
 0x333   :  { %2386 = vmatpush1.bf16.msra.mxu0 %v3002_v4  ;;  %2418 = vmatpush1.bf16.msra.mxu1 %v3006_v7 }
 0x334   :  { %2388 = vmatprep.subr.bf16.mxu0 %v3010_v10  ;;  %2420 = vmatprep.subr.bf16.mxu1 %v3014_v13 }
 0x337   :  { %2390 = vmatpush1.bf16.msra.mxu0 %v3021_v17  ;;  %2422 = vmatpush1.bf16.msra.mxu1 %v3025_v21 }
 0x338   :  { %2392 = vmatprep.subr.bf16.mxu0 %v3029_v27  ;;  %2424 = vmatprep.subr.bf16.mxu1 %v3033_v31 }
 0x33b   :  { %2394 = vmatpush1.bf16.msra.mxu0 %v3040_v37  ;;  %2426 = vmatpush1.bf16.msra.mxu1 %v3044_v41 }
 0x33c   :  { %2396 = vmatprep.subr.bf16.mxu0 %v3048_v45  ;;  %2428 = vmatprep.subr.bf16.mxu1 %v3055_v50 }
 0x33f   :  { %2398 = vmatpush1.bf16.msra.mxu0 %v3062_v56  ;;  %2430 = vmatpush1.bf16.msra.mxu1 %v3068_v61 }
 0x340   :  { %2400 = vmatprep.subr.bf16.mxu0 %v3072_v3  ;;  %2432 = vmatprep.subr.bf16.mxu1 %v3076_v8 }
 0x343   :  { %2402 = vmatpush1.bf16.msra.mxu0 %v3083_v11  ;;  %2434 = vmatpush1.bf16.msra.mxu1 %v3088_v12 }
 0x344   :  { %2436 = vmatprep.subr.bf16.mxu0 %v2944_v18  ;;  %2468 = vmatprep.subr.bf16.mxu1 %v2946_v22 }
 0x3f9   :  { %v1073_v53 = vpop.f32.mrb[6].mxu0  ;;  %v1144_v5 = vpop.f32.mrb[6].mxu1 }
 0x3fa   :  { %v2657_v6 = vadd.f32 %v1073_v53, %v3143_v28  ;;  %v1075_v9 = vpop.f32.mrb[7].mxu0  ;;  %v1146_v14 = vpop.f32.mrb[7].mxu1  ;;  %v2673_v24 = vadd.f32 %v1144_v5, %v3148_v38 }
 0x3fb   :  { %v2658_v15 = vadd.f32 %v1075_v9, %v3145_v32  ;;  %v2674_v25 = vadd.f32 %v1146_v14, %v3152_v54  ;;  %v1177_v53 = vpop.permute.xlu1 %1176 }
 0x3fc   :  { %v1153_v16 = vmul.f32 0.5, %v2657_v6  ;;  %vm1178_vm9 = vcmp.eq.s32.totalorder %v1177_v53, 1 }
 0x3fd   :  { %v1157_v19 = vmul.f32 0.5, %v2658_v15  ;;  %v1162_v33 = vmul.f32 0.5, %v2674_v25 }
 0x3fe   :  { %2755 = vtanh.f32 %v1153_v16 }
 0x3ff   :  { %2757 = vtanh.f32 %v1157_v19 }
 0x400   :  { %2759 = vtanh.f32 %v2673_v24 }
 0x401   :  { %2761 = vtanh.f32 %v1162_v33 }
 0x408   :  { %v2756_v40 = vpop.eup %2755 }
 0x409   :  { %v2758_v42 = vpop.eup %2757  ;;  %v1155_v44 = vadd.f32 1.0, %v2756_v40 }
 0x40a   :  { %v1159_v46 = vadd.f32 1.0, %v2758_v42  ;;  %v2760_v52 = vpop.eup %2759 }
 0x40b   :  { %v1156_v47 = vmul.f32 0.5, %v1155_v44  ;;  %v2762_v63 = vpop.eup %2761 }
 0x40c   :  { %v1160_v20 = vmul.f32 0.5, %v1159_v46  ;;  %v1164_v29 = vadd.f32 1.0, %v2762_v63 }
 0x40d   :  { %v1167_v34 = vmul.f32 %v2760_v52, %v1156_v47 }
 0x40e   :  { %v1166_v57 = vmul.f32 %v1160_v20, %v3250_v49  ;;  %v1165_v5 = vmul.f32 0.5, %v1164_v29  ;;  %v1534_v49 = vsel %vm2051_vm10, 1, %v2857_v1 }
 0x40f   :  { %1536 = vperm.xlu1 %2724, %v1534_v49  }
 0x410   :  { %v3297_v58 = vadd.f32 %v1167_v34, %v1166_v57 }
 0x412   :  { %2763 = vtanh.f32 %v3297_v58 }
 0x41c   :  { %v2764_v6 = vpop.eup %2763 }
 0x41d   :  { %v1170_v9 = vmul.f32 %v2764_v6, %v1165_v5 }
 0x41f   :  { %v3301_v14 = vsel %vm1178_vm9, %v1170_v9, %v3254_v2  ;;  %1252 = vmatmul.mubr.f32.vlgmr.msra.gmra.mrb[8].mxu0 %v1170_v9  ;;  %1323 = vmatmul.mubr.f32.vlgmr.msra.gmra.mrb[8].mxu1 %v1170_v9 }
 0x420   :  { %2438 = vmatpush1.bf16.msra.mxu0 %v2948_v23  ;;  %2470 = vmatpush1.bf16.msra.mxu1 %v2951_v26 }
 0x421   :  { %2440 = vmatprep.subr.bf16.mxu0 %v2955_v30  ;;  %2472 = vmatprep.subr.bf16.mxu1 %v2962_v35 }
 0x422   :  { %1431 = vmatprep.mubr.f32.mxu0 %v2856_v0  ;;  %1502 = vmatprep.mubr.f32.mxu1 %v2856_v0 }
 0x424   :  { %2442 = vmatpush1.bf16.msra.mxu0 %v2964_v36  ;;  %2474 = vmatpush1.bf16.msra.mxu1 %v2968_v39 }
 0x425   :  { %2444 = vmatprep.subr.bf16.mxu0 %v2972_v43  ;;  %2476 = vmatprep.subr.bf16.mxu1 %v2979_v48 }
 0x428   :  { %2446 = vmatpush1.bf16.msra.mxu0 %v2983_v51  ;;  %2478 = vmatpush1.bf16.msra.mxu1 %v2987_v55 }
 0x429   :  { %2448 = vmatprep.subr.bf16.mxu0 %v2991_v59  ;;  %2480 = vmatprep.subr.bf16.mxu1 %v2995_v62 }
 0x42c   :  { %2450 = vmatpush1.bf16.msra.mxu0 %v3002_v4  ;;  %2482 = vmatpush1.bf16.msra.mxu1 %v3006_v7 }
 0x42d   :  { %2452 = vmatprep.subr.bf16.mxu0 %v3010_v10  ;;  %2484 = vmatprep.subr.bf16.mxu1 %v3014_v13 }
 0x430   :  { %2454 = vmatpush1.bf16.msra.mxu0 %v3021_v17  ;;  %2486 = vmatpush1.bf16.msra.mxu1 %v3025_v21 }
 0x431   :  { %2456 = vmatprep.subr.bf16.mxu0 %v3029_v27  ;;  %2488 = vmatprep.subr.bf16.mxu1 %v3033_v31 }
 0x434   :  { %2458 = vmatpush1.bf16.msra.mxu0 %v3040_v37  ;;  %2490 = vmatpush1.bf16.msra.mxu1 %v3044_v41 }
 0x435   :  { %2460 = vmatprep.subr.bf16.mxu0 %v3048_v45  ;;  %2492 = vmatprep.subr.bf16.mxu1 %v3055_v50 }
 0x438   :  { %2462 = vmatpush1.bf16.msra.mxu0 %v3062_v56  ;;  %2494 = vmatpush1.bf16.msra.mxu1 %v3068_v61 }
 0x439   :  { %2464 = vmatprep.subr.bf16.mxu0 %v3072_v3  ;;  %2496 = vmatprep.subr.bf16.mxu1 %v3076_v8 }
 0x43c   :  { %2466 = vmatpush1.bf16.msra.mxu0 %v3083_v11  ;;  %2498 = vmatpush1.bf16.msra.mxu1 %v3088_v12 }
 0x43d   :  { %2500 = vmatprep.subr.bf16.mxu0 %v2944_v18  ;;  %2532 = vmatprep.subr.bf16.mxu1 %v2946_v22 }
 0x4f2   :  { %v1253_v2 = vpop.f32.mrb[8].mxu0  ;;  %v1324_v15 = vpop.f32.mrb[8].mxu1 }
 0x4f3   :  { %v2659_v16 = vadd.f32 %v1253_v2, %v3143_v28  ;;  %v1255_v19 = vpop.f32.mrb[9].mxu0  ;;  %v1326_v24 = vpop.f32.mrb[9].mxu1  ;;  %v2675_v42 = vadd.f32 %v1324_v15, %v3148_v38 }
 0x4f4   :  { %v2660_v25 = vadd.f32 %v1255_v19, %v3145_v32  ;;  %v2676_v44 = vadd.f32 %v1326_v24, %v3152_v54  ;;  %v1357_v2 = vpop.permute.xlu0 %1356 }
 0x4f5   :  { %v1333_v33 = vmul.f32 0.5, %v2659_v16  ;;  %vm1358_vm11 = vcmp.eq.s32.totalorder %v1357_v2, 1 }
 0x4f6   :  { %v1337_v40 = vmul.f32 0.5, %v2660_v25  ;;  %v1342_v46 = vmul.f32 0.5, %v2676_v44 }
 0x4f7   :  { %2765 = vtanh.f32 %v1333_v33 }
 0x4f8   :  { %2767 = vtanh.f32 %v1337_v40 }
 0x4f9   :  { %2769 = vtanh.f32 %v2675_v42 }
 0x4fa   :  { %2771 = vtanh.f32 %v1342_v46 }
 0x501   :  { %v2766_v47 = vpop.eup %2765 }
 0x502   :  { %v2768_v52 = vpop.eup %2767  ;;  %v1335_v20 = vadd.f32 1.0, %v2766_v47 }
 0x503   :  { %v1339_v34 = vadd.f32 1.0, %v2768_v52  ;;  %v2770_v63 = vpop.eup %2769 }
 0x504   :  { %v1336_v57 = vmul.f32 0.5, %v1335_v20  ;;  %v2772_v9 = vpop.eup %2771 }
 0x505   :  { %v1340_v29 = vmul.f32 0.5, %v1339_v34  ;;  %v1344_v49 = vadd.f32 1.0, %v2772_v9 }
 0x506   :  { %v1347_v53 = vmul.f32 %v2770_v63, %v1336_v57 }
 0x507   :  { %v1346_v5 = vmul.f32 %v1340_v29, %v3297_v58  ;;  %v1345_v15 = vmul.f32 0.5, %v1344_v49  ;;  %v1714_v58 = vsel %vm2052_vm12, 1, %v2857_v1 }
 0x508   :  { %1716 = vperm.xlu0 %2723, %v1714_v58  }
 0x509   :  { %v3344_v6 = vadd.f32 %v1347_v53, %v1346_v5 }
 0x50b   :  { %2773 = vtanh.f32 %v3344_v6 }
 0x515   :  { %v2774_v16 = vpop.eup %2773 }
 0x516   :  { %v1350_v19 = vmul.f32 %v2774_v16, %v1345_v15 }
 0x518   :  { %v3348_v24 = vsel %vm1358_vm11, %v1350_v19, %v3301_v14  ;;  %1432 = vmatmul.mubr.f32.vlgmr.msra.gmra.mrb[10].mxu0 %v1350_v19  ;;  %1503 = vmatmul.mubr.f32.vlgmr.msra.gmra.mrb[10].mxu1 %v1350_v19  ;;  %v1537_v19 = vpop.permute.xlu1 %1536 }
 0x519   :  { %2502 = vmatpush1.bf16.msra.mxu0 %v2948_v23  ;;  %2534 = vmatpush1.bf16.msra.mxu1 %v2951_v26  ;;  %vm1538_vm13 = vcmp.eq.s32.totalorder %v1537_v19, 1 }
 0x51a   :  { %2504 = vmatprep.subr.bf16.mxu0 %v2955_v30  ;;  %2536 = vmatprep.subr.bf16.mxu1 %v2962_v35 }
 0x51b   :  { %1611 = vmatprep.mubr.f32.mxu0 %v2856_v0  ;;  %1682 = vmatprep.mubr.f32.mxu1 %v2856_v0 }
 0x51d   :  { %2506 = vmatpush1.bf16.msra.mxu0 %v2964_v36  ;;  %2538 = vmatpush1.bf16.msra.mxu1 %v2968_v39 }
 0x51e   :  { %2508 = vmatprep.subr.bf16.mxu0 %v2972_v43  ;;  %2540 = vmatprep.subr.bf16.mxu1 %v2979_v48 }
 0x521   :  { %2510 = vmatpush1.bf16.msra.mxu0 %v2983_v51  ;;  %2542 = vmatpush1.bf16.msra.mxu1 %v2987_v55 }
 0x522   :  { %2512 = vmatprep.subr.bf16.mxu0 %v2991_v59  ;;  %2544 = vmatprep.subr.bf16.mxu1 %v2995_v62 }
 0x525   :  { %2514 = vmatpush1.bf16.msra.mxu0 %v3002_v4  ;;  %2546 = vmatpush1.bf16.msra.mxu1 %v3006_v7 }
 0x526   :  { %2516 = vmatprep.subr.bf16.mxu0 %v3010_v10  ;;  %2548 = vmatprep.subr.bf16.mxu1 %v3014_v13 }
 0x529   :  { %2518 = vmatpush1.bf16.msra.mxu0 %v3021_v17  ;;  %2550 = vmatpush1.bf16.msra.mxu1 %v3025_v21 }
 0x52a   :  { %2520 = vmatprep.subr.bf16.mxu0 %v3029_v27  ;;  %2552 = vmatprep.subr.bf16.mxu1 %v3033_v31 }
 0x52d   :  { %2522 = vmatpush1.bf16.msra.mxu0 %v3040_v37  ;;  %2554 = vmatpush1.bf16.msra.mxu1 %v3044_v41 }
 0x52e   :  { %2524 = vmatprep.subr.bf16.mxu0 %v3048_v45  ;;  %2556 = vmatprep.subr.bf16.mxu1 %v3055_v50 }
 0x531   :  { %2526 = vmatpush1.bf16.msra.mxu0 %v3062_v56  ;;  %2558 = vmatpush1.bf16.msra.mxu1 %v3068_v61 }
 0x532   :  { %2528 = vmatprep.subr.bf16.mxu0 %v3072_v3  ;;  %2560 = vmatprep.subr.bf16.mxu1 %v3076_v8 }
 0x535   :  { %2530 = vmatpush1.bf16.msra.mxu0 %v3083_v11  ;;  %2562 = vmatpush1.bf16.msra.mxu1 %v3088_v12 }
 0x536   :  { %2564 = vmatprep.subr.bf16.mxu0 %v2944_v18  ;;  %2596 = vmatprep.subr.bf16.mxu1 %v2946_v22 }
 0x5eb   :  { %v1433_v14 = vpop.f32.mrb[10].mxu0  ;;  %v1504_v25 = vpop.f32.mrb[10].mxu1 }
 0x5ec   :  { %v2661_v33 = vadd.f32 %v1433_v14, %v3143_v28  ;;  %v1435_v40 = vpop.f32.mrb[11].mxu0  ;;  %v1506_v42 = vpop.f32.mrb[11].mxu1  ;;  %v2677_v18 = vadd.f32 %v1504_v25, %v3148_v38 }
 0x5ed   :  { %v2662_v44 = vadd.f32 %v1435_v40, %v3145_v32  ;;  %v2678_v22 = vadd.f32 %v1506_v42, %v3152_v54  ;;  %v1909_v40 = vld [vmem:[%s3517_s5 + $0x18] sm:$0xff] }
 0x5ee   :  { %v1513_v46 = vmul.f32 0.5, %v2661_v33 }
 0x5ef   :  { %v1517_v47 = vmul.f32 0.5, %v2662_v44  ;;  %v1522_v52 = vmul.f32 0.5, %v2678_v22  ;;  %v1910_v44 = vld [vmem:[%s3517_s5 + $0x20] sm:$0xff]  ;;  %v1913_v22 = vld [vmem:[%s3517_s5 + $0x38] sm:$0xff] }
 0x5f0   :  { %2775 = vtanh.f32 %v1513_v46  ;;  %v1911_v46 = vld [vmem:[%s3517_s5 + $0x28] sm:$0xff] }
 0x5f1   :  { %2777 = vtanh.f32 %v1517_v47  ;;  %v2634_v47 = vpack.c.bf16 %v1911_v46, %v1910_v44 }
 0x5f2   :  { %2779 = vtanh.f32 %v2677_v18  ;;  %v1912_v18 = vld [vmem:[%s3517_s5 + $0x30] sm:$0xff] }
 0x5f3   :  { %2781 = vtanh.f32 %v1522_v52  ;;  %v2637_v52 = vpack.c.bf16 %v1913_v22, %v1912_v18 }
 0x5fa   :  { %v2776_v20 = vpop.eup %2775 }
 0x5fb   :  { %v2778_v34 = vpop.eup %2777  ;;  %v1515_v57 = vadd.f32 1.0, %v2776_v20  ;;  %v1914_v20 = vld [vmem:[%s3517_s5 + $0x40] sm:$0xff] }
 0x5fc   :  { %v1519_v63 = vadd.f32 1.0, %v2778_v34  ;;  %v2780_v53 = vpop.eup %2779  ;;  %v1915_v34 = vld [vmem:[%s3517_s5 + $0x48] sm:$0xff] }
 0x5fd   :  { %v1516_v29 = vmul.f32 0.5, %v1515_v57  ;;  %v2782_v15 = vpop.eup %2781  ;;  %v2640_v57 = vpack.c.bf16 %v1915_v34, %v1914_v20 }
 0x5fe   :  { %v1520_v5 = vmul.f32 0.5, %v1519_v63  ;;  %v1524_v16 = vadd.f32 1.0, %v2782_v15  ;;  %v1916_v63 = vld [vmem:[%s3517_s5 + $0x50] sm:$0xff]  ;;  %v1921_v15 = vld [vmem:[%s3517_s5 + $0x78] sm:$0xff] }
 0x5ff   :  { %v1527_v9 = vmul.f32 %v2780_v53, %v1516_v29  ;;  %v1917_v29 = vld [vmem:[%s3517_s5 + $0x58] sm:$0xff] }
 0x600   :  { %v1526_v49 = vmul.f32 %v1520_v5, %v3344_v6  ;;  %v1525_v58 = vmul.f32 0.5, %v1524_v16  ;;  %v2858_v6 = vmov 0.0|0.0   ;;  %v2643_v53 = vpack.c.bf16 %v1917_v29, %v1916_v63  ;;  %v1918_v5 = vld [vmem:[%s3517_s5 + $0x60] sm:$0xff] }
 0x602   :  { %v3391_v2 = vadd.f32 %v1527_v9, %v1526_v49  ;;  %v1919_v9 = vld [vmem:[%s3517_s5 + $0x68] sm:$0xff] }
 0x603   :  { %v2646_v49 = vpack.c.bf16 %v1919_v9, %v1918_v5 }
 0x604   :  { %2783 = vtanh.f32 %v3391_v2 }
 0x60e   :  { %v2784_v14 = vpop.eup %2783 }
 0x60f   :  { %v1530_v25 = vmul.f32 %v2784_v14, %v1525_v58 }
 0x611   :  { %v3395_v33 = vsel %vm1538_vm13, %v1530_v25, %v3348_v24  ;;  %1612 = vmatmul.mubr.f32.vlgmr.msra.gmra.mrb[12].mxu0 %v1530_v25  ;;  %1683 = vmatmul.mubr.f32.vlgmr.msra.gmra.mrb[12].mxu1 %v1530_v25  ;;  %v1908_v24 = vld [vmem:[%s3517_s5 + $0x10] sm:$0xff] }
 0x612   :  { %2566 = vmatpush1.bf16.msra.mxu0 %v2948_v23  ;;  %2598 = vmatpush1.bf16.msra.mxu1 %v2951_v26  ;;  %v1894_v23 = vsel %vm2053_vm14, 1, %v2857_v1  ;;  %v2631_v42 = vpack.c.bf16 %v1909_v40, %v1908_v24 }
 0x613   :  { %2568 = vmatprep.subr.bf16.mxu0 %v2955_v30  ;;  %2600 = vmatprep.subr.bf16.mxu1 %v2962_v35 }
 0x614   :  { %1791 = vmatprep.mubr.f32.mxu0 %v2856_v0  ;;  %1862 = vmatprep.mubr.f32.mxu1 %v2856_v0 }
 0x615   :  { %1896 = vperm.xlu1 %2724, %v1894_v23  }
 0x616   :  { %2570 = vmatpush1.bf16.msra.mxu0 %v2964_v36  ;;  %2602 = vmatpush1.bf16.msra.mxu1 %v2968_v39 }
 0x617   :  { %2572 = vmatprep.subr.bf16.mxu0 %v2972_v43  ;;  %2604 = vmatprep.subr.bf16.mxu1 %v2979_v48 }
 0x61a   :  { %2574 = vmatpush1.bf16.msra.mxu0 %v2983_v51  ;;  %2606 = vmatpush1.bf16.msra.mxu1 %v2987_v55 }
 0x61b   :  { %2576 = vmatprep.subr.bf16.mxu0 %v2991_v59  ;;  %2608 = vmatprep.subr.bf16.mxu1 %v2995_v62 }
 0x61e   :  { %2578 = vmatpush1.bf16.msra.mxu0 %v3002_v4  ;;  %2610 = vmatpush1.bf16.msra.mxu1 %v3006_v7 }
 0x61f   :  { %2580 = vmatprep.subr.bf16.mxu0 %v3010_v10  ;;  %2612 = vmatprep.subr.bf16.mxu1 %v3014_v13 }
 0x622   :  { %2582 = vmatpush1.bf16.msra.mxu0 %v3021_v17  ;;  %2614 = vmatpush1.bf16.msra.mxu1 %v3025_v21 }
 0x623   :  { %2584 = vmatprep.subr.bf16.mxu0 %v3029_v27  ;;  %2616 = vmatprep.subr.bf16.mxu1 %v3033_v31 }
 0x626   :  { %2586 = vmatpush1.bf16.msra.mxu0 %v3040_v37  ;;  %2618 = vmatpush1.bf16.msra.mxu1 %v3044_v41 }
 0x627   :  { %2588 = vmatprep.subr.bf16.mxu0 %v3048_v45  ;;  %2620 = vmatprep.subr.bf16.mxu1 %v3055_v50  ;;  %v1717_v50 = vpop.permute.xlu0 %1716 }
 0x628   :  { %vm1718_vm15 = vcmp.eq.s32.totalorder %v1717_v50, 1 }
 0x62a   :  { %2590 = vmatpush1.bf16.msra.mxu0 %v3062_v56  ;;  %2622 = vmatpush1.bf16.msra.mxu1 %v3068_v61 }
 0x62b   :  { %2592 = vmatprep.subr.bf16.mxu0 %v3072_v3  ;;  %2624 = vmatprep.subr.bf16.mxu1 %v3076_v8  ;;  %v1906_v8 = vld [vmem:[%s3517_s5] sm:$0xff] }
 0x62e   :  { %2594 = vmatpush1.bf16.msra.mxu0 %v3083_v11  ;;  %2626 = vmatpush1.bf16.msra.mxu1 %v3088_v12  ;;  %v1907_v11 = vld [vmem:[%s3517_s5 + $0x8] sm:$0xff] }
 0x62f   :  { %v2628_v12 = vpack.c.bf16 %v1907_v11, %v1906_v8  ;;  %2627 = vmatprep.subr.bf16.mxu0 %v2858_v6 }
 0x6e4   :  { %v1613_v26 = vpop.f32.mrb[12].mxu0  ;;  %v1684_v30 = vpop.f32.mrb[12].mxu1 }
 0x6e5   :  { %v2663_v35 = vadd.f32 %v1613_v26, %v3143_v28  ;;  %v1615_v36 = vpop.f32.mrb[13].mxu0  ;;  %v1686_v39 = vpop.f32.mrb[13].mxu1  ;;  %v2679_v55 = vadd.f32 %v1684_v30, %v3148_v38 }
 0x6e6   :  { %v2664_v43 = vadd.f32 %v1615_v36, %v3145_v32  ;;  %v2680_v59 = vadd.f32 %v1686_v39, %v3152_v54 }
 0x6e7   :  { %v1693_v48 = vmul.f32 0.5, %v2663_v35 }
 0x6e8   :  { %v1697_v51 = vmul.f32 0.5, %v2664_v43  ;;  %v1702_v62 = vmul.f32 0.5, %v2680_v59 }
 0x6e9   :  { %2785 = vtanh.f32 %v1693_v48 }
 0x6ea   :  { %2787 = vtanh.f32 %v1697_v51 }
 0x6eb   :  { %2789 = vtanh.f32 %v2679_v55 }
 0x6ec   :  { %2791 = vtanh.f32 %v1702_v62 }
 0x6f3   :  { %v2786_v1 = vpop.eup %2785 }
 0x6f4   :  { %v2788_v4 = vpop.eup %2787  ;;  %v1695_v7 = vadd.f32 1.0, %v2786_v1 }
 0x6f5   :  { %v1699_v10 = vadd.f32 1.0, %v2788_v4  ;;  %v2790_v17 = vpop.eup %2789 }
 0x6f6   :  { %v1696_v13 = vmul.f32 0.5, %v1695_v7  ;;  %v2792_v41 = vpop.eup %2791 }
 0x6f7   :  { %v1700_v21 = vmul.f32 0.5, %v1699_v10  ;;  %v1704_v45 = vadd.f32 1.0, %v2792_v41  ;;  %v1897_v10 = vpop.permute.xlu1 %1896 }
 0x6f8   :  { %v1707_v27 = vmul.f32 %v2790_v17, %v1696_v13  ;;  %vm1898_vm1 = vcmp.eq.s32.totalorder %v1897_v10, 1 }
 0x6f9   :  { %v1706_v31 = vmul.f32 %v1700_v21, %v3391_v2  ;;  %v1705_v56 = vmul.f32 0.5, %v1704_v45  ;;  %v1920_v2 = vld [vmem:[%s3517_s5 + $0x70] sm:$0xff]  ;;  %v2054_v21 = vld [vmem:[%s3518_s6] ss:$0 sm:$0xff] }
 0x6fa   :  { %v2649_v16 = vpack.c.bf16 %v1921_v15, %v1920_v2 }
 0x6fb   :  { %v3436_v37 = vadd.f32 %v1707_v27, %v1706_v31 }
 0x6fd   :  { %2793 = vtanh.f32 %v3436_v37 }
 0x707   :  { %v2794_v60 = vpop.eup %2793 }
 0x708   :  { %v1710_v61 = vmul.f32 %v2794_v60, %v1705_v56 }
 0x70a   :  { %v3440_v3 = vsel %vm1718_vm15, %v1710_v61, %v3395_v33  ;;  %1792 = vmatmul.mubr.f32.vlgmr.msra.gmra.mrb[14].mxu0 %v1710_v61  ;;  %1863 = vmatmul.mubr.f32.vlgmr.msra.gmra.mrb[14].mxu1 %v1710_v61 }
 0x70b   :  { %2629 = vmatpush3.bf16.msra.mxu0 %v2628_v12  ;;  %2104 = vmatprep.mubr.msk.f32.mxu0 %vm2859_vm0, %v2856_v0 }
 0x70c   :  { %2630 = vmatprep.subr.bf16.mxu0 %v2858_v6 }
 0x70f   :  { %2632 = vmatpush3.bf16.msra.mxu0 %v2631_v42 }
 0x710   :  { %2633 = vmatprep.subr.bf16.mxu0 %v2858_v6 }
 0x713   :  { %2635 = vmatpush3.bf16.msra.mxu0 %v2634_v47 }
 0x714   :  { %2636 = vmatprep.subr.bf16.mxu0 %v2858_v6 }
 0x717   :  { %2638 = vmatpush3.bf16.msra.mxu0 %v2637_v52 }
 0x718   :  { %2639 = vmatprep.subr.bf16.mxu0 %v2858_v6 }
 0x71b   :  { %2641 = vmatpush3.bf16.msra.mxu0 %v2640_v57 }
 0x71c   :  { %2642 = vmatprep.subr.bf16.mxu0 %v2858_v6 }
 0x71f   :  { %2644 = vmatpush3.bf16.msra.mxu0 %v2643_v53 }
 0x720   :  { %2645 = vmatprep.subr.bf16.mxu0 %v2858_v6 }
 0x723   :  { %2647 = vmatpush3.bf16.msra.mxu0 %v2646_v49 }
 0x724   :  { %2648 = vmatprep.subr.bf16.mxu0 %v2858_v6 }
 0x727   :  { %2650 = vmatpush3.bf16.msra.mxu0 %v2649_v16 }
 0x7dd   :  { %v1793_v19 = vpop.f32.mrb[14].mxu0  ;;  %v1864_v58 = vpop.f32.mrb[14].mxu1 }
 0x7de   :  { %v2665_v14 = vadd.f32 %v1793_v19, %v3143_v28  ;;  %v1795_v25 = vpop.f32.mrb[15].mxu0  ;;  %v1866_v33 = vpop.f32.mrb[15].mxu1  ;;  %v2681_v35 = vadd.f32 %v1864_v58, %v3148_v38 }
 0x7df   :  { %v2666_v23 = vadd.f32 %v1795_v25, %v3145_v32  ;;  %v2682_v36 = vadd.f32 %v1866_v33, %v3152_v54 }
 0x7e0   :  { %v1873_v26 = vmul.f32 0.5, %v2665_v14 }
 0x7e1   :  { %v1877_v30 = vmul.f32 0.5, %v2666_v23  ;;  %v1882_v39 = vmul.f32 0.5, %v2682_v36 }
 0x7e2   :  { %2795 = vtanh.f32 %v1873_v26 }
 0x7e3   :  { %2797 = vtanh.f32 %v1877_v30 }
 0x7e4   :  { %2799 = vtanh.f32 %v2681_v35 }
 0x7e5   :  { %2801 = vtanh.f32 %v1882_v39 }
 0x7ec   :  { %v2796_v43 = vpop.eup %2795 }
 0x7ed   :  { %v2798_v0 = vpop.eup %2797  ;;  %v1875_v48 = vadd.f32 1.0, %v2796_v43 }
 0x7ee   :  { %v1879_v51 = vadd.f32 1.0, %v2798_v0  ;;  %v2800_v55 = vpop.eup %2799 }
 0x7ef   :  { %v1876_v28 = vmul.f32 0.5, %v1875_v48  ;;  %v2802_v4 = vpop.eup %2801 }
 0x7f0   :  { %v1880_v59 = vmul.f32 0.5, %v1879_v51  ;;  %v1884_v38 = vadd.f32 1.0, %v2802_v4 }
 0x7f1   :  { %v1887_v62 = vmul.f32 %v2800_v55, %v1876_v28 }
 0x7f2   :  { %v1886_v32 = vmul.f32 %v1880_v59, %v3436_v37  ;;  %v1885_v7 = vmul.f32 0.5, %v1884_v38 }
 0x7f4   :  { %v1888_v1 = vadd.f32 %v1887_v62, %v1886_v32 }
 0x7f6   :  { %2803 = vtanh.f32 %v1888_v1 }
 0x800   :  { %v2804_v13 = vpop.eup %2803 }
 0x801   :  { %v1890_v54 = vmul.f32 %v2804_v13, %v1885_v7 }
 0x803   :  { %v1899_v17 = vsel %vm1898_vm1, %v1890_v54, %v3440_v3 }
 0x804   :  { %2105 = vmatmul.mubr.f32.vlgmr.msra.gmra.mrb[16].mxu0 %v1899_v17 }
 0x8d7   :  { %v1995_v27 = vpop.f32.mrb[16].mxu0 }
 0x8d8   :  { %v1996_v31 = vadd.f32 %v2054_v21, %v1995_v27  ;;  %v2106_v37 = vpop.f32.mrb[17].mxu0 }
 0x8da   :  { %2000 = vst.msk [vmem:[#allocation9] sm:$0xff] %vm1999_vm2, %v1996_v31 }
 0x8db   :  { %2838 = shalt.err (!%p2835_p12)
}
 0x8dc   :  { %s2839_s2 = scalar_lea.hbm %s3519_s7, 128 }
 0x8dd   :  { %p2840_p13 = scmp.ne.s32.totalorder %s3519_s7, %s2839_s2  ;;  %p2843_p0 = scmp.lt.u32.totalorder %s2839_s2, %s3519_s7 }
 0x8df   :  { %p2845_p1 = pnand %p2843_p0, %p2840_p13 }
 0x8e1   :  { %2848 = shalt.err (!%p2845_p1)
}
 0x8e2   :  { %2010 = dma.vmem_to_hbm [thread:$0]  %s2008_s28, 128, %s3519_s7, [#allocation8]  }
 0x8e3   :  { %2851 = dma.done.wait [#allocation8], 128  }
 0x8e4   :  { %2852 = vsyncadd [#allocation8], 4294967168 }
 0x8e5   :  { %2014 = vsyncpa [#allocation7], 1 }
 0x8e6   :  { %2015 = vsyncpa [#allocation8], 1 }

</bundles_post_ra>
